<compile_context>
chip_gen: v5e
topology: v5e:2x2
jax: 0.10.0
libtpu: 0.0.40
codegen_flags: <defaults>
</compile_context>

<pallas_src>
import math

import jax
import jax.numpy as jnp
from jax.experimental import pallas as pl
from jax.experimental.pallas import tpu as pltpu

# ----------------------- synthetic small CLIP-vision config -----------------------
BATCH = 2
CHANNELS = 3
IMAGE_SIZE = 16
PATCH_SIZE = 4
HIDDEN = 32
NUM_HEADS = 4
HEAD_DIM = HIDDEN // NUM_HEADS
INTERMEDIATE = 64
NUM_LAYERS = 3
SELECT_LAYER = -2          # args.mm_vision_select_layer
SELECT_FEATURE = "patch"   # args.mm_vision_select_feature
LN_EPS = 1e-5
GRID_H = IMAGE_SIZE // PATCH_SIZE
NUM_PATCHES = GRID_H * GRID_H
SEQ = NUM_PATCHES + 1      # CLS token + patches
PATCH_DIM = CHANNELS * PATCH_SIZE * PATCH_SIZE
TOKENS = BATCH * SEQ       # flat residual rows (batch folded into M)

VMEM_LIMIT = 32 * 1024 * 1024   # safe on v5e/v6e (128 MiB) and v7x (64 MiB)


def num_layers_to_compute():
    # HF hidden_states = [embeddings, layer1, ..., layerL]; hidden_states[k]
    # is the output after k layers.  For select_layer=-2 we need L-1 layers.
    if SELECT_LAYER < 0:
        return NUM_LAYERS + 1 + SELECT_LAYER
    return SELECT_LAYER


def _layer_norm(v, g, b):
    mu = jnp.mean(v, axis=-1, keepdims=True)
    var = jnp.mean((v - mu) ** 2, axis=-1, keepdims=True)
    return (v - mu) * jax.lax.rsqrt(var + LN_EPS) * g + b


# ----------------------------------- kernel ---------------------------------------
def fused_tower_kernel(
    patches_ref, emb_bias_ref, mask_ref, patch_w_ref, prew_ref, preb_ref,
    ln1w_ref, ln1b_ref,
    wq_ref, bq_ref, wk_ref, bk_ref, wv_ref, bv_ref, wo_ref, bo_ref,
    ln2w_ref, ln2b_ref, w1_ref, b1_ref, w2_ref, b2_ref,
    o_ref,
):
    """One grid step per encoder layer; embed fused into step 0.

    o_ref (TOKENS, D) f32 has a constant output block index -> it stays resident
    in VMEM across the whole ("arbitrary") layer axis and is the carried
    residual stream; it is written back to HBM once, at the end.
    """
    l = pl.program_id(0)

    @pl.when(l == 0)
    def _embed():
        # CLS rows carry zero pixels (prepared host-side), so one flat matmul
        # over all B*SEQ rows plus the precomputed (cls + positional) bias gives
        # the full embedding.  Single aligned full-block store.
        pe = jnp.dot(patches_ref[...], patch_w_ref[...],
                     preferred_element_type=jnp.float32)            # (N, D)
        o_ref[...] = _layer_norm(pe + emb_bias_ref[...], prew_ref[...], preb_ref[...])

    x = o_ref[...]                 # (N, D) f32 residual
    mask = mask_ref[...]           # (N, N) additive block-diagonal batch mask

    # --- self-attention block ---
    hn = _layer_norm(x, ln1w_ref[...], ln1b_ref[...]).astype(jnp.bfloat16)
    attn = jnp.zeros_like(x)
    # TODO(synk): at real CLIP scale (16 heads, S=577) switch this static head
    # unroll to a fori_loop / head tile axis to bound vreg live ranges.
    for head in range(NUM_HEADS):
        # Head-major packed weights -> per-head Q/K/V with no lane slicing.
        q = jnp.dot(hn, wq_ref[head], preferred_element_type=jnp.float32) + bq_ref[head]
        k = jnp.dot(hn, wk_ref[head], preferred_element_type=jnp.float32) + bk_ref[head]
        v = jnp.dot(hn, wv_ref[head], preferred_element_type=jnp.float32) + bv_ref[head]
        s = jnp.einsum('ne,me->nm', q.astype(jnp.bfloat16), k.astype(jnp.bfloat16),
                       preferred_element_type=jnp.float32) + mask    # (N, N)
        s = s - jnp.max(s, axis=-1, keepdims=True)
        p = jnp.exp(s)
        p = p * pl.reciprocal(jnp.sum(p, axis=-1, keepdims=True), approx=True)
        ctx = jnp.dot(p.astype(jnp.bfloat16), v.astype(jnp.bfloat16),
                      preferred_element_type=jnp.float32)            # (N, E)
        attn = attn + jnp.dot(ctx.astype(jnp.bfloat16), wo_ref[head],
                              preferred_element_type=jnp.float32)    # (N, D)
    x = x + attn + bo_ref[...]

    # --- MLP block (quick_gelu, CLIP default activation) ---
    hn = _layer_norm(x, ln2w_ref[...], ln2b_ref[...]).astype(jnp.bfloat16)
    m = jnp.dot(hn, w1_ref[...], preferred_element_type=jnp.float32) + b1_ref[...]
    m = m * jax.nn.sigmoid(1.702 * m)
    m = jnp.dot(m.astype(jnp.bfloat16), w2_ref[...],
                preferred_element_type=jnp.float32) + b2_ref[...]
    o_ref[...] = x + m


# --------------------------------- pallas wrapper ----------------------------------
def fused_forward(patches_full, emb_bias, attn_mask, kp):
    N = patches_full.shape[0]
    L = kp['wq'].shape[0]

    def const2(shape):
        return pl.BlockSpec(shape, lambda l: (0, 0))

    def lay3(shape):
        return pl.BlockSpec((None,) + shape, lambda l: (l, 0, 0))

    def lay4(shape):
        return pl.BlockSpec((None,) + shape, lambda l: (l, 0, 0, 0))

    in_specs = [
        const2((N, PATCH_DIM)),                   # patches (CLS rows zeroed)
        const2((N, HIDDEN)),                      # cls + positional bias
        const2((N, N)),                           # additive batch mask
        const2((PATCH_DIM, HIDDEN)),              # patch embedding weight
        const2((1, HIDDEN)),                      # pre-LN gamma
        const2((1, HIDDEN)),                      # pre-LN beta
        lay3((1, HIDDEN)),                        # ln1_w
        lay3((1, HIDDEN)),                        # ln1_b
        lay4((NUM_HEADS, HIDDEN, HEAD_DIM)),      # wq  (head-major, scaled)
        lay4((NUM_HEADS, 1, HEAD_DIM)),           # bq
        lay4((NUM_HEADS, HIDDEN, HEAD_DIM)),      # wk
        lay4((NUM_HEADS, 1, HEAD_DIM)),           # bk
        lay4((NUM_HEADS, HIDDEN, HEAD_DIM)),      # wv
        lay4((NUM_HEADS, 1, HEAD_DIM)),           # bv
        lay4((NUM_HEADS, HEAD_DIM, HIDDEN)),      # wo  (head-major)
        lay3((1, HIDDEN)),                        # bo
        lay3((1, HIDDEN)),                        # ln2_w
        lay3((1, HIDDEN)),                        # ln2_b
        lay3((HIDDEN, INTERMEDIATE)),             # w1
        lay3((1, INTERMEDIATE)),                  # b1
        lay3((INTERMEDIATE, HIDDEN)),             # w2
        lay3((1, HIDDEN)),                        # b2
    ]
    return pl.pallas_call(
        fused_tower_kernel,
        out_shape=jax.ShapeDtypeStruct((N, HIDDEN), jnp.float32),
        grid=(L,),
        in_specs=in_specs,
        out_specs=pl.BlockSpec((N, HIDDEN), lambda l: (0, 0)),
        compiler_params=pltpu.CompilerParams(
            dimension_semantics=("arbitrary",),
            vmem_limit_bytes=VMEM_LIMIT),
    )(patches_full, emb_bias, attn_mask,
      kp['patch_w'], kp['pre_ln_w'], kp['pre_ln_b'],
      kp['ln1_w'], kp['ln1_b'],
      kp['wq'], kp['bq'], kp['wk'], kp['bk'], kp['wv'], kp['bv'],
      kp['wo'], kp['bo'], kp['ln2_w'], kp['ln2_b'],
      kp['w1'], kp['b1'], kp['w2'], kp['b2'])


# --------------------------------- full forward ------------------------------------
def clip_vision_tower_forward(kparams, images):
    """images: [B, C, H, W] (NCHW) -> [B, num_patches, hidden]."""
    B = images.shape[0]
    n = num_layers_to_compute()
    assert n >= 1, "fused kernel expects at least one encoder layer"

    x = images.astype(jnp.float32).reshape(
        B, CHANNELS, GRID_H, PATCH_SIZE, GRID_H, PATCH_SIZE)
    # -> [B, Hp, Wp, C, Ph, Pw] -> [B, Np, C*P*P]  (matches conv weight flatten order)
    x = x.transpose(0, 2, 4, 1, 3, 5).reshape(B, NUM_PATCHES, PATCH_DIM)
    # Prepend a zero pixel row per image at the CLS slot so a single flat matmul
    # in-kernel produces the whole (B*SEQ, D) embedding with no scatter/concat.
    patches_full = jnp.concatenate(
        [jnp.zeros((B, 1, PATCH_DIM), jnp.float32), x], axis=1
    ).reshape(B * SEQ, PATCH_DIM).astype(jnp.bfloat16)

    # class-token + positional embedding bias, pre-tiled to the flat row layout.
    emb_row0 = kparams['cls'] + kparams['pos'][0:1]
    emb_bias = jnp.tile(jnp.concatenate([emb_row0, kparams['pos'][1:]], axis=0),
                        (B, 1))                                   # (B*SEQ, D) f32

    # Additive block-diagonal mask: tokens only attend within their own image.
    row_batch = jnp.arange(B * SEQ, dtype=jnp.int32) // SEQ
    attn_mask = jnp.where(row_batch[:, None] == row_batch[None, :],
                          0.0, -1e30).astype(jnp.float32)          # (B*SEQ, B*SEQ)

    feats = fused_forward(patches_full, emb_bias, attn_mask, kparams)
    feats = feats.reshape(B, SEQ, HIDDEN)
    if SELECT_FEATURE == "patch":
        feats = feats[:, 1:]                                       # drop CLS
    return feats.astype(images.dtype)


# --------------------------------- parameters --------------------------------------
def init_params(key):
    """Reference-layout f32 parameters (HF CLIP-vision style)."""
    keys = jax.random.split(key, 8 + NUM_LAYERS)

    def rnd(k, shape, scale=0.02):
        return scale * jax.random.normal(k, shape, dtype=jnp.float32)

    params = {
        'patch_w': rnd(keys[0], (PATCH_DIM, HIDDEN)),
        'cls': rnd(keys[1], (HIDDEN,)),
        'pos': rnd(keys[2], (SEQ, HIDDEN)),
        'pre_ln_w': 1.0 + rnd(keys[3], (HIDDEN,)),
        'pre_ln_b': rnd(keys[4], (HIDDEN,)),
        'layers': [],
    }
    for li in range(NUM_LAYERS):
        lk = jax.random.split(keys[8 + li], 16)
        params['layers'].append({
            'ln1_w': 1.0 + rnd(lk[4], (HIDDEN,)),
            'ln1_b': rnd(lk[5], (HIDDEN,)),
            'wq': rnd(lk[0], (HIDDEN, HIDDEN)),
            'wk': rnd(lk[1], (HIDDEN, HIDDEN)),
            'wv': rnd(lk[2], (HIDDEN, HIDDEN)),
            'wo': rnd(lk[3], (HIDDEN, HIDDEN)),
            'bq': rnd(lk[6], (HIDDEN,)),
            'bk': rnd(lk[7], (HIDDEN,)),
            'bv': rnd(lk[8], (HIDDEN,)),
            'bo': rnd(lk[9], (HIDDEN,)),
            'ln2_w': 1.0 + rnd(lk[10], (HIDDEN,)),
            'ln2_b': rnd(lk[11], (HIDDEN,)),
            'w1': rnd(lk[12], (HIDDEN, INTERMEDIATE)),
            'b1': rnd(lk[13], (INTERMEDIATE,)),
            'w2': rnd(lk[14], (INTERMEDIATE, HIDDEN)),
            'b2': rnd(lk[15], (HIDDEN,)),
        })
    return params


def pack_kernel_params(params):
    """Pack only the consumed layers (select_layer) into stacked [L, ...] arrays,
    repack attention weights head-major, fold the query scale into wq/bq, cast
    matmul weights to bf16."""
    n = num_layers_to_compute()
    layers = params['layers'][:n]
    scale = 1.0 / math.sqrt(HEAD_DIM)

    def heads_in(w):    # (D, D) -> (H, D, E): output columns grouped per head
        return w.reshape(HIDDEN, NUM_HEADS, HEAD_DIM).transpose(1, 0, 2)

    def heads_bias(b):  # (D,) -> (H, 1, E)
        return b.reshape(NUM_HEADS, 1, HEAD_DIM)

    def heads_out(w):   # (D, D) -> (H, E, D): input rows grouped per head
        return w.reshape(NUM_HEADS, HEAD_DIM, HIDDEN)

    def stack(fn):
        return jnp.stack([fn(lp) for lp in layers], axis=0)

    return {
        'patch_w': params['patch_w'].astype(jnp.bfloat16),
        'cls': params['cls'].reshape(1, HIDDEN),
        'pos': params['pos'],
        'pre_ln_w': params['pre_ln_w'].reshape(1, HIDDEN),
        'pre_ln_b': params['pre_ln_b'].reshape(1, HIDDEN),
        'ln1_w': stack(lambda lp: lp['ln1_w'].reshape(1, HIDDEN)),
        'ln1_b': stack(lambda lp: lp['ln1_b'].reshape(1, HIDDEN)),
        'wq': stack(lambda lp: heads_in(lp['wq'] * scale)).astype(jnp.bfloat16),
        'bq': stack(lambda lp: heads_bias(lp['bq'] * scale)),
        'wk': stack(lambda lp: heads_in(lp['wk'])).astype(jnp.bfloat16),
        'bk': stack(lambda lp: heads_bias(lp['bk'])),
        'wv': stack(lambda lp: heads_in(lp['wv'])).astype(jnp.bfloat16),
        'bv': stack(lambda lp: heads_bias(lp['bv'])),
        'wo': stack(lambda lp: heads_out(lp['wo'])).astype(jnp.bfloat16),
        'bo': stack(lambda lp: lp['bo'].reshape(1, HIDDEN)),
        'ln2_w': stack(lambda lp: lp['ln2_w'].reshape(1, HIDDEN)),
        'ln2_b': stack(lambda lp: lp['ln2_b'].reshape(1, HIDDEN)),
        'w1': stack(lambda lp: lp['w1']).astype(jnp.bfloat16),
        'b1': stack(lambda lp: lp['b1'].reshape(1, INTERMEDIATE)),
        'w2': stack(lambda lp: lp['w2']).astype(jnp.bfloat16),
        'b2': stack(lambda lp: lp['b2'].reshape(1, HIDDEN)),
    }


# --------------------------- pure-JAX reference (f32) ------------------------------
def ref_forward(params, images):
    B = images.shape[0]
    x = images.astype(jnp.float32).reshape(
        B, CHANNELS, GRID_H, PATCH_SIZE, GRID_H, PATCH_SIZE)
    x = x.transpose(0, 2, 4, 1, 3, 5).reshape(B, NUM_PATCHES, PATCH_DIM)
    pe = x @ params['patch_w']
    cls = jnp.broadcast_to(params['cls'][None, None, :], (B, 1, HIDDEN))
    h = jnp.concatenate([cls, pe], axis=1) + params['pos'][None]

    def ln(v, w, b):
        mu = v.mean(-1, keepdims=True)
        var = ((v - mu) ** 2).mean(-1, keepdims=True)
        return (v - mu) * jax.lax.rsqrt(var + LN_EPS) * w + b

    h = ln(h, params['pre_ln_w'], params['pre_ln_b'])
    hidden_states = [h]
    for lp in params['layers']:
        x0 = h
        t = ln(x0, lp['ln1_w'], lp['ln1_b'])
        q = ((t @ lp['wq']) + lp['bq']) / math.sqrt(HEAD_DIM)
        k = (t @ lp['wk']) + lp['bk']
        v = (t @ lp['wv']) + lp['bv']
        q = q.reshape(B, SEQ, NUM_HEADS, HEAD_DIM)
        k = k.reshape(B, SEQ, NUM_HEADS, HEAD_DIM)
        v = v.reshape(B, SEQ, NUM_HEADS, HEAD_DIM)
        s = jnp.einsum('bqhe,bkhe->bhqk', q, k)
        p = jax.nn.softmax(s, axis=-1)
        ctx = jnp.einsum('bhqk,bkhe->bqhe', p, v).reshape(B, SEQ, HIDDEN)
        x0 = x0 + (ctx @ lp['wo']) + lp['bo']
        t = ln(x0, lp['ln2_w'], lp['ln2_b'])
        t = (t @ lp['w1']) + lp['b1']
        t = t * jax.nn.sigmoid(1.702 * t)
        x0 = x0 + (t @ lp['w2']) + lp['b2']
        h = x0
        hidden_states.append(h)
    feats = hidden_states[SELECT_LAYER]
    if SELECT_FEATURE == "patch":
        feats = feats[:, 1:]
    return feats.astype(images.dtype)


# --------------------------------------- main --------------------------------------
if __name__ == "__main__":
    key = jax.random.PRNGKey(0)
    pkey, ikey = jax.random.split(key)
    params = init_params(pkey)
    kparams = pack_kernel_params(params)
    images = jax.random.normal(
        ikey, (BATCH, CHANNELS, IMAGE_SIZE, IMAGE_SIZE), dtype=jnp.float32)

    fwd = jax.jit(clip_vision_tower_forward)
    out = jax.block_until_ready(fwd(kparams, images))

    assert out.shape == (BATCH, NUM_PATCHES, HIDDEN), out.shape
    assert bool(jnp.all(jnp.isfinite(out)))

    # Reference is full-f32 / original semantics; the kernel uses bf16 matmul
    # operands (f32 accumulation) and an approximate softmax reciprocal, so the
    # tolerance is relaxed accordingly.
    ref = ref_forward(params, images)
    assert bool(jnp.allclose(out, ref, atol=1e-2, rtol=1e-2)), (
        "mismatch vs pure-JAX reference, max abs diff = "
        f"{float(jnp.max(jnp.abs(out - ref)))}")
    print("KERNEL_OK")
</pallas_src>

<mosaic_0001>
module attributes {stable_mosaic.version = 11 : i64} {
  func.func @fused_tower_kernel(%arg0: i32, %arg1: memref<34x48xbf16, #tpu.memory_space<vmem>>, %arg2: memref<34x32xf32, #tpu.memory_space<vmem>>, %arg3: memref<34x34xf32, #tpu.memory_space<vmem>>, %arg4: memref<48x32xbf16, #tpu.memory_space<vmem>>, %arg5: memref<1x32xf32, #tpu.memory_space<vmem>>, %arg6: memref<1x32xf32, #tpu.memory_space<vmem>>, %arg7: memref<1x1x32xf32, #tpu.memory_space<vmem>>, %arg8: memref<1x1x32xf32, #tpu.memory_space<vmem>>, %arg9: memref<1x4x32x8xbf16, #tpu.memory_space<vmem>>, %arg10: memref<1x4x1x8xf32, #tpu.memory_space<vmem>>, %arg11: memref<1x4x32x8xbf16, #tpu.memory_space<vmem>>, %arg12: memref<1x4x1x8xf32, #tpu.memory_space<vmem>>, %arg13: memref<1x4x32x8xbf16, #tpu.memory_space<vmem>>, %arg14: memref<1x4x1x8xf32, #tpu.memory_space<vmem>>, %arg15: memref<1x4x8x32xbf16, #tpu.memory_space<vmem>>, %arg16: memref<1x1x32xf32, #tpu.memory_space<vmem>>, %arg17: memref<1x1x32xf32, #tpu.memory_space<vmem>>, %arg18: memref<1x1x32xf32, #tpu.memory_space<vmem>>, %arg19: memref<1x32x64xbf16, #tpu.memory_space<vmem>>, %arg20: memref<1x1x64xf32, #tpu.memory_space<vmem>>, %arg21: memref<1x64x32xbf16, #tpu.memory_space<vmem>>, %arg22: memref<1x1x32xf32, #tpu.memory_space<vmem>>, %arg23: memref<34x32xf32, #tpu.memory_space<vmem>>) attributes {dimension_semantics = [#tpu.dimension_semantics<arbitrary>], iteration_bounds = array<i64: 2>, scalar_prefetch = 0 : i64, scratch_operands = 0 : i64, tpu.core_type = #tpu.core_type<tc>, window_params = [{pipeline_mode = #tpu.pipeline_mode<synchronous>, transform_indices = @transform_0, window_bounds = array<i64: 34, 48>}, {pipeline_mode = #tpu.pipeline_mode<synchronous>, transform_indices = @transform_1, window_bounds = array<i64: 34, 32>}, {pipeline_mode = #tpu.pipeline_mode<synchronous>, transform_indices = @transform_2, window_bounds = array<i64: 34, 34>}, {pipeline_mode = #tpu.pipeline_mode<synchronous>, transform_indices = @transform_3, window_bounds = array<i64: 48, 32>}, {pipeline_mode = #tpu.pipeline_mode<synchronous>, transform_indices = @transform_4, window_bounds = array<i64: 1, 32>}, {pipeline_mode = #tpu.pipeline_mode<synchronous>, transform_indices = @transform_5, window_bounds = array<i64: 1, 32>}, {transform_indices = @transform_6, window_bounds = array<i64: 1, 1, 32>}, {transform_indices = @transform_7, window_bounds = array<i64: 1, 1, 32>}, {transform_indices = @transform_8, window_bounds = array<i64: 1, 4, 32, 8>}, {transform_indices = @transform_9, window_bounds = array<i64: 1, 4, 1, 8>}, {transform_indices = @transform_10, window_bounds = array<i64: 1, 4, 32, 8>}, {transform_indices = @transform_11, window_bounds = array<i64: 1, 4, 1, 8>}, {transform_indices = @transform_12, window_bounds = array<i64: 1, 4, 32, 8>}, {transform_indices = @transform_13, window_bounds = array<i64: 1, 4, 1, 8>}, {transform_indices = @transform_14, window_bounds = array<i64: 1, 4, 8, 32>}, {transform_indices = @transform_15, window_bounds = array<i64: 1, 1, 32>}, {transform_indices = @transform_16, window_bounds = array<i64: 1, 1, 32>}, {transform_indices = @transform_17, window_bounds = array<i64: 1, 1, 32>}, {transform_indices = @transform_18, window_bounds = array<i64: 1, 32, 64>}, {transform_indices = @transform_19, window_bounds = array<i64: 1, 1, 64>}, {transform_indices = @transform_20, window_bounds = array<i64: 1, 64, 32>}, {transform_indices = @transform_21, window_bounds = array<i64: 1, 1, 32>}, {pipeline_mode = #tpu.pipeline_mode<synchronous>, transform_indices = @transform_22, window_bounds = array<i64: 34, 32>}]} {
    %c0_i32 = arith.constant 0 : i32
    %0 = arith.cmpi eq, %arg0, %c0_i32 : i32
    %1 = arith.extui %0 : i1 to i32
    %c0_i32_0 = arith.constant 0 : i32
    %2 = arith.cmpi ne, %1, %c0_i32_0 : i32
    scf.if %2 {
      %c0_188 = arith.constant 0 : index
      %c0_189 = arith.constant 0 : index
      %262 = vector.load %arg1[%c0_188, %c0_189] : memref<34x48xbf16, #tpu.memory_space<vmem>>, vector<34x48xbf16>
      %c0_190 = arith.constant 0 : index
      %c0_191 = arith.constant 0 : index
      %263 = vector.load %arg4[%c0_190, %c0_191] : memref<48x32xbf16, #tpu.memory_space<vmem>>, vector<48x32xbf16>
      %cst_192 = arith.constant dense<0.000000e+00> : vector<34x32xf32>
      %264 = tpu.matmul %262, %263, %cst_192 {dimension_numbers = #tpu.dot_dimension_numbers<[1], [0], [0], [1], [0, 0, 1, 1], [], []>} : vector<34x48xbf16>, vector<48x32xbf16>, vector<34x32xf32> -> vector<34x32xf32>
      %c0_193 = arith.constant 0 : index
      %c0_194 = arith.constant 0 : index
      %265 = vector.load %arg2[%c0_193, %c0_194] : memref<34x32xf32, #tpu.memory_space<vmem>>, vector<34x32xf32>
      %266 = arith.addf %264, %265 : vector<34x32xf32>
      %c0_195 = arith.constant 0 : index
      %c0_196 = arith.constant 0 : index
      %267 = vector.load %arg5[%c0_195, %c0_196] : memref<1x32xf32, #tpu.memory_space<vmem>>, vector<1x32xf32>
      %c0_197 = arith.constant 0 : index
      %c0_198 = arith.constant 0 : index
      %268 = vector.load %arg6[%c0_197, %c0_198] : memref<1x32xf32, #tpu.memory_space<vmem>>, vector<1x32xf32>
      %cst_199 = arith.constant dense<0.000000e+00> : vector<34xf32>
      %269 = vector.multi_reduction <add>, %266, %cst_199 [1] : vector<34x32xf32> to vector<34xf32>
      %270 = vector.shape_cast %269 : vector<34xf32> to vector<34x1xf32>
      %cst_200 = arith.constant 3.200000e+01 : f32
      %271 = vector.broadcast %cst_200 : f32 to vector<34x1xf32>
      %272 = arith.divf %270, %271 : vector<34x1xf32>
      %273 = vector.broadcast %272 : vector<34x1xf32> to vector<34x32xf32>
      %274 = arith.subf %266, %273 : vector<34x32xf32>
      %275 = arith.mulf %274, %274 : vector<34x32xf32>
      %cst_201 = arith.constant dense<0.000000e+00> : vector<34xf32>
      %276 = vector.multi_reduction <add>, %275, %cst_201 [1] : vector<34x32xf32> to vector<34xf32>
      %277 = vector.shape_cast %276 : vector<34xf32> to vector<34x1xf32>
      %cst_202 = arith.constant 3.200000e+01 : f32
      %278 = vector.broadcast %cst_202 : f32 to vector<34x1xf32>
      %279 = arith.divf %277, %278 : vector<34x1xf32>
      %280 = vector.broadcast %272 : vector<34x1xf32> to vector<34x32xf32>
      %281 = arith.subf %266, %280 : vector<34x32xf32>
      %cst_203 = arith.constant 9.99999974E-6 : f32
      %282 = vector.broadcast %cst_203 : f32 to vector<34x1xf32>
      %283 = arith.addf %279, %282 : vector<34x1xf32>
      %284 = math.rsqrt %283 : vector<34x1xf32>
      %285 = vector.broadcast %284 : vector<34x1xf32> to vector<34x32xf32>
      %286 = arith.mulf %281, %285 : vector<34x32xf32>
      %287 = vector.broadcast %267 : vector<1x32xf32> to vector<34x32xf32>
      %288 = arith.mulf %286, %287 : vector<34x32xf32>
      %289 = vector.broadcast %268 : vector<1x32xf32> to vector<34x32xf32>
      %290 = arith.addf %288, %289 : vector<34x32xf32>
      %c0_204 = arith.constant 0 : index
      %c0_205 = arith.constant 0 : index
      %291 = vector.load %arg23[%c0_204, %c0_205] : memref<34x32xf32, #tpu.memory_space<vmem>>, vector<34x32xf32>
      tpu.vector_store %arg23[%c0_204, %c0_205], %290 {strides = array<i32>} : memref<34x32xf32, #tpu.memory_space<vmem>>, vector<34x32xf32>,
    } else {
    }
    %c0 = arith.constant 0 : index
    %c0_1 = arith.constant 0 : index
    %3 = vector.load %arg23[%c0, %c0_1] : memref<34x32xf32, #tpu.memory_space<vmem>>, vector<34x32xf32>
    %c0_2 = arith.constant 0 : index
    %c0_3 = arith.constant 0 : index
    %4 = vector.load %arg3[%c0_2, %c0_3] : memref<34x34xf32, #tpu.memory_space<vmem>>, vector<34x34xf32>
    %c0_4 = arith.constant 0 : index
    %c0_5 = arith.constant 0 : index
    %c0_6 = arith.constant 0 : index
    %5 = vector.load %arg7[%c0_4, %c0_5, %c0_6] : memref<1x1x32xf32, #tpu.memory_space<vmem>>, vector<1x1x32xf32>
    %6 = vector.shape_cast %5 : vector<1x1x32xf32> to vector<1x32xf32>
    %c0_7 = arith.constant 0 : index
    %c0_8 = arith.constant 0 : index
    %c0_9 = arith.constant 0 : index
    %7 = vector.load %arg8[%c0_7, %c0_8, %c0_9] : memref<1x1x32xf32, #tpu.memory_space<vmem>>, vector<1x1x32xf32>
    %8 = vector.shape_cast %7 : vector<1x1x32xf32> to vector<1x32xf32>
    %cst = arith.constant dense<0.000000e+00> : vector<34xf32>
    %9 = vector.multi_reduction <add>, %3, %cst [1] : vector<34x32xf32> to vector<34xf32>
    %10 = vector.shape_cast %9 : vector<34xf32> to vector<34x1xf32>
    %cst_10 = arith.constant 3.200000e+01 : f32
    %11 = vector.broadcast %cst_10 : f32 to vector<34x1xf32>
    %12 = arith.divf %10, %11 : vector<34x1xf32>
    %13 = vector.broadcast %12 : vector<34x1xf32> to vector<34x32xf32>
    %14 = arith.subf %3, %13 : vector<34x32xf32>
    %15 = arith.mulf %14, %14 : vector<34x32xf32>
    %cst_11 = arith.constant dense<0.000000e+00> : vector<34xf32>
    %16 = vector.multi_reduction <add>, %15, %cst_11 [1] : vector<34x32xf32> to vector<34xf32>
    %17 = vector.shape_cast %16 : vector<34xf32> to vector<34x1xf32>
    %cst_12 = arith.constant 3.200000e+01 : f32
    %18 = vector.broadcast %cst_12 : f32 to vector<34x1xf32>
    %19 = arith.divf %17, %18 : vector<34x1xf32>
    %20 = vector.broadcast %12 : vector<34x1xf32> to vector<34x32xf32>
    %21 = arith.subf %3, %20 : vector<34x32xf32>
    %cst_13 = arith.constant 9.99999974E-6 : f32
    %22 = vector.broadcast %cst_13 : f32 to vector<34x1xf32>
    %23 = arith.addf %19, %22 : vector<34x1xf32>
    %24 = math.rsqrt %23 : vector<34x1xf32>
    %25 = vector.broadcast %24 : vector<34x1xf32> to vector<34x32xf32>
    %26 = arith.mulf %21, %25 : vector<34x32xf32>
    %27 = vector.broadcast %6 : vector<1x32xf32> to vector<34x32xf32>
    %28 = arith.mulf %26, %27 : vector<34x32xf32>
    %29 = vector.broadcast %8 : vector<1x32xf32> to vector<34x32xf32>
    %30 = arith.addf %28, %29 : vector<34x32xf32>
    %31 = arith.truncf %30 : vector<34x32xf32> to vector<34x32xbf16>
    %cst_14 = arith.constant 0.000000e+00 : f32
    %32 = vector.broadcast %cst_14 : f32 to vector<34x32xf32>
    %c0_15 = arith.constant 0 : index
    %c0_16 = arith.constant 0 : index
    %c0_17 = arith.constant 0 : index
    %c0_18 = arith.constant 0 : index
    %33 = vector.load %arg9[%c0_15, %c0_16, %c0_17, %c0_18] : memref<1x4x32x8xbf16, #tpu.memory_space<vmem>>, vector<1x1x32x8xbf16>
    %34 = vector.shape_cast %33 : vector<1x1x32x8xbf16> to vector<32x8xbf16>
    %cst_19 = arith.constant dense<0.000000e+00> : vector<34x8xf32>
    %35 = tpu.matmul %31, %34, %cst_19 {dimension_numbers = #tpu.dot_dimension_numbers<[1], [0], [0], [1], [0, 0, 1, 1], [], []>} : vector<34x32xbf16>, vector<32x8xbf16>, vector<34x8xf32> -> vector<34x8xf32>
    %c0_20 = arith.constant 0 : index
    %c0_21 = arith.constant 0 : index
    %c0_22 = arith.constant 0 : index
    %c0_23 = arith.constant 0 : index
    %36 = vector.load %arg10[%c0_20, %c0_21, %c0_22, %c0_23] : memref<1x4x1x8xf32, #tpu.memory_space<vmem>>, vector<1x1x1x8xf32>
    %37 = vector.shape_cast %36 : vector<1x1x1x8xf32> to vector<1x8xf32>
    %38 = vector.broadcast %37 : vector<1x8xf32> to vector<34x8xf32>
    %39 = arith.addf %35, %38 : vector<34x8xf32>
    %c0_24 = arith.constant 0 : index
    %c0_25 = arith.constant 0 : index
    %c0_26 = arith.constant 0 : index
    %c0_27 = arith.constant 0 : index
    %40 = vector.load %arg11[%c0_24, %c0_25, %c0_26, %c0_27] : memref<1x4x32x8xbf16, #tpu.memory_space<vmem>>, vector<1x1x32x8xbf16>
    %41 = vector.shape_cast %40 : vector<1x1x32x8xbf16> to vector<32x8xbf16>
    %cst_28 = arith.constant dense<0.000000e+00> : vector<34x8xf32>
    %42 = tpu.matmul %31, %41, %cst_28 {dimension_numbers = #tpu.dot_dimension_numbers<[1], [0], [0], [1], [0, 0, 1, 1], [], []>} : vector<34x32xbf16>, vector<32x8xbf16>, vector<34x8xf32> -> vector<34x8xf32>
    %c0_29 = arith.constant 0 : index
    %c0_30 = arith.constant 0 : index
    %c0_31 = arith.constant 0 : index
    %c0_32 = arith.constant 0 : index
    %43 = vector.load %arg12[%c0_29, %c0_30, %c0_31, %c0_32] : memref<1x4x1x8xf32, #tpu.memory_space<vmem>>, vector<1x1x1x8xf32>
    %44 = vector.shape_cast %43 : vector<1x1x1x8xf32> to vector<1x8xf32>
    %45 = vector.broadcast %44 : vector<1x8xf32> to vector<34x8xf32>
    %46 = arith.addf %42, %45 : vector<34x8xf32>
    %c0_33 = arith.constant 0 : index
    %c0_34 = arith.constant 0 : index
    %c0_35 = arith.constant 0 : index
    %c0_36 = arith.constant 0 : index
    %47 = vector.load %arg13[%c0_33, %c0_34, %c0_35, %c0_36] : memref<1x4x32x8xbf16, #tpu.memory_space<vmem>>, vector<1x1x32x8xbf16>
    %48 = vector.shape_cast %47 : vector<1x1x32x8xbf16> to vector<32x8xbf16>
    %cst_37 = arith.constant dense<0.000000e+00> : vector<34x8xf32>
    %49 = tpu.matmul %31, %48, %cst_37 {dimension_numbers = #tpu.dot_dimension_numbers<[1], [0], [0], [1], [0, 0, 1, 1], [], []>} : vector<34x32xbf16>, vector<32x8xbf16>, vector<34x8xf32> -> vector<34x8xf32>
    %c0_38 = arith.constant 0 : index
    %c0_39 = arith.constant 0 : index
    %c0_40 = arith.constant 0 : index
    %c0_41 = arith.constant 0 : index
    %50 = vector.load %arg14[%c0_38, %c0_39, %c0_40, %c0_41] : memref<1x4x1x8xf32, #tpu.memory_space<vmem>>, vector<1x1x1x8xf32>
    %51 = vector.shape_cast %50 : vector<1x1x1x8xf32> to vector<1x8xf32>
    %52 = vector.broadcast %51 : vector<1x8xf32> to vector<34x8xf32>
    %53 = arith.addf %49, %52 : vector<34x8xf32>
    %54 = arith.truncf %39 : vector<34x8xf32> to vector<34x8xbf16>
    %55 = arith.truncf %46 : vector<34x8xf32> to vector<34x8xbf16>
    "tpu.trace_start"() <{level = 10 : i32, message = "ne,me->nm"}> : () -> ()
    %cst_42 = arith.constant dense<0.000000e+00> : vector<34x34xf32>
    %56 = tpu.matmul %54, %55, %cst_42 {dimension_numbers = #tpu.dot_dimension_numbers<[1], [1], [0], [0], [0, 0, 1, 0], [], []>} : vector<34x8xbf16>, vector<34x8xbf16>, vector<34x34xf32> -> vector<34x34xf32>
    "tpu.trace_stop"() : () -> ()
    %57 = arith.addf %56, %4 : vector<34x34xf32>
    %cst_43 = arith.constant dense<0xFF800000> : vector<34xf32>
    %58 = vector.multi_reduction <maximumf>, %57, %cst_43 [1] : vector<34x34xf32> to vector<34xf32>
    %59 = vector.shape_cast %58 : vector<34xf32> to vector<34x1xf32>
    %60 = vector.broadcast %59 : vector<34x1xf32> to vector<34x34xf32>
    %61 = arith.subf %57, %60 : vector<34x34xf32>
    %62 = math.exp %61 : vector<34x34xf32>
    %cst_44 = arith.constant dense<0.000000e+00> : vector<34xf32>
    %63 = vector.multi_reduction <add>, %62, %cst_44 [1] : vector<34x34xf32> to vector<34xf32>
    %64 = vector.shape_cast %63 : vector<34xf32> to vector<34x1xf32>
    %65 = tpu.reciprocal %64 {approx = true} : vector<34x1xf32> -> vector<34x1xf32>
    %66 = vector.broadcast %65 : vector<34x1xf32> to vector<34x34xf32>
    %67 = arith.mulf %62, %66 : vector<34x34xf32>
    %68 = arith.truncf %67 : vector<34x34xf32> to vector<34x34xbf16>
    %69 = arith.truncf %53 : vector<34x8xf32> to vector<34x8xbf16>
    %cst_45 = arith.constant dense<0.000000e+00> : vector<34x8xf32>
    %70 = tpu.matmul %68, %69, %cst_45 {dimension_numbers = #tpu.dot_dimension_numbers<[1], [0], [0], [1], [0, 0, 1, 1], [], []>} : vector<34x34xbf16>, vector<34x8xbf16>, vector<34x8xf32> -> vector<34x8xf32>
    %71 = arith.truncf %70 : vector<34x8xf32> to vector<34x8xbf16>
    %c0_46 = arith.constant 0 : index
    %c0_47 = arith.constant 0 : index
    %c0_48 = arith.constant 0 : index
    %c0_49 = arith.constant 0 : index
    %72 = vector.load %arg15[%c0_46, %c0_47, %c0_48, %c0_49] : memref<1x4x8x32xbf16, #tpu.memory_space<vmem>>, vector<1x1x8x32xbf16>
    %73 = vector.shape_cast %72 : vector<1x1x8x32xbf16> to vector<8x32xbf16>
    %cst_50 = arith.constant dense<0.000000e+00> : vector<34x32xf32>
    %74 = tpu.matmul %71, %73, %cst_50 {dimension_numbers = #tpu.dot_dimension_numbers<[1], [0], [0], [1], [0, 0, 1, 1], [], []>} : vector<34x8xbf16>, vector<8x32xbf16>, vector<34x32xf32> -> vector<34x32xf32>
    %75 = arith.addf %32, %74 : vector<34x32xf32>
    %c0_51 = arith.constant 0 : index
    %c1 = arith.constant 1 : index
    %c0_52 = arith.constant 0 : index
    %c0_53 = arith.constant 0 : index
    %76 = vector.load %arg9[%c0_51, %c1, %c0_52, %c0_53] : memref<1x4x32x8xbf16, #tpu.memory_space<vmem>>, vector<1x1x32x8xbf16>
    %77 = vector.shape_cast %76 : vector<1x1x32x8xbf16> to vector<32x8xbf16>
    %cst_54 = arith.constant dense<0.000000e+00> : vector<34x8xf32>
    %78 = tpu.matmul %31, %77, %cst_54 {dimension_numbers = #tpu.dot_dimension_numbers<[1], [0], [0], [1], [0, 0, 1, 1], [], []>} : vector<34x32xbf16>, vector<32x8xbf16>, vector<34x8xf32> -> vector<34x8xf32>
    %c0_55 = arith.constant 0 : index
    %c1_56 = arith.constant 1 : index
    %c0_57 = arith.constant 0 : index
    %c0_58 = arith.constant 0 : index
    %79 = vector.load %arg10[%c0_55, %c1_56, %c0_57, %c0_58] : memref<1x4x1x8xf32, #tpu.memory_space<vmem>>, vector<1x1x1x8xf32>
    %80 = vector.shape_cast %79 : vector<1x1x1x8xf32> to vector<1x8xf32>
    %81 = vector.broadcast %80 : vector<1x8xf32> to vector<34x8xf32>
    %82 = arith.addf %78, %81 : vector<34x8xf32>
    %c0_59 = arith.constant 0 : index
    %c1_60 = arith.constant 1 : index
    %c0_61 = arith.constant 0 : index
    %c0_62 = arith.constant 0 : index
    %83 = vector.load %arg11[%c0_59, %c1_60, %c0_61, %c0_62] : memref<1x4x32x8xbf16, #tpu.memory_space<vmem>>, vector<1x1x32x8xbf16>
    %84 = vector.shape_cast %83 : vector<1x1x32x8xbf16> to vector<32x8xbf16>
    %cst_63 = arith.constant dense<0.000000e+00> : vector<34x8xf32>
    %85 = tpu.matmul %31, %84, %cst_63 {dimension_numbers = #tpu.dot_dimension_numbers<[1], [0], [0], [1], [0, 0, 1, 1], [], []>} : vector<34x32xbf16>, vector<32x8xbf16>, vector<34x8xf32> -> vector<34x8xf32>
    %c0_64 = arith.constant 0 : index
    %c1_65 = arith.constant 1 : index
    %c0_66 = arith.constant 0 : index
    %c0_67 = arith.constant 0 : index
    %86 = vector.load %arg12[%c0_64, %c1_65, %c0_66, %c0_67] : memref<1x4x1x8xf32, #tpu.memory_space<vmem>>, vector<1x1x1x8xf32>
    %87 = vector.shape_cast %86 : vector<1x1x1x8xf32> to vector<1x8xf32>
    %88 = vector.broadcast %87 : vector<1x8xf32> to vector<34x8xf32>
    %89 = arith.addf %85, %88 : vector<34x8xf32>
    %c0_68 = arith.constant 0 : index
    %c1_69 = arith.constant 1 : index
    %c0_70 = arith.constant 0 : index
    %c0_71 = arith.constant 0 : index
    %90 = vector.load %arg13[%c0_68, %c1_69, %c0_70, %c0_71] : memref<1x4x32x8xbf16, #tpu.memory_space<vmem>>, vector<1x1x32x8xbf16>
    %91 = vector.shape_cast %90 : vector<1x1x32x8xbf16> to vector<32x8xbf16>
    %cst_72 = arith.constant dense<0.000000e+00> : vector<34x8xf32>
    %92 = tpu.matmul %31, %91, %cst_72 {dimension_numbers = #tpu.dot_dimension_numbers<[1], [0], [0], [1], [0, 0, 1, 1], [], []>} : vector<34x32xbf16>, vector<32x8xbf16>, vector<34x8xf32> -> vector<34x8xf32>
    %c0_73 = arith.constant 0 : index
    %c1_74 = arith.constant 1 : index
    %c0_75 = arith.constant 0 : index
    %c0_76 = arith.constant 0 : index
    %93 = vector.load %arg14[%c0_73, %c1_74, %c0_75, %c0_76] : memref<1x4x1x8xf32, #tpu.memory_space<vmem>>, vector<1x1x1x8xf32>
    %94 = vector.shape_cast %93 : vector<1x1x1x8xf32> to vector<1x8xf32>
    %95 = vector.broadcast %94 : vector<1x8xf32> to vector<34x8xf32>
    %96 = arith.addf %92, %95 : vector<34x8xf32>
    %97 = arith.truncf %82 : vector<34x8xf32> to vector<34x8xbf16>
    %98 = arith.truncf %89 : vector<34x8xf32> to vector<34x8xbf16>
    "tpu.trace_start"() <{level = 10 : i32, message = "ne,me->nm"}> : () -> ()
    %cst_77 = arith.constant dense<0.000000e+00> : vector<34x34xf32>
    %99 = tpu.matmul %97, %98, %cst_77 {dimension_numbers = #tpu.dot_dimension_numbers<[1], [1], [0], [0], [0, 0, 1, 0], [], []>} : vector<34x8xbf16>, vector<34x8xbf16>, vector<34x34xf32> -> vector<34x34xf32>
    "tpu.trace_stop"() : () -> ()
    %100 = arith.addf %99, %4 : vector<34x34xf32>
    %cst_78 = arith.constant dense<0xFF800000> : vector<34xf32>
    %101 = vector.multi_reduction <maximumf>, %100, %cst_78 [1] : vector<34x34xf32> to vector<34xf32>
    %102 = vector.shape_cast %101 : vector<34xf32> to vector<34x1xf32>
    %103 = vector.broadcast %102 : vector<34x1xf32> to vector<34x34xf32>
    %104 = arith.subf %100, %103 : vector<34x34xf32>
    %105 = math.exp %104 : vector<34x34xf32>
    %cst_79 = arith.constant dense<0.000000e+00> : vector<34xf32>
    %106 = vector.multi_reduction <add>, %105, %cst_79 [1] : vector<34x34xf32> to vector<34xf32>
    %107 = vector.shape_cast %106 : vector<34xf32> to vector<34x1xf32>
    %108 = tpu.reciprocal %107 {approx = true} : vector<34x1xf32> -> vector<34x1xf32>
    %109 = vector.broadcast %108 : vector<34x1xf32> to vector<34x34xf32>
    %110 = arith.mulf %105, %109 : vector<34x34xf32>
    %111 = arith.truncf %110 : vector<34x34xf32> to vector<34x34xbf16>
    %112 = arith.truncf %96 : vector<34x8xf32> to vector<34x8xbf16>
    %cst_80 = arith.constant dense<0.000000e+00> : vector<34x8xf32>
    %113 = tpu.matmul %111, %112, %cst_80 {dimension_numbers = #tpu.dot_dimension_numbers<[1], [0], [0], [1], [0, 0, 1, 1], [], []>} : vector<34x34xbf16>, vector<34x8xbf16>, vector<34x8xf32> -> vector<34x8xf32>
    %114 = arith.truncf %113 : vector<34x8xf32> to vector<34x8xbf16>
    %c0_81 = arith.constant 0 : index
    %c1_82 = arith.constant 1 : index
    %c0_83 = arith.constant 0 : index
    %c0_84 = arith.constant 0 : index
    %115 = vector.load %arg15[%c0_81, %c1_82, %c0_83, %c0_84] : memref<1x4x8x32xbf16, #tpu.memory_space<vmem>>, vector<1x1x8x32xbf16>
    %116 = vector.shape_cast %115 : vector<1x1x8x32xbf16> to vector<8x32xbf16>
    %cst_85 = arith.constant dense<0.000000e+00> : vector<34x32xf32>
    %117 = tpu.matmul %114, %116, %cst_85 {dimension_numbers = #tpu.dot_dimension_numbers<[1], [0], [0], [1], [0, 0, 1, 1], [], []>} : vector<34x8xbf16>, vector<8x32xbf16>, vector<34x32xf32> -> vector<34x32xf32>
    %118 = arith.addf %75, %117 : vector<34x32xf32>
    %c0_86 = arith.constant 0 : index
    %c2 = arith.constant 2 : index
    %c0_87 = arith.constant 0 : index
    %c0_88 = arith.constant 0 : index
    %119 = vector.load %arg9[%c0_86, %c2, %c0_87, %c0_88] : memref<1x4x32x8xbf16, #tpu.memory_space<vmem>>, vector<1x1x32x8xbf16>
    %120 = vector.shape_cast %119 : vector<1x1x32x8xbf16> to vector<32x8xbf16>
    %cst_89 = arith.constant dense<0.000000e+00> : vector<34x8xf32>
    %121 = tpu.matmul %31, %120, %cst_89 {dimension_numbers = #tpu.dot_dimension_numbers<[1], [0], [0], [1], [0, 0, 1, 1], [], []>} : vector<34x32xbf16>, vector<32x8xbf16>, vector<34x8xf32> -> vector<34x8xf32>
    %c0_90 = arith.constant 0 : index
    %c2_91 = arith.constant 2 : index
    %c0_92 = arith.constant 0 : index
    %c0_93 = arith.constant 0 : index
    %122 = vector.load %arg10[%c0_90, %c2_91, %c0_92, %c0_93] : memref<1x4x1x8xf32, #tpu.memory_space<vmem>>, vector<1x1x1x8xf32>
    %123 = vector.shape_cast %122 : vector<1x1x1x8xf32> to vector<1x8xf32>
    %124 = vector.broadcast %123 : vector<1x8xf32> to vector<34x8xf32>
    %125 = arith.addf %121, %124 : vector<34x8xf32>
    %c0_94 = arith.constant 0 : index
    %c2_95 = arith.constant 2 : index
    %c0_96 = arith.constant 0 : index
    %c0_97 = arith.constant 0 : index
    %126 = vector.load %arg11[%c0_94, %c2_95, %c0_96, %c0_97] : memref<1x4x32x8xbf16, #tpu.memory_space<vmem>>, vector<1x1x32x8xbf16>
    %127 = vector.shape_cast %126 : vector<1x1x32x8xbf16> to vector<32x8xbf16>
    %cst_98 = arith.constant dense<0.000000e+00> : vector<34x8xf32>
    %128 = tpu.matmul %31, %127, %cst_98 {dimension_numbers = #tpu.dot_dimension_numbers<[1], [0], [0], [1], [0, 0, 1, 1], [], []>} : vector<34x32xbf16>, vector<32x8xbf16>, vector<34x8xf32> -> vector<34x8xf32>
    %c0_99 = arith.constant 0 : index
    %c2_100 = arith.constant 2 : index
    %c0_101 = arith.constant 0 : index
    %c0_102 = arith.constant 0 : index
    %129 = vector.load %arg12[%c0_99, %c2_100, %c0_101, %c0_102] : memref<1x4x1x8xf32, #tpu.memory_space<vmem>>, vector<1x1x1x8xf32>
    %130 = vector.shape_cast %129 : vector<1x1x1x8xf32> to vector<1x8xf32>
    %131 = vector.broadcast %130 : vector<1x8xf32> to vector<34x8xf32>
    %132 = arith.addf %128, %131 : vector<34x8xf32>
    %c0_103 = arith.constant 0 : index
    %c2_104 = arith.constant 2 : index
    %c0_105 = arith.constant 0 : index
    %c0_106 = arith.constant 0 : index
    %133 = vector.load %arg13[%c0_103, %c2_104, %c0_105, %c0_106] : memref<1x4x32x8xbf16, #tpu.memory_space<vmem>>, vector<1x1x32x8xbf16>
    %134 = vector.shape_cast %133 : vector<1x1x32x8xbf16> to vector<32x8xbf16>
    %cst_107 = arith.constant dense<0.000000e+00> : vector<34x8xf32>
    %135 = tpu.matmul %31, %134, %cst_107 {dimension_numbers = #tpu.dot_dimension_numbers<[1], [0], [0], [1], [0, 0, 1, 1], [], []>} : vector<34x32xbf16>, vector<32x8xbf16>, vector<34x8xf32> -> vector<34x8xf32>
    %c0_108 = arith.constant 0 : index
    %c2_109 = arith.constant 2 : index
    %c0_110 = arith.constant 0 : index
    %c0_111 = arith.constant 0 : index
    %136 = vector.load %arg14[%c0_108, %c2_109, %c0_110, %c0_111] : memref<1x4x1x8xf32, #tpu.memory_space<vmem>>, vector<1x1x1x8xf32>
    %137 = vector.shape_cast %136 : vector<1x1x1x8xf32> to vector<1x8xf32>
    %138 = vector.broadcast %137 : vector<1x8xf32> to vector<34x8xf32>
    %139 = arith.addf %135, %138 : vector<34x8xf32>
    %140 = arith.truncf %125 : vector<34x8xf32> to vector<34x8xbf16>
    %141 = arith.truncf %132 : vector<34x8xf32> to vector<34x8xbf16>
    "tpu.trace_start"() <{level = 10 : i32, message = "ne,me->nm"}> : () -> ()
    %cst_112 = arith.constant dense<0.000000e+00> : vector<34x34xf32>
    %142 = tpu.matmul %140, %141, %cst_112 {dimension_numbers = #tpu.dot_dimension_numbers<[1], [1], [0], [0], [0, 0, 1, 0], [], []>} : vector<34x8xbf16>, vector<34x8xbf16>, vector<34x34xf32> -> vector<34x34xf32>
    "tpu.trace_stop"() : () -> ()
    %143 = arith.addf %142, %4 : vector<34x34xf32>
    %cst_113 = arith.constant dense<0xFF800000> : vector<34xf32>
    %144 = vector.multi_reduction <maximumf>, %143, %cst_113 [1] : vector<34x34xf32> to vector<34xf32>
    %145 = vector.shape_cast %144 : vector<34xf32> to vector<34x1xf32>
    %146 = vector.broadcast %145 : vector<34x1xf32> to vector<34x34xf32>
    %147 = arith.subf %143, %146 : vector<34x34xf32>
    %148 = math.exp %147 : vector<34x34xf32>
    %cst_114 = arith.constant dense<0.000000e+00> : vector<34xf32>
    %149 = vector.multi_reduction <add>, %148, %cst_114 [1] : vector<34x34xf32> to vector<34xf32>
    %150 = vector.shape_cast %149 : vector<34xf32> to vector<34x1xf32>
    %151 = tpu.reciprocal %150 {approx = true} : vector<34x1xf32> -> vector<34x1xf32>
    %152 = vector.broadcast %151 : vector<34x1xf32> to vector<34x34xf32>
    %153 = arith.mulf %148, %152 : vector<34x34xf32>
    %154 = arith.truncf %153 : vector<34x34xf32> to vector<34x34xbf16>
    %155 = arith.truncf %139 : vector<34x8xf32> to vector<34x8xbf16>
    %cst_115 = arith.constant dense<0.000000e+00> : vector<34x8xf32>
    %156 = tpu.matmul %154, %155, %cst_115 {dimension_numbers = #tpu.dot_dimension_numbers<[1], [0], [0], [1], [0, 0, 1, 1], [], []>} : vector<34x34xbf16>, vector<34x8xbf16>, vector<34x8xf32> -> vector<34x8xf32>
    %157 = arith.truncf %156 : vector<34x8xf32> to vector<34x8xbf16>
    %c0_116 = arith.constant 0 : index
    %c2_117 = arith.constant 2 : index
    %c0_118 = arith.constant 0 : index
    %c0_119 = arith.constant 0 : index
    %158 = vector.load %arg15[%c0_116, %c2_117, %c0_118, %c0_119] : memref<1x4x8x32xbf16, #tpu.memory_space<vmem>>, vector<1x1x8x32xbf16>
    %159 = vector.shape_cast %158 : vector<1x1x8x32xbf16> to vector<8x32xbf16>
    %cst_120 = arith.constant dense<0.000000e+00> : vector<34x32xf32>
    %160 = tpu.matmul %157, %159, %cst_120 {dimension_numbers = #tpu.dot_dimension_numbers<[1], [0], [0], [1], [0, 0, 1, 1], [], []>} : vector<34x8xbf16>, vector<8x32xbf16>, vector<34x32xf32> -> vector<34x32xf32>
    %161 = arith.addf %118, %160 : vector<34x32xf32>
    %c0_121 = arith.constant 0 : index
    %c3 = arith.constant 3 : index
    %c0_122 = arith.constant 0 : index
    %c0_123 = arith.constant 0 : index
    %162 = vector.load %arg9[%c0_121, %c3, %c0_122, %c0_123] : memref<1x4x32x8xbf16, #tpu.memory_space<vmem>>, vector<1x1x32x8xbf16>
    %163 = vector.shape_cast %162 : vector<1x1x32x8xbf16> to vector<32x8xbf16>
    %cst_124 = arith.constant dense<0.000000e+00> : vector<34x8xf32>
    %164 = tpu.matmul %31, %163, %cst_124 {dimension_numbers = #tpu.dot_dimension_numbers<[1], [0], [0], [1], [0, 0, 1, 1], [], []>} : vector<34x32xbf16>, vector<32x8xbf16>, vector<34x8xf32> -> vector<34x8xf32>
    %c0_125 = arith.constant 0 : index
    %c3_126 = arith.constant 3 : index
    %c0_127 = arith.constant 0 : index
    %c0_128 = arith.constant 0 : index
    %165 = vector.load %arg10[%c0_125, %c3_126, %c0_127, %c0_128] : memref<1x4x1x8xf32, #tpu.memory_space<vmem>>, vector<1x1x1x8xf32>
    %166 = vector.shape_cast %165 : vector<1x1x1x8xf32> to vector<1x8xf32>
    %167 = vector.broadcast %166 : vector<1x8xf32> to vector<34x8xf32>
    %168 = arith.addf %164, %167 : vector<34x8xf32>
    %c0_129 = arith.constant 0 : index
    %c3_130 = arith.constant 3 : index
    %c0_131 = arith.constant 0 : index
    %c0_132 = arith.constant 0 : index
    %169 = vector.load %arg11[%c0_129, %c3_130, %c0_131, %c0_132] : memref<1x4x32x8xbf16, #tpu.memory_space<vmem>>, vector<1x1x32x8xbf16>
    %170 = vector.shape_cast %169 : vector<1x1x32x8xbf16> to vector<32x8xbf16>
    %cst_133 = arith.constant dense<0.000000e+00> : vector<34x8xf32>
    %171 = tpu.matmul %31, %170, %cst_133 {dimension_numbers = #tpu.dot_dimension_numbers<[1], [0], [0], [1], [0, 0, 1, 1], [], []>} : vector<34x32xbf16>, vector<32x8xbf16>, vector<34x8xf32> -> vector<34x8xf32>
    %c0_134 = arith.constant 0 : index
    %c3_135 = arith.constant 3 : index
    %c0_136 = arith.constant 0 : index
    %c0_137 = arith.constant 0 : index
    %172 = vector.load %arg12[%c0_134, %c3_135, %c0_136, %c0_137] : memref<1x4x1x8xf32, #tpu.memory_space<vmem>>, vector<1x1x1x8xf32>
    %173 = vector.shape_cast %172 : vector<1x1x1x8xf32> to vector<1x8xf32>
    %174 = vector.broadcast %173 : vector<1x8xf32> to vector<34x8xf32>
    %175 = arith.addf %171, %174 : vector<34x8xf32>
    %c0_138 = arith.constant 0 : index
    %c3_139 = arith.constant 3 : index
    %c0_140 = arith.constant 0 : index
    %c0_141 = arith.constant 0 : index
    %176 = vector.load %arg13[%c0_138, %c3_139, %c0_140, %c0_141] : memref<1x4x32x8xbf16, #tpu.memory_space<vmem>>, vector<1x1x32x8xbf16>
    %177 = vector.shape_cast %176 : vector<1x1x32x8xbf16> to vector<32x8xbf16>
    %cst_142 = arith.constant dense<0.000000e+00> : vector<34x8xf32>
    %178 = tpu.matmul %31, %177, %cst_142 {dimension_numbers = #tpu.dot_dimension_numbers<[1], [0], [0], [1], [0, 0, 1, 1], [], []>} : vector<34x32xbf16>, vector<32x8xbf16>, vector<34x8xf32> -> vector<34x8xf32>
    %c0_143 = arith.constant 0 : index
    %c3_144 = arith.constant 3 : index
    %c0_145 = arith.constant 0 : index
    %c0_146 = arith.constant 0 : index
    %179 = vector.load %arg14[%c0_143, %c3_144, %c0_145, %c0_146] : memref<1x4x1x8xf32, #tpu.memory_space<vmem>>, vector<1x1x1x8xf32>
    %180 = vector.shape_cast %179 : vector<1x1x1x8xf32> to vector<1x8xf32>
    %181 = vector.broadcast %180 : vector<1x8xf32> to vector<34x8xf32>
    %182 = arith.addf %178, %181 : vector<34x8xf32>
    %183 = arith.truncf %168 : vector<34x8xf32> to vector<34x8xbf16>
    %184 = arith.truncf %175 : vector<34x8xf32> to vector<34x8xbf16>
    "tpu.trace_start"() <{level = 10 : i32, message = "ne,me->nm"}> : () -> ()
    %cst_147 = arith.constant dense<0.000000e+00> : vector<34x34xf32>
    %185 = tpu.matmul %183, %184, %cst_147 {dimension_numbers = #tpu.dot_dimension_numbers<[1], [1], [0], [0], [0, 0, 1, 0], [], []>} : vector<34x8xbf16>, vector<34x8xbf16>, vector<34x34xf32> -> vector<34x34xf32>
    "tpu.trace_stop"() : () -> ()
    %186 = arith.addf %185, %4 : vector<34x34xf32>
    %cst_148 = arith.constant dense<0xFF800000> : vector<34xf32>
    %187 = vector.multi_reduction <maximumf>, %186, %cst_148 [1] : vector<34x34xf32> to vector<34xf32>
    %188 = vector.shape_cast %187 : vector<34xf32> to vector<34x1xf32>
    %189 = vector.broadcast %188 : vector<34x1xf32> to vector<34x34xf32>
    %190 = arith.subf %186, %189 : vector<34x34xf32>
    %191 = math.exp %190 : vector<34x34xf32>
    %cst_149 = arith.constant dense<0.000000e+00> : vector<34xf32>
    %192 = vector.multi_reduction <add>, %191, %cst_149 [1] : vector<34x34xf32> to vector<34xf32>
    %193 = vector.shape_cast %192 : vector<34xf32> to vector<34x1xf32>
    %194 = tpu.reciprocal %193 {approx = true} : vector<34x1xf32> -> vector<34x1xf32>
    %195 = vector.broadcast %194 : vector<34x1xf32> to vector<34x34xf32>
    %196 = arith.mulf %191, %195 : vector<34x34xf32>
    %197 = arith.truncf %196 : vector<34x34xf32> to vector<34x34xbf16>
    %198 = arith.truncf %182 : vector<34x8xf32> to vector<34x8xbf16>
    %cst_150 = arith.constant dense<0.000000e+00> : vector<34x8xf32>
    %199 = tpu.matmul %197, %198, %cst_150 {dimension_numbers = #tpu.dot_dimension_numbers<[1], [0], [0], [1], [0, 0, 1, 1], [], []>} : vector<34x34xbf16>, vector<34x8xbf16>, vector<34x8xf32> -> vector<34x8xf32>
    %200 = arith.truncf %199 : vector<34x8xf32> to vector<34x8xbf16>
    %c0_151 = arith.constant 0 : index
    %c3_152 = arith.constant 3 : index
    %c0_153 = arith.constant 0 : index
    %c0_154 = arith.constant 0 : index
    %201 = vector.load %arg15[%c0_151, %c3_152, %c0_153, %c0_154] : memref<1x4x8x32xbf16, #tpu.memory_space<vmem>>, vector<1x1x8x32xbf16>
    %202 = vector.shape_cast %201 : vector<1x1x8x32xbf16> to vector<8x32xbf16>
    %cst_155 = arith.constant dense<0.000000e+00> : vector<34x32xf32>
    %203 = tpu.matmul %200, %202, %cst_155 {dimension_numbers = #tpu.dot_dimension_numbers<[1], [0], [0], [1], [0, 0, 1, 1], [], []>} : vector<34x8xbf16>, vector<8x32xbf16>, vector<34x32xf32> -> vector<34x32xf32>
    %204 = arith.addf %161, %203 : vector<34x32xf32>
    %205 = arith.addf %3, %204 : vector<34x32xf32>
    %c0_156 = arith.constant 0 : index
    %c0_157 = arith.constant 0 : index
    %c0_158 = arith.constant 0 : index
    %206 = vector.load %arg16[%c0_156, %c0_157, %c0_158] : memref<1x1x32xf32, #tpu.memory_space<vmem>>, vector<1x1x32xf32>
    %207 = vector.shape_cast %206 : vector<1x1x32xf32> to vector<1x32xf32>
    %208 = vector.broadcast %207 : vector<1x32xf32> to vector<34x32xf32>
    %209 = arith.addf %205, %208 : vector<34x32xf32>
    %c0_159 = arith.constant 0 : index
    %c0_160 = arith.constant 0 : index
    %c0_161 = arith.constant 0 : index
    %210 = vector.load %arg17[%c0_159, %c0_160, %c0_161] : memref<1x1x32xf32, #tpu.memory_space<vmem>>, vector<1x1x32xf32>
    %211 = vector.shape_cast %210 : vector<1x1x32xf32> to vector<1x32xf32>
    %c0_162 = arith.constant 0 : index
    %c0_163 = arith.constant 0 : index
    %c0_164 = arith.constant 0 : index
    %212 = vector.load %arg18[%c0_162, %c0_163, %c0_164] : memref<1x1x32xf32, #tpu.memory_space<vmem>>, vector<1x1x32xf32>
    %213 = vector.shape_cast %212 : vector<1x1x32xf32> to vector<1x32xf32>
    %cst_165 = arith.constant dense<0.000000e+00> : vector<34xf32>
    %214 = vector.multi_reduction <add>, %209, %cst_165 [1] : vector<34x32xf32> to vector<34xf32>
    %215 = vector.shape_cast %214 : vector<34xf32> to vector<34x1xf32>
    %cst_166 = arith.constant 3.200000e+01 : f32
    %216 = vector.broadcast %cst_166 : f32 to vector<34x1xf32>
    %217 = arith.divf %215, %216 : vector<34x1xf32>
    %218 = vector.broadcast %217 : vector<34x1xf32> to vector<34x32xf32>
    %219 = arith.subf %209, %218 : vector<34x32xf32>
    %220 = arith.mulf %219, %219 : vector<34x32xf32>
    %cst_167 = arith.constant dense<0.000000e+00> : vector<34xf32>
    %221 = vector.multi_reduction <add>, %220, %cst_167 [1] : vector<34x32xf32> to vector<34xf32>
    %222 = vector.shape_cast %221 : vector<34xf32> to vector<34x1xf32>
    %cst_168 = arith.constant 3.200000e+01 : f32
    %223 = vector.broadcast %cst_168 : f32 to vector<34x1xf32>
    %224 = arith.divf %222, %223 : vector<34x1xf32>
    %225 = vector.broadcast %217 : vector<34x1xf32> to vector<34x32xf32>
    %226 = arith.subf %209, %225 : vector<34x32xf32>
    %cst_169 = arith.constant 9.99999974E-6 : f32
    %227 = vector.broadcast %cst_169 : f32 to vector<34x1xf32>
    %228 = arith.addf %224, %227 : vector<34x1xf32>
    %229 = math.rsqrt %228 : vector<34x1xf32>
    %230 = vector.broadcast %229 : vector<34x1xf32> to vector<34x32xf32>
    %231 = arith.mulf %226, %230 : vector<34x32xf32>
    %232 = vector.broadcast %211 : vector<1x32xf32> to vector<34x32xf32>
    %233 = arith.mulf %231, %232 : vector<34x32xf32>
    %234 = vector.broadcast %213 : vector<1x32xf32> to vector<34x32xf32>
    %235 = arith.addf %233, %234 : vector<34x32xf32>
    %236 = arith.truncf %235 : vector<34x32xf32> to vector<34x32xbf16>
    %c0_170 = arith.constant 0 : index
    %c0_171 = arith.constant 0 : index
    %c0_172 = arith.constant 0 : index
    %237 = vector.load %arg19[%c0_170, %c0_171, %c0_172] : memref<1x32x64xbf16, #tpu.memory_space<vmem>>, vector<1x32x64xbf16>
    %238 = vector.shape_cast %237 : vector<1x32x64xbf16> to vector<32x64xbf16>
    %cst_173 = arith.constant dense<0.000000e+00> : vector<34x64xf32>
    %239 = tpu.matmul %236, %238, %cst_173 {dimension_numbers = #tpu.dot_dimension_numbers<[1], [0], [0], [1], [0, 0, 1, 1], [], []>} : vector<34x32xbf16>, vector<32x64xbf16>, vector<34x64xf32> -> vector<34x64xf32>
    %c0_174 = arith.constant 0 : index
    %c0_175 = arith.constant 0 : index
    %c0_176 = arith.constant 0 : index
    %240 = vector.load %arg20[%c0_174, %c0_175, %c0_176] : memref<1x1x64xf32, #tpu.memory_space<vmem>>, vector<1x1x64xf32>
    %241 = vector.shape_cast %240 : vector<1x1x64xf32> to vector<1x64xf32>
    %242 = vector.broadcast %241 : vector<1x64xf32> to vector<34x64xf32>
    %243 = arith.addf %239, %242 : vector<34x64xf32>
    %cst_177 = arith.constant 1.702000e+00 : f32
    %244 = vector.broadcast %cst_177 : f32 to vector<34x64xf32>
    %245 = arith.mulf %244, %243 : vector<34x64xf32>
    %246 = arith.negf %245 : vector<34x64xf32>
    %247 = math.exp %246 : vector<34x64xf32>
    %cst_178 = arith.constant 1.000000e+00 : f32
    %248 = vector.broadcast %cst_178 : f32 to vector<34x64xf32>
    %249 = arith.addf %248, %247 : vector<34x64xf32>
    %250 = arith.divf %248, %249 : vector<34x64xf32>
    %251 = arith.mulf %243, %250 : vector<34x64xf32>
    %252 = arith.truncf %251 : vector<34x64xf32> to vector<34x64xbf16>
    %c0_179 = arith.constant 0 : index
    %c0_180 = arith.constant 0 : index
    %c0_181 = arith.constant 0 : index
    %253 = vector.load %arg21[%c0_179, %c0_180, %c0_181] : memref<1x64x32xbf16, #tpu.memory_space<vmem>>, vector<1x64x32xbf16>
    %254 = vector.shape_cast %253 : vector<1x64x32xbf16> to vector<64x32xbf16>
    %cst_182 = arith.constant dense<0.000000e+00> : vector<34x32xf32>
    %255 = tpu.matmul %252, %254, %cst_182 {dimension_numbers = #tpu.dot_dimension_numbers<[1], [0], [0], [1], [0, 0, 1, 1], [], []>} : vector<34x64xbf16>, vector<64x32xbf16>, vector<34x32xf32> -> vector<34x32xf32>
    %c0_183 = arith.constant 0 : index
    %c0_184 = arith.constant 0 : index
    %c0_185 = arith.constant 0 : index
    %256 = vector.load %arg22[%c0_183, %c0_184, %c0_185] : memref<1x1x32xf32, #tpu.memory_space<vmem>>, vector<1x1x32xf32>
    %257 = vector.shape_cast %256 : vector<1x1x32xf32> to vector<1x32xf32>
    %258 = vector.broadcast %257 : vector<1x32xf32> to vector<34x32xf32>
    %259 = arith.addf %255, %258 : vector<34x32xf32>
    %260 = arith.addf %209, %259 : vector<34x32xf32>
    %c0_186 = arith.constant 0 : index
    %c0_187 = arith.constant 0 : index
    %261 = vector.load %arg23[%c0_186, %c0_187] : memref<34x32xf32, #tpu.memory_space<vmem>>, vector<34x32xf32>
    tpu.vector_store %arg23[%c0_186, %c0_187], %260 {strides = array<i32>} : memref<34x32xf32, #tpu.memory_space<vmem>>, vector<34x32xf32>,
    return
  }
  func.func @transform_0(%arg0: i32) -> (i32, i32) {
    %c0_i32 = arith.constant 0 : i32
    %c0_i32_0 = arith.constant 0 : i32
    %c0_i32_1 = arith.constant 0 : i32
    return %c0_i32, %c0_i32_0 : i32, i32
  }
  func.func @transform_1(%arg0: i32) -> (i32, i32) {
    %c0_i32 = arith.constant 0 : i32
    %c0_i32_0 = arith.constant 0 : i32
    %c0_i32_1 = arith.constant 0 : i32
    return %c0_i32, %c0_i32_0 : i32, i32
  }
  func.func @transform_2(%arg0: i32) -> (i32, i32) {
    %c0_i32 = arith.constant 0 : i32
    %c0_i32_0 = arith.constant 0 : i32
    %c0_i32_1 = arith.constant 0 : i32
    return %c0_i32, %c0_i32_0 : i32, i32
  }
  func.func @transform_3(%arg0: i32) -> (i32, i32) {
    %c0_i32 = arith.constant 0 : i32
    %c0_i32_0 = arith.constant 0 : i32
    %c0_i32_1 = arith.constant 0 : i32
    return %c0_i32, %c0_i32_0 : i32, i32
  }
  func.func @transform_4(%arg0: i32) -> (i32, i32) {
    %c0_i32 = arith.constant 0 : i32
    %c0_i32_0 = arith.constant 0 : i32
    %c0_i32_1 = arith.constant 0 : i32
    return %c0_i32, %c0_i32_0 : i32, i32
  }
  func.func @transform_5(%arg0: i32) -> (i32, i32) {
    %c0_i32 = arith.constant 0 : i32
    %c0_i32_0 = arith.constant 0 : i32
    %c0_i32_1 = arith.constant 0 : i32
    return %c0_i32, %c0_i32_0 : i32, i32
  }
  func.func @transform_6(%arg0: i32) -> (i32, i32, i32) {
    %c0_i32 = arith.constant 0 : i32
    %c0_i32_0 = arith.constant 0 : i32
    %c0_i32_1 = arith.constant 0 : i32
    return %arg0, %c0_i32, %c0_i32_0 : i32, i32, i32
  }
  func.func @transform_7(%arg0: i32) -> (i32, i32, i32) {
    %c0_i32 = arith.constant 0 : i32
    %c0_i32_0 = arith.constant 0 : i32
    %c0_i32_1 = arith.constant 0 : i32
    return %arg0, %c0_i32, %c0_i32_0 : i32, i32, i32
  }
  func.func @transform_8(%arg0: i32) -> (i32, i32, i32, i32) {
    %c0_i32 = arith.constant 0 : i32
    %c0_i32_0 = arith.constant 0 : i32
    %c0_i32_1 = arith.constant 0 : i32
    %c0_i32_2 = arith.constant 0 : i32
    return %arg0, %c0_i32, %c0_i32_0, %c0_i32_1 : i32, i32, i32, i32
  }
  func.func @transform_9(%arg0: i32) -> (i32, i32, i32, i32) {
    %c0_i32 = arith.constant 0 : i32
    %c0_i32_0 = arith.constant 0 : i32
    %c0_i32_1 = arith.constant 0 : i32
    %c0_i32_2 = arith.constant 0 : i32
    return %arg0, %c0_i32, %c0_i32_0, %c0_i32_1 : i32, i32, i32, i32
  }
  func.func @transform_10(%arg0: i32) -> (i32, i32, i32, i32) {
    %c0_i32 = arith.constant 0 : i32
    %c0_i32_0 = arith.constant 0 : i32
    %c0_i32_1 = arith.constant 0 : i32
    %c0_i32_2 = arith.constant 0 : i32
    return %arg0, %c0_i32, %c0_i32_0, %c0_i32_1 : i32, i32, i32, i32
  }
  func.func @transform_11(%arg0: i32) -> (i32, i32, i32, i32) {
    %c0_i32 = arith.constant 0 : i32
    %c0_i32_0 = arith.constant 0 : i32
    %c0_i32_1 = arith.constant 0 : i32
    %c0_i32_2 = arith.constant 0 : i32
    return %arg0, %c0_i32, %c0_i32_0, %c0_i32_1 : i32, i32, i32, i32
  }
  func.func @transform_12(%arg0: i32) -> (i32, i32, i32, i32) {
    %c0_i32 = arith.constant 0 : i32
    %c0_i32_0 = arith.constant 0 : i32
    %c0_i32_1 = arith.constant 0 : i32
    %c0_i32_2 = arith.constant 0 : i32
    return %arg0, %c0_i32, %c0_i32_0, %c0_i32_1 : i32, i32, i32, i32
  }
  func.func @transform_13(%arg0: i32) -> (i32, i32, i32, i32) {
    %c0_i32 = arith.constant 0 : i32
    %c0_i32_0 = arith.constant 0 : i32
    %c0_i32_1 = arith.constant 0 : i32
    %c0_i32_2 = arith.constant 0 : i32
    return %arg0, %c0_i32, %c0_i32_0, %c0_i32_1 : i32, i32, i32, i32
  }
  func.func @transform_14(%arg0: i32) -> (i32, i32, i32, i32) {
    %c0_i32 = arith.constant 0 : i32
    %c0_i32_0 = arith.constant 0 : i32
    %c0_i32_1 = arith.constant 0 : i32
    %c0_i32_2 = arith.constant 0 : i32
    return %arg0, %c0_i32, %c0_i32_0, %c0_i32_1 : i32, i32, i32, i32
  }
  func.func @transform_15(%arg0: i32) -> (i32, i32, i32) {
    %c0_i32 = arith.constant 0 : i32
    %c0_i32_0 = arith.constant 0 : i32
    %c0_i32_1 = arith.constant 0 : i32
    return %arg0, %c0_i32, %c0_i32_0 : i32, i32, i32
  }
  func.func @transform_16(%arg0: i32) -> (i32, i32, i32) {
    %c0_i32 = arith.constant 0 : i32
    %c0_i32_0 = arith.constant 0 : i32
    %c0_i32_1 = arith.constant 0 : i32
    return %arg0, %c0_i32, %c0_i32_0 : i32, i32, i32
  }
  func.func @transform_17(%arg0: i32) -> (i32, i32, i32) {
    %c0_i32 = arith.constant 0 : i32
    %c0_i32_0 = arith.constant 0 : i32
    %c0_i32_1 = arith.constant 0 : i32
    return %arg0, %c0_i32, %c0_i32_0 : i32, i32, i32
  }
  func.func @transform_18(%arg0: i32) -> (i32, i32, i32) {
    %c0_i32 = arith.constant 0 : i32
    %c0_i32_0 = arith.constant 0 : i32
    %c0_i32_1 = arith.constant 0 : i32
    return %arg0, %c0_i32, %c0_i32_0 : i32, i32, i32
  }
  func.func @transform_19(%arg0: i32) -> (i32, i32, i32) {
    %c0_i32 = arith.constant 0 : i32
    %c0_i32_0 = arith.constant 0 : i32
    %c0_i32_1 = arith.constant 0 : i32
    return %arg0, %c0_i32, %c0_i32_0 : i32, i32, i32
  }
  func.func @transform_20(%arg0: i32) -> (i32, i32, i32) {
    %c0_i32 = arith.constant 0 : i32
    %c0_i32_0 = arith.constant 0 : i32
    %c0_i32_1 = arith.constant 0 : i32
    return %arg0, %c0_i32, %c0_i32_0 : i32, i32, i32
  }
  func.func @transform_21(%arg0: i32) -> (i32, i32, i32) {
    %c0_i32 = arith.constant 0 : i32
    %c0_i32_0 = arith.constant 0 : i32
    %c0_i32_1 = arith.constant 0 : i32
    return %arg0, %c0_i32, %c0_i32_0 : i32, i32, i32
  }
  func.func @transform_22(%arg0: i32) -> (i32, i32) {
    %c0_i32 = arith.constant 0 : i32
    %c0_i32_0 = arith.constant 0 : i32
    %c0_i32_1 = arith.constant 0 : i32
    return %c0_i32, %c0_i32_0 : i32, i32
  }
}

</mosaic_0001>

<bundles_post_ra>
// kernel: tile.9
= control target key start
LH: loop header
LB: loop body
LE: loop exit
PB: predicated region body
PF: predicated region fallthrough
CT: control target
= control target key end

     0   :  { %vm3_vm0 = vcmask 261120   ;;  %s11_s6 = smov 3  ;;  %s74_s0 = inlined_call_operand.vmem [shape: f32[2,17,32], index: 0, kind: input, shape index: {}]   ;;  %s75_s1 = inlined_call_operand.vmem [shape: f32[34,32], index: 1, kind: output, shape index: {}]  }
   0x1   :  { %v2_v0 = vld [vmem:[%s74_s0] sm:$0xff]   ;;  %v26_v1 = vld [vmem:[%s74_s0 + $0x8] sm:$0xff]  }
   0x2   :  { %v28_v2 = vld [vmem:[%s74_s0 + $0x10] ss:$8 sm:%s11_s6]   ;;  %4 = vst.msk [vmem:[%s75_s1] sm:$0xff] %vm3_vm0, %v2_v0  }
   0x3   :  { %v30_v3 = vld [vmem:[%s74_s0 + $0x19] sm:$0xff]   ;;  %27 = vst.msk [vmem:[%s75_s1 + $0x8] sm:$0xff] %vm3_vm0, %v26_v1   ;;  %v32_v4 = vld [vmem:[%s74_s0 + $0x21] sm:$0xff]  }
   0x4   :  { %29 = vst.msk [vmem:[%s75_s1 + $0x10] sm:$0x3] %vm3_vm0, %v28_v2  }
   0x5   :  { %31 = vst.msk [vmem:[%s75_s1 + $0x12] sm:$0xff] %vm3_vm0, %v30_v3  }
   0x6   :  { %33 = vst.msk [vmem:[%s75_s1 + $0x1a] sm:$0xff] %vm3_vm0, %v32_v4  }

// kernel: clip_vision_tower_forward.1
= control target key start
LH: loop header
LB: loop body
LE: loop exit
PB: predicated region body
PF: predicated region fallthrough
CT: control target
= control target key end

     0   :  { %s4611_s0 = inlined_call_operand.vmem [shape: bf16[34,48], index: 0, kind: input, shape index: {}]   ;;  %s4612_s1 = inlined_call_operand.vmem [shape: f32[34,32], index: 1, kind: input, shape index: {}]   ;;  %s4613_s2 = inlined_call_operand.vmem [shape: f32[34,34], index: 2, kind: input, shape index: {}]   ;;  %s4614_s3 = inlined_call_operand.vmem [shape: bf16[48,32], index: 3, kind: input, shape index: {}]   ;;  %s4615_s4 = inlined_call_operand.vmem [shape: f32[1,32], index: 4, kind: input, shape index: {}]   ;;  %s4616_s5 = inlined_call_operand.vmem [shape: f32[1,32], index: 5, kind: input, shape index: {}]   ;;  %s4617_s6 = inlined_call_operand.vmem [shape: f32[2,1,32], index: 6, kind: input, shape index: {}]   ;;  %s4618_s7 = inlined_call_operand.vmem [shape: f32[2,1,32], index: 7, kind: input, shape index: {}]   ;;  %s4619_s8 = inlined_call_operand.vmem [shape: bf16[2,4,32,8], index: 8, kind: input, shape index: {}]   ;;  %s4620_s9 = inlined_call_operand.vmem [shape: f32[2,4,1,8], index: 9, kind: input, shape index: {}]   ;;  %s4621_s10 = inlined_call_operand.vmem [shape: bf16[2,4,32,8], index: 10, kind: input, shape index: {}]   ;;  %s4622_s11 = inlined_call_operand.vmem [shape: f32[2,4,1,8], index: 11, kind: input, shape index: {}]   ;;  %s4623_s12 = inlined_call_operand.vmem [shape: bf16[2,4,32,8], index: 12, kind: input, shape index: {}]   ;;  %s4624_s13 = inlined_call_operand.vmem [shape: f32[2,4,1,8], index: 13, kind: input, shape index: {}]   ;;  %s4625_s14 = inlined_call_operand.vmem [shape: bf16[2,4,8,32], index: 14, kind: input, shape index: {}]   ;;  %s4626_s15 = inlined_call_operand.vmem [shape: f32[2,1,32], index: 15, kind: input, shape index: {}]   ;;  %s4627_s16 = inlined_call_operand.vmem [shape: f32[2,1,32], index: 16, kind: input, shape index: {}]   ;;  %s4628_s17 = inlined_call_operand.vmem [shape: f32[2,1,32], index: 17, kind: input, shape index: {}]   ;;  %s4629_s18 = inlined_call_operand.vmem [shape: bf16[2,32,64], index: 18, kind: input, shape index: {}]   ;;  %s4630_s19 = inlined_call_operand.vmem [shape: f32[2,1,64], index: 19, kind: input, shape index: {}]   ;;  %s4631_s20 = inlined_call_operand.vmem [shape: bf16[2,64,32], index: 20, kind: input, shape index: {}]   ;;  %s4632_s21 = inlined_call_operand.vmem [shape: f32[2,1,32], index: 21, kind: input, shape index: {}]   ;;  %s4633_s22 = inlined_call_operand.vmem [shape: f32[34,32], index: 22, kind: output, shape index: {}]  }
   0x1   :  { %4643 = sst [smem:[#allocation5_spill]] %s4611_s0 }
   0x2   :  { %4644 = sst [smem:[#allocation6_spill]] %s4612_s1 }
   0x3   :  { %4645 = sst [smem:[#allocation7_spill]] %s4613_s2 }
   0x4   :  { %4646 = sst [smem:[#allocation8_spill]] %s4614_s3  ;;  %s3802_s3 = smov 0  }
   0x5   :  { %4647 = sst [smem:[#allocation9_spill]] %s4615_s4 }
   0x6   :  { %4648 = sst [smem:[#allocation10_spill]] %s4616_s5 }
   0x7   :  { %4649 = sst [smem:[#allocation11_spill]] %s4617_s6 }
   0x8   :  { %4650 = sst [smem:[#allocation12_spill]] %s4618_s7 }
   0x9   :  { %4651 = sst [smem:[#allocation13_spill]] %s4619_s8 }
   0xa   :  { %4652 = sst [smem:[#allocation14_spill]] %s4620_s9 }
   0xb   :  { %4653 = sst [smem:[#allocation15_spill]] %s4621_s10 }
   0xc   :  { %4654 = sst [smem:[#allocation16_spill]] %s4622_s11 }
   0xd   :  { %4655 = sst [smem:[#allocation17_spill]] %s4623_s12 }
   0xe   :  { %4656 = sst [smem:[#allocation18_spill]] %s4624_s13 }
   0xf   :  { %4657 = sst [smem:[#allocation19_spill]] %s4625_s14 }
  0x10   :  { %4658 = sst [smem:[#allocation20_spill]] %s4633_s22 }
  0x11 LB: > { %4659 = sst [smem:[#allocation2_spill]] %s3683_s3  ;;  %s3155_s28 = sadd.s32 4294967295, %s3683_s3   ;;  %s3683_s3 = sphi %s3802_s3, %s32_s3  }
  0x12   : > { %p3158_p0 = scmp.ge.s32.totalorder %s3683_s3, 1  ;;  %p740_p1 = scmp.lt.s32.totalorder %s3683_s3, 3 }
  0x14   : > { %p741_p2 = pnand %p3158_p0, %p740_p1 }
  0x16   : > { %744 = sbr.rel (%p741_p2) target bundleno = 3870 (0xf1e), region = 108 }
  0x1b   : > { %p855_p3 = scmp.lt.s32.totalorder %s3155_s28, 1  ;;  %s4662_s8 = sld [smem:[#allocation13_spill]] }
  0x1c   : > { %s4664_s9 = sld [smem:[#allocation14_spill]]  ;;  %p3174_p4 = scmp.ne.s32.totalorder %s3155_s28, 0 }
  0x1d   : > { %s3810_s29 = scalar_select %p855_p3, %s3155_s28, 1 }
  0x1e   : > { %s4666_s10 = sld [smem:[#allocation15_spill]] }
  0x1f   : > { %s3451_s6 = sshll.u32 %s3810_s29, 6  ;;  %s3161_s25 = sshll.u32 %s3810_s29, 2 }
  0x20   : > { %s4667_s11 = sld [smem:[#allocation16_spill]]  ;;  %s3454_s4 = sshll.u32 %s3810_s29, 4 }
  0x21   : > { %s3825_s27 = scalar_lea.vmem %s4662_s8, %s3451_s6  ;;  %s4668_s12 = sld [smem:[#allocation17_spill]] }
  0x22   : > { %4663 = sst [smem:[#allocation3_spill]] %s3825_s27  ;;  %s3830_s3 = scalar_lea.vmem %s4664_s9, %s3161_s25 }
  0x23   : > { %4665 = sst [smem:[#allocation4_spill]] %s3830_s3  ;;  %s898_s22 = scalar_lea.vmem %s4627_s16, %s3810_s29 }
  0x24   : > { %s3835_s1 = scalar_lea.vmem %s4666_s10, %s3451_s6  ;;  %s4669_s13 = sld [smem:[#allocation18_spill]] }
  0x25   : > { %s4670_s14 = sld [smem:[#allocation19_spill]]  ;;  %s901_s8 = scalar_lea.vmem %s4628_s17, %s3810_s29 }
  0x26   : > { %s3840_s7 = scalar_lea.vmem %s4667_s11, %s3161_s25  ;;  %s909_s0 = scalar_lea.vmem %s4630_s19, %s3810_s29 }
  0x27   : > { %s3845_s2 = scalar_lea.vmem %s4668_s12, %s3451_s6  ;;  %s3873_s12 = scalar_lea.vmem %s4629_s18, %s3454_s4 }
  0x28   : > { %s3456_s10 = sshll.u32 %s3810_s29, 5  ;;  %922 = sbr.rel (%p3174_p4) target bundleno = 475 (0x1db), region = 112 }
  0x29   : > { %s4674_s3 = sld [smem:[#allocation9_spill]] (!%p3174_p4) }
  0x2a   : > { %s3850_s30 = scalar_lea.vmem %s4669_s13, %s3161_s25  ;;  %s4673_s13 = sld [smem:[#allocation6_spill]] (!%p3174_p4) }
  0x2b   : > { %s3860_s24 = scalar_lea.vmem %s4670_s14, %s3454_s4  ;;  %s3883_s14 = scalar_lea.vmem %s4631_s20, %s3456_s10 }
  0x2c   : > { %s4671_s4 = sld [smem:[#allocation8_spill]] (!%p3174_p4) }
  0x2d   : > { %s4672_s10 = sld [smem:[#allocation5_spill]]  ;;  %vm970_vm0 = vcmask 392192   ;;  %vm1005_vm1 = vcmask 261120   ;;  %vm1018_vm2 = vcmask 254976   ;;  %v3685_v29 = vmov 32.0  }
  0x2e   : > { %3514 = vrcp.f32 %v3685_v29  ;;  %s4675_s5 = sld [smem:[#allocation10_spill]] }
  0x2f   : > { %s4676_s27 = sld [smem:[#allocation20_spill]] }
  0x30   : > { %v934_v8 = vld [vmem:[%s4673_s13] sm:$0xff]  ;;  %v936_v9 = vld [vmem:[%s4673_s13 + $0x10] sm:$0xff]  ;;  %v935_v17 = vld [vmem:[%s4673_s13 + $0x8] sm:$0xff] }
  0x31   : > { %v938_v16 = vld [vmem:[%s4673_s13 + $0x20] sm:$0x3]  ;;  %v937_v18 = vld [vmem:[%s4673_s13 + $0x18] sm:$0xff] }
  0x32   : > { %v3461_v0 = vld [vmem:[%s4671_s4 + $0x10] sm:$0xff]  ;;  %v3460_v1 = vld [vmem:[%s4671_s4 + $0x8] sm:$0xff]  ;;  %v3459_v3 = vld [vmem:[%s4671_s4] sm:$0xff] }
  0x33   : > { %985 = vmatpush.bf16.msra.mxu0 %v3461_v0  ;;  %3492 = vmatpush.bf16.msra.mxu1 %v3461_v0  ;;  %v927_v2 = vld [vmem:[%s4672_s10 + $0x10] sm:$0x1]  ;;  %v3457_v5 = vld [vmem:[%s4672_s10] sm:$0xff]  ;;  %v3458_v6 = vld [vmem:[%s4672_s10 + $0x8] sm:$0xff] }
  0x34   : > { %3493 = vmatpush.bf16.msra.mxu2 %v3461_v0  ;;  %v948_v4 = vunpack.c.l.b16 %v927_v2  ;;  %v3515_v30 = vpop.eup %3514 }
  0x35   : > { %v1023_v31 = vmul.f32 32.0, %v3515_v30  ;;  %vm1027_vm3 = vweird.f32 %v3515_v30 }
  0x36   : > { %v951_v7 = vpack.c.b16 %v948_v4, %v948_v4 }
  0x37   : > { %986 = vmatpush.bf16.msra.mxu0 %v3460_v1  ;;  %3494 = vmatpush.bf16.msra.mxu1 %v3460_v1  ;;  %v1024_v32 = vsub.f32 1.0, %v1023_v31  ;;  %v3513_v31 = vld [vmem:[%s4675_s5] ss:$0 sm:$0xff] }
  0x38   : > { %3495 = vmatpush.bf16.msra.mxu2 %v3460_v1 }
  0x39   : > { %v1025_v33 = vmul.f32 %v3515_v30, %v1024_v32 }
  0x3b   : > { %987 = vmatpush.bf16.msra.mxu0 %v3459_v3  ;;  %3496 = vmatpush.bf16.msra.mxu1 %v3459_v3  ;;  %v1026_v34 = vadd.f32 %v3515_v30, %v1025_v33 }
  0x3c   : > { %3497 = vmatpush.bf16.msra.mxu2 %v3459_v3 }
  0x3d   : > { %v1028_v35 = vsel %vm1027_vm3, %v3515_v30, %v1026_v34 }
  0x3e   : > { %3195 = vmatmul.msk.bf16.vlgmr.msra.gmra.mxu0 %vm970_vm0, %v3457_v5  ;;  %3196 = vmatmul.msk.bf16.vlgmr.msra.gmra.mxu1 %vm970_vm0, %v3458_v6 }
  0x3f   : > { %3197 = vmatmul.msk.bf16.vlgmr.msra.gmra.mxu2 %vm970_vm0, %v951_v7 }
  0xbb   : > { %v989_v10 = vpop.f32.mrf.mxu0  ;;  %v994_v11 = vpop.f32.mrf.mxu1 }
  0xbc   : > { %v990_v12 = vadd.f32 %v989_v10, %v934_v8  ;;  %v995_v13 = vadd.f32 %v994_v11, %v936_v9 }
  0xbe   : > { %v1012_v14 = vsel %vm1005_vm1, %v995_v13, 0.0  ;;  %v1006_v15 = vsel %vm1005_vm1, %v990_v12, 0.0 }
  0xbf   : > { %1013 = vadd.xlane.f32.xlu1 %v1012_v14  ;;  %1007 = vadd.xlane.f32.xlu0 %v1006_v15 }
  0xc2   : > { %v999_v19 = vpop.f32.mrf.mxu2 }
  0xc3   : > { %v1000_v20 = vadd.f32 %v999_v19, %v938_v16  ;;  %v991_v21 = vpop.f32.mrf.mxu0  ;;  %v996_v22 = vpop.f32.mrf.mxu1 }
  0xc4   : > { %v992_v23 = vadd.f32 %v991_v21, %v935_v17  ;;  %v997_v24 = vadd.f32 %v996_v22, %v937_v18 }
  0xc5   : > { %v1019_v25 = vsel %vm1018_vm2, %v1000_v20, 0.0 }
  0xc6   : > { %1020 = vadd.xlane.f32.xlu2 %v1019_v25  ;;  %v1015_v26 = vsel %vm1005_vm1, %v997_v24, 0.0  ;;  %v1009_v27 = vsel %vm1005_vm1, %v992_v23, 0.0 }
  0xc7   : > { %1016 = vadd.xlane.f32.xlu1 %v1015_v26  ;;  %1010 = vadd.xlane.f32.xlu0 %v1009_v27  ;;  %v3512_v26 = vld [vmem:[%s4674_s3] ss:$0 sm:$0xff] }
  0xca   : > { %v1001_v28 = vpop.f32.mrf.mxu2 }
 0x132   : > { %v1014_v36 = vpop.xlane.xlu1 %1013  ;;  %v1008_v37 = vpop.xlane.xlu0 %1007 }
 0x133   : > { %v1031_v38 = vmul.f32 %v1028_v35, %v1014_v36  ;;  %v1029_v39 = vmul.f32 %v1028_v35, %v1008_v37 }
 0x135   : > { %v3927_v40 = vsub.f32 %v995_v13, %v1031_v38  ;;  %v3929_v41 = vsub.f32 %v990_v12, %v1029_v39 }
 0x137   : > { %v1041_v42 = vmul.f32 %v3927_v40, %v3927_v40  ;;  %v1039_v43 = vmul.f32 %v3929_v41, %v3929_v41 }
 0x139   : > { %v1021_v44 = vpop.xlane.xlu2 %1020  ;;  %v1050_v45 = vsel %vm1005_vm1, %v1041_v42, 0.0  ;;  %v1044_v46 = vsel %vm1005_vm1, %v1039_v43, 0.0 }
 0x13a   : > { %1051 = vadd.xlane.f32.xlu1 %v1050_v45  ;;  %v1017_v47 = vpop.xlane.xlu1 %1016  ;;  %1045 = vadd.xlane.f32.xlu2 %v1044_v46  ;;  %v1011_v48 = vpop.xlane.xlu0 %1010  ;;  %v1033_v51 = vmul.f32 %v1028_v35, %v1021_v44 }
 0x13b   : > { %v1032_v49 = vmul.f32 %v1028_v35, %v1017_v47  ;;  %v1030_v50 = vmul.f32 %v1028_v35, %v1011_v48 }
 0x13c   : > { %v3945_v56 = vsub.f32 %v1000_v20, %v1033_v51 }
 0x13d   : > { %v3937_v52 = vsub.f32 %v997_v24, %v1032_v49  ;;  %v3939_v53 = vsub.f32 %v992_v23, %v1030_v50 }
 0x13e   : > { %v1043_v59 = vmul.f32 %v3945_v56, %v3945_v56 }
 0x13f   : > { %v1042_v54 = vmul.f32 %v3937_v52, %v3937_v52  ;;  %v1040_v55 = vmul.f32 %v3939_v53, %v3939_v53 }
 0x140   : > { %v1056_v60 = vsel %vm1018_vm2, %v1043_v59, 0.0 }
 0x141   : > { %v1053_v57 = vsel %vm1005_vm1, %v1042_v54, 0.0  ;;  %v1047_v58 = vsel %vm1005_vm1, %v1040_v55, 0.0 }
 0x142   : > { %1054 = vadd.xlane.f32.xlu2 %v1053_v57  ;;  %1048 = vadd.xlane.f32.xlu0 %v1047_v58 }
 0x14a   : > { %1057 = vadd.xlane.f32.xlu0 %v1056_v60 }
 0x1ad   : > { %v1052_v61 = vpop.xlane.xlu1 %1051  ;;  %v1046_v62 = vpop.xlane.xlu2 %1045 }
 0x1ae   : > { %v1061_v63 = vmul.f32 %v1052_v61, %v1028_v35  ;;  %v1059_v0 = vmul.f32 %v1046_v62, %v1028_v35 }
 0x1b0   : > { %v1066_v1 = vadd.f32 1e-05, %v1061_v63  ;;  %v1064_v2 = vadd.f32 1e-05, %v1059_v0 }
 0x1b2   : > { %3516 = vrsqrt.f32 %v1066_v1  ;;  %vm1095_vm6 = vweird.f32 %v1066_v1  ;;  %vm1075_vm8 = vweird.f32 %v1064_v2 }
 0x1b3   : > { %3518 = vrsqrt.f32 %v1064_v2 }
 0x1b5   : > { %v1055_v3 = vpop.xlane.xlu2 %1054  ;;  %v1049_v4 = vpop.xlane.xlu0 %1048 }
 0x1b6   : > { %v1062_v5 = vmul.f32 %v1055_v3, %v1028_v35  ;;  %v1060_v6 = vmul.f32 %v1049_v4, %v1028_v35 }
 0x1b8   : > { %v3517_v7 = vpop.eup %3516  ;;  %v1067_v8 = vadd.f32 1e-05, %v1062_v5  ;;  %v1065_v9 = vadd.f32 1e-05, %v1060_v6 }
 0x1b9   : > { %v3519_v10 = vpop.eup %3518  ;;  %v1090_v11 = vmul.f32 %v3517_v7, %v1066_v1  ;;  %vm1096_vm4 = vweird.f32 %v3517_v7 }
 0x1ba   : > { %v1070_v12 = vmul.f32 %v3519_v10, %v1064_v2  ;;  %3520 = vrsqrt.f32 %v1067_v8  ;;  %vm1076_vm5 = vweird.f32 %v3519_v10  ;;  %vm1097_vm7 = vmor %vm1095_vm6, %vm1096_vm4  ;;  %vm1105_vm12 = vweird.f32 %v1067_v8 }
 0x1bb   : > { %v1091_v13 = vmul.f32 %v3517_v7, %v1090_v11  ;;  %3522 = vrsqrt.f32 %v1065_v9  ;;  %vm1077_vm9 = vmor %vm1075_vm8, %vm1076_vm5  ;;  %vm1085_vm14 = vweird.f32 %v1065_v9 }
 0x1bc   : > { %v1071_v14 = vmul.f32 %v3519_v10, %v1070_v12 }
 0x1bd   : > { %v1092_v15 = vmul.f32 0.5, %v1091_v13  ;;  %v1058_v16 = vpop.xlane.xlu0 %1057 }
 0x1be   : > { %v1072_v17 = vmul.f32 0.5, %v1071_v14  ;;  %v1063_v18 = vmul.f32 %v1058_v16, %v1028_v35 }
 0x1bf   : > { %v1093_v19 = vsub.f32 1.5, %v1092_v15 }
 0x1c0   : > { %v3521_v20 = vpop.eup %3520  ;;  %v1073_v21 = vsub.f32 1.5, %v1072_v17  ;;  %v1068_v22 = vadd.f32 1e-05, %v1063_v18 }
 0x1c1   : > { %v3523_v23 = vpop.eup %3522  ;;  %v1094_v24 = vmul.f32 %v3517_v7, %v1093_v19  ;;  %v1100_v25 = vmul.f32 %v3521_v20, %v1067_v8  ;;  %vm1106_vm10 = vweird.f32 %v3521_v20 }
 0x1c2   : > { %v1074_v27 = vmul.f32 %v3519_v10, %v1073_v21  ;;  %v1080_v28 = vmul.f32 %v3523_v23, %v1065_v9  ;;  %3524 = vrsqrt.f32 %v1068_v22  ;;  %vm1086_vm11 = vweird.f32 %v3523_v23  ;;  %vm1107_vm13 = vmor %vm1105_vm12, %vm1106_vm10 }
 0x1c3   : > { %v1098_v29 = vsel %vm1097_vm7, %v3517_v7, %v1094_v24  ;;  %v1101_v30 = vmul.f32 %v3521_v20, %v1100_v25  ;;  %vm1087_vm15 = vmor %vm1085_vm14, %vm1086_vm11  ;;  %vm1115_vm3 = vweird.f32 %v1068_v22 }
 0x1c4   : > { %v1121_v32 = vmul.f32 %v1098_v29, %v3927_v40  ;;  %v1078_v33 = vsel %vm1077_vm9, %v3519_v10, %v1074_v27  ;;  %v1081_v34 = vmul.f32 %v3523_v23, %v1080_v28 }
 0x1c5   : > { %v1119_v35 = vmul.f32 %v1078_v33, %v3929_v41  ;;  %v1102_v36 = vmul.f32 0.5, %v1101_v30 }
 0x1c6   : > { %v1129_v37 = vmul.f32 %v3512_v26, %v1121_v32  ;;  %v1082_v38 = vmul.f32 0.5, %v1081_v34 }
 0x1c7   : > { %v1127_v39 = vmul.f32 %v3512_v26, %v1119_v35  ;;  %v1103_v42 = vsub.f32 1.5, %v1102_v36 }
 0x1c8   : > { %v3525_v43 = vpop.eup %3524  ;;  %v1137_v44 = vadd.f32 %v3513_v31, %v1129_v37  ;;  %v1083_v45 = vsub.f32 1.5, %v1082_v38 }
 0x1c9   : > { %v1135_v46 = vadd.f32 %v3513_v31, %v1127_v39  ;;  %v1104_v47 = vmul.f32 %v3521_v20, %v1103_v42  ;;  %v1110_v48 = vmul.f32 %v3525_v43, %v1068_v22  ;;  %vm1116_vm0 = vweird.f32 %v3525_v43 }
 0x1ca   : > { %1142 = vst.msk [vmem:[%s4676_s27 + $0x10] sm:$0xff] %vm1005_vm1, %v1137_v44  ;;  %v1084_v40 = vmul.f32 %v3523_v23, %v1083_v45  ;;  %vm1117_vm4 = vmor %vm1115_vm3, %vm1116_vm0 }
 0x1cb   : > { %1140 = vst.msk [vmem:[%s4676_s27] sm:$0xff] %vm1005_vm1, %v1135_v46  ;;  %v1108_v41 = vsel %vm1107_vm13, %v3521_v20, %v1104_v47  ;;  %v1111_v49 = vmul.f32 %v3525_v43, %v1110_v48 }
 0x1cc   : > { %v1122_v50 = vmul.f32 %v1108_v41, %v3937_v52  ;;  %v1088_v51 = vsel %vm1087_vm15, %v3523_v23, %v1084_v40 }
 0x1cd   : > { %v1120_v54 = vmul.f32 %v1088_v51, %v3939_v53  ;;  %v1112_v55 = vmul.f32 0.5, %v1111_v49 }
 0x1ce   : > { %v1130_v57 = vmul.f32 %v3512_v26, %v1122_v50 }
 0x1cf   : > { %v1128_v58 = vmul.f32 %v3512_v26, %v1120_v54  ;;  %v1113_v59 = vsub.f32 1.5, %v1112_v55 }
 0x1d0   : > { %v1138_v60 = vadd.f32 %v3513_v31, %v1130_v57 }
 0x1d1   : > { %v1136_v61 = vadd.f32 %v3513_v31, %v1128_v58  ;;  %v1114_v62 = vmul.f32 %v3525_v43, %v1113_v59 }
 0x1d2   : > { %1143 = vst.msk [vmem:[%s4676_s27 + $0x18] sm:$0xff] %vm1005_vm1, %v1138_v60 }
 0x1d3   : > { %1141 = vst.msk [vmem:[%s4676_s27 + $0x8] sm:$0xff] %vm1005_vm1, %v1136_v61  ;;  %v1118_v52 = vsel %vm1117_vm4, %v3525_v43, %v1114_v62 }
 0x1d4   : > { %v1123_v53 = vmul.f32 %v1118_v52, %v3945_v56 }
 0x1d6   : > { %v1131_v63 = vmul.f32 %v3512_v26, %v1123_v53 }
 0x1d8   : > { %v1139_v0 = vadd.f32 %v3513_v31, %v1131_v63 }
 0x1da   : > { %1144 = vst.msk [vmem:[%s4676_s27 + $0x20] sm:$0x3] %vm1018_vm2, %v1139_v0 }
 0x1db PF: > { %s4677_s3 = sld [smem:[#allocation20_spill]]  ;;  %vm1170_vm5 = vcmask 254976   ;;  %vm1157_vm1 = vcmask 261120   ;;  %v3686_v10 = vmov 32.0   ;;  %v3465_v46 = vld [vmem:[%s3835_s1 + $0x8] sm:$0xff]  ;;  %v3464_v51 = vld [vmem:[%s3835_s1] sm:$0xff]  ;;  %s4687_s26 = scalar_lea.vmem %s4626_s15, %s3810_s29 }
 0x1dc   : > { %3545 = vrcp.f32 %v3686_v10  ;;  %s4678_s6 = sld [smem:[#allocation3_spill]]  ;;  %3500 = vmatpush.bf16.msra.mxu1 %v3465_v46  ;;  %1373 = vmatpush.bf16.msra.mxu0 %v3465_v46 }
 0x1dd   : > { %s4679_s11 = sld [smem:[#allocation11_spill]] }
 0x1de   : > { %s4681_s25 = sld [smem:[#allocation12_spill]] }
 0x1df   : > { %s4685_s23 = sld [smem:[#allocation4_spill]] }
 0x1e0   : > { %3501 = vmatpush.bf16.msra.mxu1 %v3464_v51  ;;  %1374 = vmatpush.bf16.msra.mxu0 %v3464_v51 }
 0x1e1   : > { %v1149_v1 = vld [vmem:[%s4677_s3 + $0x20] sm:$0x3]  ;;  %v1147_v2 = vld [vmem:[%s4677_s3 + $0x10] sm:$0xff]  ;;  %v1148_v56 = vld [vmem:[%s4677_s3 + $0x18] sm:$0xff] }
 0x1e2   : > { %v1171_v3 = vsel %vm1170_vm5, %v1149_v1, 0.0  ;;  %v1164_v4 = vsel %vm1157_vm1, %v1147_v2, 0.0  ;;  %v1167_v5 = vsel %vm1157_vm1, %v1148_v56, 0.0  ;;  %v1145_v6 = vld [vmem:[%s4677_s3] sm:$0xff]  ;;  %v1146_v7 = vld [vmem:[%s4677_s3 + $0x8] sm:$0xff]  ;;  %v3546_v11 = vpop.eup %3545 }
 0x1e3   : > { %1172 = vadd.xlane.f32.xlu1 %v1171_v3  ;;  %1165 = vadd.xlane.f32.xlu0 %v1164_v4  ;;  %v1158_v8 = vsel %vm1157_vm1, %v1145_v6, 0.0  ;;  %v1161_v9 = vsel %vm1157_vm1, %v1146_v7, 0.0  ;;  %v1175_v12 = vmul.f32 32.0, %v3546_v11  ;;  %vm1179_vm2 = vweird.f32 %v3546_v11  ;;  %v3463_v44 = vld [vmem:[%s4678_s6 + $0x8] sm:$0xff]  ;;  %v3462_v45 = vld [vmem:[%s4678_s6] sm:$0xff]  ;;  %s4680_s5 = scalar_lea.vmem %s4679_s11, %s3810_s29 }
 0x1e4   : > { %1162 = vadd.xlane.f32.xlu2 %v1161_v9  ;;  %3498 = vmatpush.bf16.msra.mxu3 %v3463_v44  ;;  %s4682_s9 = scalar_lea.vmem %s4681_s25, %s3810_s29 }
 0x1e5   : > { %v1176_v13 = vsub.f32 1.0, %v1175_v12  ;;  %1330 = vmatpush.bf16.msra.mxu2 %v3463_v44 }
 0x1e7   : > { %v1177_v14 = vmul.f32 %v3546_v11, %v1176_v13  ;;  %v3526_v13 = vld [vmem:[%s4680_s5] ss:$0 sm:$0xff]  ;;  %s4686_s5 = sld [smem:[#allocation7_spill]] }
 0x1e8   : > { %3499 = vmatpush.bf16.msra.mxu3 %v3462_v45 }
 0x1e9   : > { %v1178_v15 = vadd.f32 %v3546_v11, %v1177_v14  ;;  %1331 = vmatpush.bf16.msra.mxu2 %v3462_v45 }
 0x1eb   : > { %1168 = vadd.xlane.f32.xlu0 %v1167_v5  ;;  %1159 = vadd.xlane.f32.xlu1 %v1158_v8  ;;  %v4003_v16 = vsel %vm1179_vm2, %v3546_v11, %v1178_v15 }
 0x256   : > { %v1173_v17 = vpop.xlane.xlu1 %1172  ;;  %v1166_v18 = vpop.xlane.xlu0 %1165 }
 0x257   : > { %v1185_v19 = vmul.f32 %v4003_v16, %v1173_v17  ;;  %v1183_v20 = vmul.f32 %v4003_v16, %v1166_v18  ;;  %v1163_v25 = vpop.xlane.xlu2 %1162  ;;  %v3527_v18 = vld [vmem:[%s4682_s9] ss:$0 sm:$0xff] }
 0x258   : > { %v1182_v32 = vmul.f32 %v4003_v16, %v1163_v25 }
 0x259   : > { %v4007_v21 = vsub.f32 %v1149_v1, %v1185_v19  ;;  %v4009_v22 = vsub.f32 %v1147_v2, %v1183_v20 }
 0x25a   : > { %v4026_v36 = vsub.f32 %v1146_v7, %v1182_v32 }
 0x25b   : > { %v1193_v23 = vmul.f32 %v4009_v22, %v4009_v22  ;;  %v1195_v24 = vmul.f32 %v4007_v21, %v4007_v21 }
 0x25c   : > { %v1192_v42 = vmul.f32 %v4026_v36, %v4026_v36 }
 0x25d   : > { %v1202_v26 = vsel %vm1157_vm1, %v1193_v23, 0.0  ;;  %v1208_v27 = vsel %vm1170_vm5, %v1195_v24, 0.0 }
 0x25e   : > { %v1169_v28 = vpop.xlane.xlu0 %1168  ;;  %1203 = vadd.xlane.f32.xlu2 %v1202_v26  ;;  %1209 = vadd.xlane.f32.xlu1 %v1208_v27  ;;  %v1160_v29 = vpop.xlane.xlu1 %1159  ;;  %v1199_v43 = vsel %vm1157_vm1, %v1192_v42, 0.0 }
 0x25f   : > { %v1184_v30 = vmul.f32 %v4003_v16, %v1169_v28  ;;  %v1181_v31 = vmul.f32 %v4003_v16, %v1160_v29 }
 0x261   : > { %v4020_v33 = vsub.f32 %v1148_v56, %v1184_v30  ;;  %v4022_v34 = vsub.f32 %v1145_v6, %v1181_v31 }
 0x263   : > { %v1194_v35 = vmul.f32 %v4020_v33, %v4020_v33  ;;  %v1191_v37 = vmul.f32 %v4022_v34, %v4022_v34 }
 0x265   : > { %v1205_v38 = vsel %vm1157_vm1, %v1194_v35, 0.0  ;;  %v1196_v39 = vsel %vm1157_vm1, %v1191_v37, 0.0 }
 0x266   : > { %1206 = vadd.xlane.f32.xlu0 %v1205_v38  ;;  %1197 = vadd.xlane.f32.xlu2 %v1196_v39 }
 0x26e   : > { %1200 = vadd.xlane.f32.xlu0 %v1199_v43 }
 0x2d1   : > { %v1204_v47 = vpop.xlane.xlu2 %1203  ;;  %v1210_v48 = vpop.xlane.xlu1 %1209 }
 0x2d2   : > { %v1213_v40 = vmul.f32 %v1204_v47, %v4003_v16  ;;  %v1215_v41 = vmul.f32 %v1210_v48, %v4003_v16  ;;  %v3468_v47 = vld [vmem:[%s4678_s6 + $0x10] sm:$0xff] }
 0x2d4   : > { %v1218_v49 = vadd.f32 1e-05, %v1213_v40  ;;  %v1220_v50 = vadd.f32 1e-05, %v1215_v41 }
 0x2d6   : > { %3547 = vrsqrt.f32 %v1218_v49  ;;  %vm1267_vm6 = vweird.f32 %v1220_v50  ;;  %vm1247_vm10 = vweird.f32 %v1218_v49 }
 0x2d7   : > { %3549 = vrsqrt.f32 %v1220_v50 }
 0x2d9   : > { %v1207_v54 = vpop.xlane.xlu0 %1206  ;;  %v1198_v55 = vpop.xlane.xlu2 %1197 }
 0x2da   : > { %v1214_v57 = vmul.f32 %v1207_v54, %v4003_v16  ;;  %v1211_v58 = vmul.f32 %v1198_v55, %v4003_v16 }
 0x2dc   : > { %v3548_v59 = vpop.eup %3547  ;;  %v1219_v60 = vadd.f32 1e-05, %v1214_v57  ;;  %v1216_v61 = vadd.f32 1e-05, %v1211_v58  ;;  %v3467_v57 = vld [vmem:[%s3845_s2 + $0x8] sm:$0xff] }
 0x2dd   : > { %v3550_v62 = vpop.eup %3549  ;;  %v1242_v52 = vmul.f32 %v3548_v59, %v1218_v49  ;;  %vm1248_vm8 = vweird.f32 %v3548_v59  ;;  %1416 = vmatpush.bf16.msrb.mxu2 %v3467_v57 }
 0x2de   : > { %v1262_v53 = vmul.f32 %v3550_v62, %v1220_v50  ;;  %3551 = vrsqrt.f32 %v1219_v60  ;;  %vm1268_vm7 = vweird.f32 %v3550_v62  ;;  %vm1249_vm11 = vmor %vm1247_vm10, %vm1248_vm8  ;;  %vm1227_vm13 = vweird.f32 %v1216_v61 }
 0x2df   : > { %v1243_v63 = vmul.f32 %v3548_v59, %v1242_v52  ;;  %3553 = vrsqrt.f32 %v1216_v61  ;;  %vm1269_vm9 = vmor %vm1267_vm6, %vm1268_vm7  ;;  %vm1257_vm15 = vweird.f32 %v1219_v60  ;;  %vm1439_vm7 = vcmask 64512  }
 0x2e0   : > { %v1263_v0 = vmul.f32 %v3550_v62, %v1262_v53  ;;  %vm1553_vm8 = vcmask 1040384   ;;  %vm1494_vm10 = vcmask 271360  }
 0x2e1   : > { %v1244_v1 = vmul.f32 0.5, %v1243_v63  ;;  %v1201_v2 = vpop.xlane.xlu0 %1200 }
 0x2e2   : > { %v1264_v56 = vmul.f32 0.5, %v1263_v0  ;;  %v1212_v3 = vmul.f32 %v1201_v2, %v4003_v16  ;;  %v3529_v2 = vld [vmem:[%s3840_s7] ss:$0 sm:$0xff] }
 0x2e3   : > { %v1245_v4 = vsub.f32 1.5, %v1244_v1 }
 0x2e4   : > { %v3552_v5 = vpop.eup %3551  ;;  %v1265_v6 = vsub.f32 1.5, %v1264_v56  ;;  %v1217_v7 = vadd.f32 1e-05, %v1212_v3 }
 0x2e5   : > { %v3554_v8 = vpop.eup %3553  ;;  %v1246_v9 = vmul.f32 %v3548_v59, %v1245_v4  ;;  %v1252_v10 = vmul.f32 %v3552_v5, %v1219_v60  ;;  %vm1258_vm12 = vweird.f32 %v3552_v5 }
 0x2e6   : > { %v1266_v11 = vmul.f32 %v3550_v62, %v1265_v6  ;;  %v1222_v12 = vmul.f32 %v3554_v8, %v1216_v61  ;;  %3555 = vrsqrt.f32 %v1217_v7  ;;  %vm1228_vm14 = vweird.f32 %v3554_v8  ;;  %vm1259_vm0 = vmor %vm1257_vm15, %vm1258_vm12 }
 0x2e7   : > { %v1253_v14 = vmul.f32 %v3552_v5, %v1252_v10  ;;  %v1250_v19 = vsel %vm1249_vm11, %v3548_v59, %v1246_v9  ;;  %vm4056_vm3 = vmor %vm1227_vm13, %vm1228_vm14  ;;  %vm1237_vm4 = vweird.f32 %v1217_v7  ;;  %v3466_v59 = vld [vmem:[%s3845_s2] sm:$0xff]  ;;  %vm1876_vm11 = vcmask 1043456  }
 0x2e8   : > { %v1270_v15 = vsel %vm1269_vm9, %v3550_v62, %v1266_v11  ;;  %v1223_v17 = vmul.f32 %v3554_v8, %v1222_v12  ;;  %v1273_v28 = vmul.f32 %v1250_v19, %v4009_v22  ;;  %v3469_v22 = vld [vmem:[%s4678_s6 + $0x18] sm:$0xff]  ;;  %1417 = vmatpush.bf16.msrb.mxu2 %v3466_v59  ;;  %v3470_v62 = vld [vmem:[%s3835_s1 + $0x10] sm:$0xff]  ;;  %vm1481_vm9 = vcmask 277504  }
 0x2e9   : > { %v1275_v20 = vmul.f32 %v1270_v15, %v4007_v21  ;;  %v1254_v23 = vmul.f32 0.5, %v1253_v14  ;;  %1612 = vmatpush.bf16.msrb.mxu1 %v3469_v22 }
 0x2ea   : > { %v1224_v24 = vmul.f32 0.5, %v1223_v17  ;;  %v1281_v42 = vmul.f32 %v3526_v13, %v1273_v28 }
 0x2eb   : > { %v1283_v25 = vmul.f32 %v3526_v13, %v1275_v20  ;;  %v1255_v26 = vsub.f32 1.5, %v1254_v23  ;;  %v3528_v20 = vld [vmem:[%s4685_s23] ss:$0 sm:$0xff] }
 0x2ec   : > { %v3556_v27 = vpop.eup %3555  ;;  %v1225_v29 = vsub.f32 1.5, %v1224_v24  ;;  %v1289_v40 = vadd.f32 %v3527_v18, %v1281_v42 }
 0x2ed   : > { %v1291_v30 = vadd.f32 %v3527_v18, %v1283_v25  ;;  %v1256_v31 = vmul.f32 %v3552_v5, %v1255_v26  ;;  %v1232_v32 = vmul.f32 %v3556_v27, %v1217_v7  ;;  %vm1238_vm2 = vweird.f32 %v3556_v27  ;;  %1613 = vmatpush.bf16.msrb.mxu1 %v3468_v47 }
 0x2ee   : > { %v1226_v35 = vmul.f32 %v3554_v8, %v1225_v29  ;;  %vm1239_vm6 = vmor %vm1237_vm4, %vm1238_vm2 }
 0x2ef   : > { %v4060_v37 = vpack.c.bf16 %v1291_v30, %v1291_v30  ;;  %v1260_v38 = vsel %vm1259_vm0, %v3552_v5, %v1256_v31  ;;  %v1233_v39 = vmul.f32 %v3556_v27, %v1232_v32  ;;  %v3473_v31 = vld [vmem:[%s3845_s2 + $0x18] sm:$0xff] }
 0x2f0   : > { %v1274_v43 = vmul.f32 %v1260_v38, %v4020_v33  ;;  %v1230_v44 = vsel %vm4056_vm3, %v3554_v8, %v1226_v35  ;;  %v3472_v38 = vld [vmem:[%s3845_s2 + $0x10] sm:$0xff] }
 0x2f1   : > { %v1234_v45 = vmul.f32 0.5, %v1233_v39  ;;  %3208 = vmatmul.msk.bf16.vlgmr.msra.gmra.mxu3 %vm1157_vm1, %v4060_v37  ;;  %v1271_v33 = vmul.f32 %v1230_v44, %v4022_v34 }
 0x2f2   : > { %v1282_v46 = vmul.f32 %v3526_v13, %v1274_v43 }
 0x2f3   : > { %v1235_v48 = vsub.f32 1.5, %v1234_v45  ;;  %v1279_v54 = vmul.f32 %v3526_v13, %v1271_v33 }
 0x2f4   : > { %v1290_v41 = vadd.f32 %v3527_v18, %v1282_v46 }
 0x2f5   : > { %v1236_v49 = vmul.f32 %v3556_v27, %v1235_v48  ;;  %v1287_v60 = vadd.f32 %v3527_v18, %v1279_v54  ;;  %v3531_v48 = vld [vmem:[%s3850_s30] ss:$0 sm:$0xff] }
 0x2f6   : > { %v4070_v50 = vpack.c.bf16 %v1290_v41, %v1289_v40 }
 0x2f7   : > { %v1240_v51 = vsel %vm1239_vm6, %v3556_v27, %v1236_v49 }
 0x2f8   : > { %v1272_v55 = vmul.f32 %v1240_v51, %v4026_v36  ;;  %3218 = vmatmul.msk.bf16.vlgmr.msra.gmra.mxu1 %vm1157_vm1, %v4070_v50  ;;  %v3471_v36 = vld [vmem:[%s3835_s1 + $0x18] sm:$0xff] }
 0x2fa   : > { %v1280_v58 = vmul.f32 %v3526_v13, %v1272_v55 }
 0x2fc   : > { %v1288_v34 = vadd.f32 %v3527_v18, %v1280_v58 }
 0x2fe   : > { %v4077_v61 = vpack.c.bf16 %v1288_v34, %v1287_v60 }
 0x300   : > { %3206 = vmatmul.msk.bf16.vlgmr.msra.gmra.mxu2 %vm1157_vm1, %v4077_v61  ;;  %3217 = vmatmul.msk.bf16.vlgmr.msra.gmra.mxu0 %vm1157_vm1, %v4077_v61 }
 0x301   : > { %1657 = vmatpush.bf16.msra.mxu2 %v3471_v36 }
 0x305   : > { %1658 = vmatpush.bf16.msra.mxu2 %v3470_v62 }
 0x308   : > { %3219 = vmatmul.msk.bf16.gmra.mxu1 %vm1157_vm1, %v4060_v37 }
 0x310   : > { %3207 = vmatmul.msk.bf16.gmra.mxu2 %vm1157_vm1, %v4070_v50 }
 0x318   : > { %3250 = vmatmul.msk.bf16.vlgmr.msrb.gmra.mxu1 %vm1157_vm1, %v4077_v61 }
 0x320   : > { %3228 = vmatmul.msk.bf16.vlgmr.msrb.gmra.mxu2 %vm1157_vm1, %v4077_v61 }
 0x328   : > { %3251 = vmatmul.msk.bf16.gmra.mxu1 %vm1157_vm1, %v4070_v50 }
 0x330   : > { %3229 = vmatmul.msk.bf16.gmra.mxu2 %vm1157_vm1, %v4070_v50 }
 0x338   : > { %3252 = vmatmul.msk.bf16.gmra.mxu1 %vm1157_vm1, %v4060_v37 }
 0x340   : > { %3230 = vmatmul.msk.bf16.gmra.mxu2 %vm1157_vm1, %v4060_v37 }
 0x350   : > { %3266 = vmatmul.msk.bf16.vlgmr.msra.gmra.mxu2 %vm1157_vm1, %v4077_v61 }
 0x360   : > { %3267 = vmatmul.msk.bf16.gmra.mxu2 %vm1157_vm1, %v4070_v50 }
 0x370   : > { %3268 = vmatmul.msk.bf16.gmra.mxu2 %vm1157_vm1, %v4060_v37 }
 0x374   : > { %v1343_v52 = vpop.f32.mrf.mxu3 }
 0x375   : > { %v1381_v53 = vpop.f32.mrf.mxu1  ;;  %v1344_v45 = vadd.f32 %v3528_v20, %v1343_v52 }
 0x376   : > { %v1382_v9 = vadd.f32 %v3529_v2, %v1381_v53  ;;  %v3532_v53 = vld [vmem:[%s3840_s7 + $0x1] ss:$0 sm:$0xff] }
 0x377   : > { %v1435_v47 = vpack.c.bf16 %v1344_v45, %v1344_v45 }
 0x37c   : > { %v1345_v63 = vpop.f32.mrf.mxu3 }
 0x37d   : > { %v1383_v0 = vpop.f32.mrf.mxu1  ;;  %v1376_v56 = vpop.f32.mrf.mxu0 }
 0x37e   : > { %v1384_v6 = vadd.f32 %v3529_v2, %v1383_v0  ;;  %v1377_v17 = vadd.f32 %v3529_v2, %v1376_v56 }
 0x380   : > { %v1437_v11 = vpack.c.bf16 %v1384_v6, %v1382_v9 }
 0x382   : > { %v1453_v14 = vsel %vm1439_vm7, %v1437_v11, 0  ;;  %v4142_v11 = vld [vmem:[%s4686_s5] sm:$0xff] }
 0x383   : > { %v1333_v1 = vpop.f32.mrf.mxu2 }
 0x384   : > { %v1334_v27 = vadd.f32 %v3528_v20, %v1333_v1 }
 0x385   : > { %v1386_v3 = vpop.f32.mrf.mxu1  ;;  %v1378_v12 = vpop.f32.mrf.mxu0 }
 0x386   : > { %v1387_v4 = vadd.f32 %v3529_v2, %v1386_v3  ;;  %v1379_v13 = vadd.f32 %v3529_v2, %v1378_v12 }
 0x388   : > { %v1438_v5 = vpack.c.bf16 %v1387_v4, %v1387_v4  ;;  %v1436_v19 = vpack.c.bf16 %v1379_v13, %v1377_v17 }
 0x38a   : > { %v1456_v7 = vsel %vm1439_vm7, %v1438_v5, 0  ;;  %v1450_v23 = vsel %vm1439_vm7, %v1436_v19, 0 }
 0x38b   : > { %v1335_v8 = vpop.f32.mrf.mxu2  ;;  %1463 = vmatpush.bf16.xpose.msrb.mxu3 %v1456_v7 }
 0x38c   : > { %v1336_v25 = vadd.f32 %v3528_v20, %v1335_v8 }
 0x38d   : > { %v1388_v10 = vpop.f32.mrf.mxu1 }
 0x38e   : > { %v1433_v28 = vpack.c.bf16 %v1336_v25, %v1334_v27 }
 0x393   : > { %v1338_v15 = vpop.f32.mrf.mxu2  ;;  %1464 = vmatpush.bf16.xpose.msrb.mxu3 %v1453_v14 }
 0x394   : > { %v1339_v39 = vadd.f32 %v3528_v20, %v1338_v15  ;;  %v4149_v15 = vld [vmem:[%s4686_s5 + $0x8] sm:$0xff] }
 0x395   : > { %v4110_v18 = vpop.f32.mrf.mxu1 }
 0x39b   : > { %v1340_v24 = vpop.f32.mrf.mxu2  ;;  %1465 = vmatpush.bf16.xpose.msrb.mxu3 %v1450_v23  ;;  %v4156_v23 = vld [vmem:[%s4686_s5 + $0x10] sm:$0xff] }
 0x39c   : > { %v1341_v35 = vadd.f32 %v3528_v20, %v1340_v24 }
 0x39d   : > { %v4114_v26 = vpop.f32.mrf.mxu1 }
 0x39e   : > { %v1434_v42 = vpack.c.bf16 %v1341_v35, %v1339_v39  ;;  %v4170_v35 = vld [vmem:[%s4686_s5 + $0x20] sm:$0x3] }
 0x3a2   : > { %3231 = vmatmul.msk.bf16.vlgmr.msrb.gmra.mxu3 %vm1439_vm7, %v1433_v28  ;;  %v4163_v28 = vld [vmem:[%s4686_s5 + $0x18] sm:$0xff] }
 0x3a3   : > { %v1419_v29 = vpop.f32.mrf.mxu2  ;;  %1702 = vmatpush.bf16.msra.mxu3 %v3473_v31 }
 0x3a4   : > { %v1420_v59 = vadd.f32 %v3531_v48, %v1419_v29 }
 0x3a5   : > { %v4117_v30 = vpop.f32.mrf.mxu1 }
 0x3a7   : > { %1703 = vmatpush.bf16.msra.mxu3 %v3472_v38 }
 0x3ab   : > { %v1421_v32 = vpop.f32.mrf.mxu2 }
 0x3ac   : > { %v1422_v55 = vadd.f32 %v3531_v48, %v1421_v32 }
 0x3ad   : > { %v4120_v21 = vpop.f32.mrf.mxu1 }
 0x3ae   : > { %v1541_v60 = vpack.c.bf16 %v1422_v55, %v1420_v59 }
 0x3b2   : > { %3232 = vmatmul.msk.bf16.gmra.mxu3 %vm1439_vm7, %v1434_v42 }
 0x3b3   : > { %v1424_v43 = vpop.f32.mrf.mxu2 }
 0x3b4   : > { %v1425_v54 = vadd.f32 %v3531_v48, %v1424_v43 }
 0x3b5   : > { %v4124_v22 = vpop.f32.mrf.mxu1 }
 0x3bb   : > { %v1426_v44 = vpop.f32.mrf.mxu2 }
 0x3bc   : > { %v1427_v49 = vadd.f32 %v3531_v48, %v1426_v44 }
 0x3bd   : > { %v1627_v46 = vpop.f32.mrf.mxu1 }
 0x3be   : > { %v1542_v58 = vpack.c.bf16 %v1427_v49, %v1425_v54 }
 0x3c2   : > { %3233 = vmatmul.msk.bf16.gmra.mxu3 %vm1439_vm7, %v1435_v47 }
 0x3c3   : > { %v1429_v40 = vpop.f32.mrf.mxu2 }
 0x3c4   : > { %v1430_v41 = vadd.f32 %v3531_v48, %v1429_v40  ;;  %v3533_v48 = vld [vmem:[%s3850_s30 + $0x1] ss:$0 sm:$0xff] }
 0x3c6   : > { %v1543_v33 = vpack.c.bf16 %v1430_v41, %v1430_v41 }
 0x3c8   : > { %v1555_v51 = vsel %vm1553_vm8, %v1543_v33, 0 }
 0x3c9   : > { %1562 = vmatpush.bf16.msrb.mxu0 %v1555_v51 }
 0x3cb   : > { %v1431_v57 = vpop.f32.mrf.mxu2 }
 0x3cd   : > { %1563 = vmatpush.bf16.msrb.mxu0 %v1542_v58 }
 0x3d1   : > { %1564 = vmatpush.bf16.msrb.mxu0 %v1541_v60 }
 0x3d2   : > { %3282 = vmatmul.msk.bf16.vlgmr.msra.gmra.mxu3 %vm1157_vm1, %v4077_v61 }
 0x3d3   : > { %v1660_v34 = vpop.f32.mrf.mxu2 }
 0x3d4   : > { %v1661_v8 = vadd.f32 %v3532_v53, %v1660_v34 }
 0x3db   : > { %v1662_v36 = vpop.f32.mrf.mxu2 }
 0x3dc   : > { %v1663_v6 = vadd.f32 %v3532_v53, %v1662_v36 }
 0x3de   : > { %v1722_v9 = vpack.c.bf16 %v1663_v6, %v1661_v8 }
 0x3e0   : > { %v1735_v10 = vsel %vm1439_vm7, %v1722_v9, 0 }
 0x3e2   : > { %3283 = vmatmul.msk.bf16.gmra.mxu3 %vm1157_vm1, %v4070_v50 }
 0x3e3   : > { %v1665_v62 = vpop.f32.mrf.mxu2 }
 0x3e4   : > { %v1666_v3 = vadd.f32 %v3532_v53, %v1665_v62 }
 0x3eb   : > { %v1667_v52 = vpop.f32.mrf.mxu2 }
 0x3ec   : > { %v1668_v2 = vadd.f32 %v3532_v53, %v1667_v52 }
 0x3ee   : > { %v1723_v5 = vpack.c.bf16 %v1668_v2, %v1666_v3 }
 0x3f0   : > { %v1738_v7 = vsel %vm1439_vm7, %v1723_v5, 0 }
 0x3f2   : > { %3284 = vmatmul.msk.bf16.gmra.mxu3 %vm1157_vm1, %v4060_v37 }
 0x3f3   : > { %v1670_v63 = vpop.f32.mrf.mxu2 }
 0x3f4   : > { %v1671_v0 = vadd.f32 %v3532_v53, %v1670_v63 }
 0x3f6   : > { %v1724_v1 = vpack.c.bf16 %v1671_v0, %v1671_v0 }
 0x3f8   : > { %v1741_v56 = vsel %vm1439_vm7, %v1724_v1, 0 }
 0x3f9   : > { %1748 = vmatpush.bf16.xpose.msra.mxu0 %v1741_v56 }
 0x3fb   : > { %v1672_v4 = vpop.f32.mrf.mxu2 }
 0x401   : > { %1749 = vmatpush.bf16.xpose.msra.mxu0 %v1738_v7 }
 0x409   : > { %1750 = vmatpush.bf16.xpose.msra.mxu0 %v1735_v10 }
 0x425   : > { %v1467_v12 = vpop.f32.mrf.mxu3 }
 0x426   : > { %v1468_v13 = vadd.f32 %v1467_v12, %v4142_v11 }
 0x428   : > { %v1482_v14 = vsel %vm1481_vm9, %v1468_v13, -inf }
 0x429   : > { %1483 = vmax.xlane.f32.xlu1 %v1482_v14 }
 0x42d   : > { %v1469_v17 = vpop.f32.mrf.mxu3 }
 0x42e   : > { %v1470_v19 = vadd.f32 %v1469_v17, %v4149_v15 }
 0x430   : > { %v1485_v20 = vsel %vm1481_vm9, %v1470_v19, -inf }
 0x431   : > { %1486 = vmax.xlane.f32.xlu2 %v1485_v20 }
 0x435   : > { %v1472_v24 = vpop.f32.mrf.mxu3 }
 0x436   : > { %v1473_v25 = vadd.f32 %v1472_v24, %v4156_v23 }
 0x438   : > { %v1488_v27 = vsel %vm1481_vm9, %v1473_v25, -inf }
 0x439   : > { %1489 = vmax.xlane.f32.xlu0 %v1488_v27 }
 0x43d   : > { %v1474_v29 = vpop.f32.mrf.mxu3 }
 0x43e   : > { %v1475_v31 = vadd.f32 %v1474_v29, %v4163_v28 }
 0x440   : > { %v1491_v32 = vsel %vm1481_vm9, %v1475_v31, -inf }
 0x441   : > { %1492 = vmax.xlane.f32.xlu1 %v1491_v32 }
 0x445   : > { %v1477_v38 = vpop.f32.mrf.mxu3 }
 0x446   : > { %v1478_v39 = vadd.f32 %v1477_v38, %v4170_v35 }
 0x448   : > { %v1495_v42 = vsel %vm1494_vm10, %v1478_v39, -inf }
 0x449   : > { %1496 = vmax.xlane.f32.xlu2 %v1495_v42 }
 0x44d   : > { %v1479_v43 = vpop.f32.mrf.mxu3 }
 0x455   : > { %v1705_v44 = vpop.f32.mrf.mxu3 }
 0x456   : > { %v1706_v59 = vadd.f32 %v3533_v48, %v1705_v44 }
 0x45d   : > { %v1707_v45 = vpop.f32.mrf.mxu3 }
 0x45e   : > { %v1708_v55 = vadd.f32 %v3533_v48, %v1707_v45 }
 0x460   : > { %v1824_v60 = vpack.c.bf16 %v1708_v55, %v1706_v59  ;;  %v3474_v59 = vld [vmem:[%s4678_s6 + $0x20] sm:$0xff] }
 0x465   : > { %v1710_v46 = vpop.f32.mrf.mxu3 }
 0x466   : > { %v1711_v54 = vadd.f32 %v3533_v48, %v1710_v46 }
 0x46d   : > { %v1712_v47 = vpop.f32.mrf.mxu3 }
 0x46e   : > { %v1713_v49 = vadd.f32 %v3533_v48, %v1712_v47 }
 0x470   : > { %v1825_v57 = vpack.c.bf16 %v1713_v49, %v1711_v54 }
 0x475   : > { %v1715_v40 = vpop.f32.mrf.mxu3 }
 0x476   : > { %v1716_v41 = vadd.f32 %v3533_v48, %v1715_v40 }
 0x478   : > { %v1826_v33 = vpack.c.bf16 %v1716_v41, %v1716_v41 }
 0x47a   : > { %v1837_v51 = vsel %vm1553_vm8, %v1826_v33, 0 }
 0x47b   : > { %1844 = vmatpush.bf16.msra.mxu1 %v1837_v51  ;;  %v3530_v51 = vld [vmem:[%s4685_s23 + $0x1] ss:$0 sm:$0xff] }
 0x47c   : > { %v1618_v54 = vadd.f32 %v3530_v51, %v4114_v26  ;;  %v1616_v55 = vadd.f32 %v3530_v51, %v4110_v18  ;;  %v1583_v18 = vld [vmem:[%s3860_s24] sm:$0xf] }
 0x47d   : > { %v1717_v58 = vpop.f32.mrf.mxu3 }
 0x47e   : > { %v3475_v58 = vld [vmem:[%s4678_s6 + $0x28] sm:$0xff] }
 0x47f   : > { %1845 = vmatpush.bf16.msra.mxu1 %v1825_v57  ;;  %v1719_v57 = vpack.c.bf16 %v1618_v54, %v1616_v55 }
 0x483   : > { %1846 = vmatpush.bf16.msra.mxu1 %v1824_v60  ;;  %v1623_v60 = vadd.f32 %v3530_v51, %v4120_v21 }
 0x49c   : > { %v1484_v34 = vpop.xlane.xlu1 %1483 }
 0x49d   : > { %v1498_v36 = vsub.f32 %v1468_v13, %v1484_v34  ;;  %v1621_v34 = vadd.f32 %v3530_v51, %v4117_v30 }
 0x49f   : > { %v1503_v62 = vmul.f32 1.442695, %v1498_v36  ;;  %v1720_v36 = vpack.c.bf16 %v1623_v60, %v1621_v34 }
 0x4a1   : > { %3557 = vpow2.f32 %v1503_v62  ;;  %v1626_v62 = vadd.f32 %v3530_v51, %v4124_v22 }
 0x4a3   : > { %v1721_v26 = vpack.c.bf16 %v1626_v62, %v1626_v62 }
 0x4a4   : > { %v1487_v52 = vpop.xlane.xlu2 %1486 }
 0x4a5   : > { %v1499_v53 = vsub.f32 %v1470_v19, %v1487_v52  ;;  %v1913_v52 = vsel %vm1876_vm11, %v1583_v18, 0 }
 0x4a6   : > { %1922 = vmatpush.bf16.msrb.mxu3 %v1913_v52 }
 0x4a7   : > { %v3558_v63 = vpop.eup %3557  ;;  %v1505_v0 = vmul.f32 1.442695, %v1499_v53 }
 0x4a8   : > { %v1513_v1 = vsel %vm1481_vm9, %v3558_v63, 0.0 }
 0x4a9   : > { %3559 = vpow2.f32 %v1505_v0  ;;  %1514 = vadd.xlane.f32.xlu0 %v1513_v1 }
 0x4ac   : > { %v1490_v2 = vpop.xlane.xlu0 %1489 }
 0x4ad   : > { %v1500_v56 = vsub.f32 %v1473_v25, %v1490_v2 }
 0x4af   : > { %v3560_v3 = vpop.eup %3559  ;;  %v1507_v4 = vmul.f32 1.442695, %v1500_v56 }
 0x4b0   : > { %v1516_v5 = vsel %vm1481_vm9, %v3560_v3, 0.0 }
 0x4b1   : > { %3561 = vpow2.f32 %v1507_v4  ;;  %1517 = vadd.xlane.f32.xlu1 %v1516_v5 }
 0x4b4   : > { %v1493_v6 = vpop.xlane.xlu1 %1492 }
 0x4b5   : > { %v1501_v7 = vsub.f32 %v1475_v31, %v1493_v6 }
 0x4b7   : > { %v3562_v8 = vpop.eup %3561  ;;  %v1509_v9 = vmul.f32 1.442695, %v1501_v7 }
 0x4b8   : > { %v1519_v10 = vsel %vm1481_vm9, %v3562_v8, 0.0 }
 0x4b9   : > { %3563 = vpow2.f32 %v1509_v9  ;;  %1520 = vadd.xlane.f32.xlu2 %v1519_v10 }
 0x4bc   : > { %v1497_v12 = vpop.xlane.xlu2 %1496 }
 0x4bd   : > { %v1502_v13 = vsub.f32 %v1478_v39, %v1497_v12 }
 0x4bf   : > { %v3564_v14 = vpop.eup %3563  ;;  %v1511_v17 = vmul.f32 1.442695, %v1502_v13 }
 0x4c0   : > { %v1522_v19 = vsel %vm1481_vm9, %v3564_v14, 0.0 }
 0x4c1   : > { %3565 = vpow2.f32 %v1511_v17  ;;  %1523 = vadd.xlane.f32.xlu0 %v1522_v19 }
 0x4c7   : > { %v3566_v20 = vpop.eup %3565 }
 0x4c8   : > { %v1525_v24 = vsel %vm1494_vm10, %v3566_v20, 0.0 }
 0x4c9   : > { %1526 = vadd.xlane.f32.xlu1 %v1525_v24 }
 0x51c   : > { %v1515_v25 = vpop.xlane.xlu0 %1514 }
 0x51d   : > { %3567 = vrcp.f32 %v1515_v25 }
 0x523   : > { %v3568_v29 = vpop.eup %3567 }
 0x524   : > { %v1518_v27 = vpop.xlane.xlu1 %1517  ;;  %v1533_v32 = vmul.f32 %v3568_v29, %v3558_v63  ;;  %v4217_v29 = vld [vmem:[%s4685_s23 + $0x2] ss:$0 sm:$0xff] }
 0x525   : > { %3569 = vrcp.f32 %v1518_v27 }
 0x52b   : > { %v3570_v31 = vpop.eup %3569 }
 0x52c   : > { %v1534_v38 = vmul.f32 %v3570_v31, %v3560_v3  ;;  %v1521_v39 = vpop.xlane.xlu2 %1520 }
 0x52d   : > { %3571 = vrcp.f32 %v1521_v39 }
 0x52e   : > { %v1538_v42 = vpack.c.bf16 %v1534_v38, %v1533_v32 }
 0x530   : > { %3234 = vmatmul.msk.bf16.vlgmr.msrb.gmra.mxu0 %vm1481_vm9, %v1538_v42 }
 0x531   : > { %1966 = vmatpush.bf16.msrb.mxu0 %v3475_v58 }
 0x533   : > { %v3572_v44 = vpop.eup %3571 }
 0x534   : > { %v1524_v43 = vpop.xlane.xlu0 %1523  ;;  %v1535_v46 = vmul.f32 %v3572_v44, %v3562_v8 }
 0x535   : > { %3573 = vrcp.f32 %v1524_v43  ;;  %1967 = vmatpush.bf16.msrb.mxu0 %v3474_v59 }
 0x53b   : > { %v3574_v45 = vpop.eup %3573 }
 0x53c   : > { %v1536_v47 = vmul.f32 %v3574_v45, %v3564_v14  ;;  %v1527_v48 = vpop.xlane.xlu1 %1526 }
 0x53d   : > { %3575 = vrcp.f32 %v1527_v48 }
 0x53e   : > { %v1539_v40 = vpack.c.bf16 %v1536_v47, %v1535_v46 }
 0x540   : > { %3235 = vmatmul.msk.bf16.gmra.mxu0 %vm1481_vm9, %v1539_v40 }
 0x543   : > { %v3576_v41 = vpop.eup %3575 }
 0x544   : > { %v1537_v33 = vmul.f32 %v3576_v41, %v3566_v20 }
 0x546   : > { %v1540_v49 = vpack.c.bf16 %v1537_v33, %v1537_v33 }
 0x550   : > { %3236 = vmatmul.msk.bf16.gmra.mxu0 %vm1481_vm9, %v1540_v49 }
 0x560   : > { %3285 = vmatmul.msk.bf16.vlgmr.msra.gmra.mxu0 %vm1439_vm7, %v1719_v57 }
 0x570   : > { %3286 = vmatmul.msk.bf16.gmra.mxu0 %vm1439_vm7, %v1720_v36 }
 0x580   : > { %3287 = vmatmul.msk.bf16.gmra.mxu0 %vm1439_vm7, %v1721_v26 }
 0x590   : > { %3311 = vmatmul.msk.bf16.vlgmr.msrb.gmra.mxu0 %vm1157_vm1, %v4077_v61 }
 0x5a0   : > { %3312 = vmatmul.msk.bf16.gmra.mxu0 %vm1157_vm1, %v4070_v50 }
 0x5ad   : > { %v1566_v30 = vpop.f32.mrf.mxu0 }
 0x5b0   : > { %3313 = vmatmul.msk.bf16.gmra.mxu0 %vm1157_vm1, %v4060_v37 }
 0x5b5   : > { %v1568_v21 = vpop.f32.mrf.mxu0 }
 0x5b6   : > { %v1580_v22 = vpack.c.bf16 %v1568_v21, %v1566_v30 }
 0x5b8   : > { %3295 = vmatmul.msk.bf16.vlgmr.msrb.gmra.mxu3 %vm1439_vm7, %v1580_v22 }
 0x5bd   : > { %v1571_v53 = vpop.f32.mrf.mxu0 }
 0x5c5   : > { %v1573_v63 = vpop.f32.mrf.mxu0 }
 0x5c6   : > { %v1581_v0 = vpack.c.bf16 %v1573_v63, %v1571_v53 }
 0x5c8   : > { %3296 = vmatmul.msk.bf16.gmra.mxu3 %vm1439_vm7, %v1581_v0 }
 0x5cd   : > { %v1576_v1 = vpop.f32.mrf.mxu0 }
 0x5ce   : > { %v1582_v56 = vpack.c.bf16 %v1576_v1, %v1576_v1 }
 0x5d5   : > { %v1578_v2 = vpop.f32.mrf.mxu0 }
 0x5d8   : > { %3297 = vmatmul.msk.bf16.gmra.mxu3 %vm1439_vm7, %v1582_v56 }
 0x5dd   : > { %v1752_v3 = vpop.f32.mrf.mxu0 }
 0x5de   : > { %v1753_v4 = vadd.f32 %v1752_v3, %v4142_v11 }
 0x5e0   : > { %v1766_v5 = vsel %vm1481_vm9, %v1753_v4, -inf }
 0x5e1   : > { %1767 = vmax.xlane.f32.xlu2 %v1766_v5 }
 0x5e5   : > { %v1754_v6 = vpop.f32.mrf.mxu0 }
 0x5e6   : > { %v1755_v7 = vadd.f32 %v1754_v6, %v4149_v15 }
 0x5e8   : > { %v1769_v8 = vsel %vm1481_vm9, %v1755_v7, -inf }
 0x5e9   : > { %1770 = vmax.xlane.f32.xlu0 %v1769_v8 }
 0x5ed   : > { %v1757_v9 = vpop.f32.mrf.mxu0 }
 0x5ee   : > { %v1758_v10 = vadd.f32 %v1757_v9, %v4156_v23  ;;  %v3477_v9 = vld [vmem:[%s3835_s1 + $0x28] sm:$0xff] }
 0x5ef   : > { %2011 = vmatpush.bf16.msrb.mxu1 %v3477_v9 }
 0x5f0   : > { %v1772_v12 = vsel %vm1481_vm9, %v1758_v10, -inf }
 0x5f1   : > { %1773 = vmax.xlane.f32.xlu1 %v1772_v12 }
 0x5f5   : > { %v1759_v13 = vpop.f32.mrf.mxu0 }
 0x5f6   : > { %v1760_v14 = vadd.f32 %v1759_v13, %v4163_v28 }
 0x5f8   : > { %v1775_v17 = vsel %vm1481_vm9, %v1760_v14, -inf }
 0x5f9   : > { %1776 = vmax.xlane.f32.xlu2 %v1775_v17 }
 0x5fd   : > { %v1762_v19 = vpop.f32.mrf.mxu0 }
 0x5fe   : > { %v1763_v20 = vadd.f32 %v1762_v19, %v4170_v35 }
 0x600   : > { %v1778_v24 = vsel %vm1494_vm10, %v1763_v20, -inf }
 0x601   : > { %1779 = vmax.xlane.f32.xlu0 %v1778_v24  ;;  %v3476_v24 = vld [vmem:[%s3835_s1 + $0x20] sm:$0xff] }
 0x602   : > { %2012 = vmatpush.bf16.msrb.mxu1 %v3476_v24 }
 0x605   : > { %v1764_v25 = vpop.f32.mrf.mxu0 }
 0x60d   : > { %v1969_v27 = vpop.f32.mrf.mxu0 }
 0x60e   : > { %v4220_v32 = vadd.f32 %v4217_v29, %v1969_v27 }
 0x615   : > { %v1971_v31 = vpop.f32.mrf.mxu0 }
 0x616   : > { %v4223_v38 = vadd.f32 %v4217_v29, %v1971_v31 }
 0x618   : > { %v2073_v42 = vpack.c.bf16 %v4223_v38, %v4220_v32 }
 0x61d   : > { %v1974_v39 = vpop.f32.mrf.mxu0 }
 0x61e   : > { %v4228_v44 = vadd.f32 %v4217_v29, %v1974_v39 }
 0x625   : > { %v1976_v43 = vpop.f32.mrf.mxu0 }
 0x626   : > { %v4231_v45 = vadd.f32 %v4217_v29, %v1976_v43 }
 0x628   : > { %v2074_v46 = vpack.c.bf16 %v4231_v45, %v4228_v44 }
 0x62d   : > { %v4235_v47 = vpop.f32.mrf.mxu0 }
 0x635   : > { %v1981_v48 = vpop.f32.mrf.mxu0 }
 0x63b   : > { %v4237_v40 = vpop.f32.mrf.mxu3 }
 0x643   : > { %v4239_v41 = vpop.f32.mrf.mxu3 }
 0x64b   : > { %v4241_v33 = vpop.f32.mrf.mxu3 }
 0x653   : > { %v4243_v49 = vpop.f32.mrf.mxu3 }
 0x654   : > { %v1768_v51 = vpop.xlane.xlu2 %1767 }
 0x655   : > { %v1781_v54 = vsub.f32 %v1753_v4, %v1768_v51 }
 0x657   : > { %v1786_v55 = vmul.f32 1.442695, %v1781_v54 }
 0x659   : > { %3577 = vpow2.f32 %v1786_v55 }
 0x65b   : > { %v4245_v57 = vpop.f32.mrf.mxu3 }
 0x65c   : > { %v1771_v58 = vpop.xlane.xlu0 %1770 }
 0x65d   : > { %v1782_v59 = vsub.f32 %v1755_v7, %v1771_v58 }
 0x65f   : > { %v3578_v60 = vpop.eup %3577  ;;  %v1788_v34 = vmul.f32 1.442695, %v1782_v59  ;;  %v3291_v59 = vld [vmem:[%s3860_s24 + $0x4] sm:$0xf] }
 0x660   : > { %v1796_v36 = vsel %vm1481_vm9, %v3578_v60, 0.0 }
 0x661   : > { %3579 = vpow2.f32 %v1788_v34  ;;  %1797 = vadd.xlane.f32.xlu1 %v1796_v36 }
 0x663   : > { %v1936_v62 = vpop.f32.mrf.mxu3 }
 0x664   : > { %v1774_v26 = vpop.xlane.xlu1 %1773 }
 0x665   : > { %v1783_v18 = vsub.f32 %v1758_v10, %v1774_v26 }
 0x667   : > { %v3580_v52 = vpop.eup %3579  ;;  %v1790_v30 = vmul.f32 1.442695, %v1783_v18  ;;  %v3479_v18 = vld [vmem:[%s3845_s2 + $0x28] sm:$0xff] }
 0x668   : > { %v1799_v21 = vsel %vm1481_vm9, %v3580_v52, 0.0 }
 0x669   : > { %3581 = vpow2.f32 %v1790_v30  ;;  %1800 = vadd.xlane.f32.xlu2 %v1799_v21 }
 0x66c   : > { %v1777_v22 = vpop.xlane.xlu2 %1776 }
 0x66d   : > { %v1784_v53 = vsub.f32 %v1760_v14, %v1777_v22 }
 0x66f   : > { %v3582_v63 = vpop.eup %3581  ;;  %v1792_v0 = vmul.f32 1.442695, %v1784_v53 }
 0x670   : > { %v1802_v1 = vsel %vm1481_vm9, %v3582_v63, 0.0 }
 0x671   : > { %3583 = vpow2.f32 %v1792_v0  ;;  %1803 = vadd.xlane.f32.xlu0 %v1802_v1 }
 0x674   : > { %v1780_v2 = vpop.xlane.xlu0 %1779 }
 0x675   : > { %v1785_v56 = vsub.f32 %v1763_v20, %v1780_v2  ;;  %v3481_v2 = vld [vmem:[%s4678_s6 + $0x38] sm:$0xff] }
 0x677   : > { %v3584_v3 = vpop.eup %3583  ;;  %v1794_v4 = vmul.f32 1.442695, %v1785_v56 }
 0x678   : > { %v1805_v5 = vsel %vm1481_vm9, %v3584_v3, 0.0 }
 0x679   : > { %3585 = vpow2.f32 %v1794_v4  ;;  %1806 = vadd.xlane.f32.xlu1 %v1805_v5  ;;  %v3535_v5 = vld [vmem:[%s3840_s7 + $0x2] ss:$0 sm:$0xff] }
 0x67f   : > { %v3586_v6 = vpop.eup %3585 }
 0x680   : > { %v1808_v7 = vsel %vm1494_vm10, %v3586_v6, 0.0 }
 0x681   : > { %1809 = vadd.xlane.f32.xlu2 %v1808_v7 }
 0x6d4   : > { %v1798_v8 = vpop.xlane.xlu1 %1797 }
 0x6d5   : > { %3587 = vrcp.f32 %v1798_v8 }
 0x6db   : > { %v3588_v12 = vpop.eup %3587 }
 0x6dc   : > { %v1801_v10 = vpop.xlane.xlu2 %1800  ;;  %v1816_v14 = vmul.f32 %v3588_v12, %v3578_v60  ;;  %v1878_v60 = vsel %vm1876_vm11, %v3291_v59, 0 }
 0x6dd   : > { %3589 = vrcp.f32 %v1801_v10  ;;  %1887 = vmatpush.bf16.msrb.mxu2 %v1878_v60 }
 0x6e1   : > { %2056 = vmatpush.bf16.msra.mxu2 %v3479_v18 }
 0x6e3   : > { %v3590_v13 = vpop.eup %3589 }
 0x6e4   : > { %v1817_v17 = vmul.f32 %v3590_v13, %v3580_v52  ;;  %v1804_v20 = vpop.xlane.xlu0 %1803  ;;  %v3478_v52 = vld [vmem:[%s3845_s2 + $0x20] sm:$0xff] }
 0x6e5   : > { %3591 = vrcp.f32 %v1804_v20  ;;  %2057 = vmatpush.bf16.msra.mxu2 %v3478_v52 }
 0x6e6   : > { %v1821_v19 = vpack.c.bf16 %v1817_v17, %v1816_v14 }
 0x6e8   : > { %3288 = vmatmul.msk.bf16.vlgmr.msra.gmra.mxu1 %vm1481_vm9, %v1821_v19 }
 0x6eb   : > { %v3592_v27 = vpop.eup %3591 }
 0x6ec   : > { %v1807_v25 = vpop.xlane.xlu1 %1806  ;;  %v1818_v39 = vmul.f32 %v3592_v27, %v3582_v63  ;;  %v3483_v27 = vld [vmem:[%s3835_s1 + $0x38] sm:$0xff] }
 0x6ed   : > { %3593 = vrcp.f32 %v1807_v25 }
 0x6f3   : > { %v3594_v31 = vpop.eup %3593 }
 0x6f4   : > { %v1819_v43 = vmul.f32 %v3594_v31, %v3584_v3  ;;  %v1810_v48 = vpop.xlane.xlu2 %1809  ;;  %v3480_v3 = vld [vmem:[%s4678_s6 + $0x30] sm:$0xff] }
 0x6f5   : > { %3595 = vrcp.f32 %v1810_v48  ;;  %v3482_v31 = vld [vmem:[%s3835_s1 + $0x30] sm:$0xff] }
 0x6f6   : > { %v1822_v51 = vpack.c.bf16 %v1819_v43, %v1818_v39  ;;  %v1980_v39 = vadd.f32 %v4217_v29, %v4235_v47 }
 0x6f8   : > { %3289 = vmatmul.msk.bf16.gmra.mxu1 %vm1481_vm9, %v1822_v51  ;;  %v2075_v43 = vpack.c.bf16 %v1980_v39, %v1980_v39 }
 0x6fb   : > { %v3596_v54 = vpop.eup %3595 }
 0x6fc   : > { %v1820_v55 = vmul.f32 %v3596_v54, %v3586_v6  ;;  %v3536_v54 = vld [vmem:[%s3850_s30 + $0x2] ss:$0 sm:$0xff] }
 0x6fe   : > { %v1823_v58 = vpack.c.bf16 %v1820_v55, %v1820_v55 }
 0x708   : > { %3290 = vmatmul.msk.bf16.gmra.mxu1 %vm1481_vm9, %v1823_v58 }
 0x718   : > { %3327 = vmatmul.msk.bf16.vlgmr.msrb.gmra.mxu1 %vm1157_vm1, %v4077_v61 }
 0x728   : > { %3328 = vmatmul.msk.bf16.gmra.mxu1 %vm1157_vm1, %v4070_v50 }
 0x738   : > { %3329 = vmatmul.msk.bf16.gmra.mxu1 %vm1157_vm1, %v4060_v37 }
 0x765   : > { %v1848_v34 = vpop.f32.mrf.mxu1 }
 0x76d   : > { %v1850_v36 = vpop.f32.mrf.mxu1 }
 0x76e   : > { %v1862_v62 = vpack.c.bf16 %v1850_v36, %v1848_v34 }
 0x770   : > { %3292 = vmatmul.msk.bf16.vlgmr.msrb.gmra.mxu2 %vm1439_vm7, %v1862_v62 }
 0x771   : > { %2289 = vmatpush.bf16.msrb.mxu2 %v3481_v2 }
 0x775   : > { %v1853_v26 = vpop.f32.mrf.mxu1  ;;  %2290 = vmatpush.bf16.msrb.mxu2 %v3480_v3 }
 0x77d   : > { %v1855_v30 = vpop.f32.mrf.mxu1 }
 0x77e   : > { %v1863_v21 = vpack.c.bf16 %v1855_v30, %v1853_v26 }
 0x780   : > { %3293 = vmatmul.msk.bf16.gmra.mxu2 %vm1439_vm7, %v1863_v21 }
 0x785   : > { %v1858_v22 = vpop.f32.mrf.mxu1 }
 0x786   : > { %v1864_v63 = vpack.c.bf16 %v1858_v22, %v1858_v22 }
 0x78d   : > { %v1860_v53 = vpop.f32.mrf.mxu1 }
 0x790   : > { %3294 = vmatmul.msk.bf16.gmra.mxu2 %vm1439_vm7, %v1864_v63  ;;  %v4321_v63 = vld [vmem:[%s4685_s23 + $0x3] ss:$0 sm:$0xff] }
 0x795   : > { %v2014_v0 = vpop.f32.mrf.mxu1 }
 0x796   : > { %v2015_v20 = vadd.f32 %v3535_v5, %v2014_v0 }
 0x79d   : > { %v2016_v1 = vpop.f32.mrf.mxu1 }
 0x79e   : > { %v2017_v17 = vadd.f32 %v3535_v5, %v2016_v1 }
 0x7a0   : > { %3343 = vmatmul.msk.bf16.vlgmr.msra.gmra.mxu2 %vm1157_vm1, %v4077_v61  ;;  %v2076_v24 = vpack.c.bf16 %v2017_v17, %v2015_v20 }
 0x7a2   : > { %v2089_v25 = vsel %vm1439_vm7, %v2076_v24, 0 }
 0x7a5   : > { %v2019_v56 = vpop.f32.mrf.mxu1 }
 0x7a6   : > { %v2020_v12 = vadd.f32 %v3535_v5, %v2019_v56 }
 0x7ad   : > { %v2021_v4 = vpop.f32.mrf.mxu1 }
 0x7ae   : > { %v2022_v9 = vadd.f32 %v3535_v5, %v2021_v4 }
 0x7b0   : > { %3344 = vmatmul.msk.bf16.gmra.mxu2 %vm1157_vm1, %v4070_v50  ;;  %v2077_v14 = vpack.c.bf16 %v2022_v9, %v2020_v12 }
 0x7b2   : > { %v2092_v19 = vsel %vm1439_vm7, %v2077_v14, 0 }
 0x7b5   : > { %v2024_v6 = vpop.f32.mrf.mxu1 }
 0x7b6   : > { %v2025_v7 = vadd.f32 %v3535_v5, %v2024_v6 }
 0x7b8   : > { %v2078_v8 = vpack.c.bf16 %v2025_v7, %v2025_v7 }
 0x7ba   : > { %v2095_v10 = vsel %vm1439_vm7, %v2078_v8, 0 }
 0x7bb   : > { %2102 = vmatpush.bf16.xpose.msra.mxu3 %v2095_v10 }
 0x7bd   : > { %v2026_v13 = vpop.f32.mrf.mxu1 }
 0x7c0   : > { %3345 = vmatmul.msk.bf16.gmra.mxu2 %vm1157_vm1, %v4060_v37 }
 0x7c3   : > { %2103 = vmatpush.bf16.xpose.msra.mxu3 %v2092_v19 }
 0x7cb   : > { %2104 = vmatpush.bf16.xpose.msra.mxu3 %v2089_v25 }
 0x7d0   : > { %3369 = vmatmul.msk.bf16.vlgmr.msrb.gmra.mxu2 %vm1157_vm1, %v4077_v61 }
 0x7d2   : > { %3346 = vmatmul.msk.bf16.vlgmr.msra.gmra.mxu3 %vm1439_vm7, %v2073_v42 }
 0x7d3   : > { %2334 = vmatpush.bf16.msrb.mxu3 %v3483_v27 }
 0x7d7   : > { %2335 = vmatpush.bf16.msrb.mxu3 %v3482_v31 }
 0x7e0   : > { %3370 = vmatmul.msk.bf16.gmra.mxu2 %vm1157_vm1, %v4070_v50 }
 0x7e2   : > { %3347 = vmatmul.msk.bf16.gmra.mxu3 %vm1439_vm7, %v2074_v46 }
 0x7f0   : > { %3371 = vmatmul.msk.bf16.gmra.mxu2 %vm1157_vm1, %v4060_v37 }
 0x7f2   : > { %3348 = vmatmul.msk.bf16.gmra.mxu3 %vm1439_vm7, %v2075_v43  ;;  %v3352_v43 = vld [vmem:[%s3860_s24 + $0x8] sm:$0xf] }
 0x7f3   : > { %v4301_v32 = vpop.f32.mrf.mxu2 }
 0x7fb   : > { %v4303_v38 = vpop.f32.mrf.mxu2 }
 0x802   : > { %3385 = vmatmul.msk.bf16.vlgmr.msrb.gmra.mxu3 %vm1157_vm1, %v4077_v61 }
 0x803   : > { %v4307_v42 = vpop.f32.mrf.mxu2 }
 0x80b   : > { %v4309_v44 = vpop.f32.mrf.mxu2 }
 0x812   : > { %3386 = vmatmul.msk.bf16.gmra.mxu3 %vm1157_vm1, %v4070_v50 }
 0x813   : > { %v4313_v29 = vpop.f32.mrf.mxu2 }
 0x81b   : > { %v1901_v45 = vpop.f32.mrf.mxu2 }
 0x81c   : > { %v2231_v45 = vsel %vm1876_vm11, %v3352_v43, 0 }
 0x81d   : > { %2240 = vmatpush.bf16.msra.mxu1 %v2231_v45 }
 0x822   : > { %3387 = vmatmul.msk.bf16.gmra.mxu3 %vm1157_vm1, %v4060_v37 }
 0x823   : > { %v2059_v46 = vpop.f32.mrf.mxu2 }
 0x824   : > { %v2060_v52 = vadd.f32 %v3536_v54, %v2059_v46 }
 0x82b   : > { %v2061_v47 = vpop.f32.mrf.mxu2 }
 0x82c   : > { %v2062_v62 = vadd.f32 %v3536_v54, %v2061_v47 }
 0x82e   : > { %v2178_v30 = vpack.c.bf16 %v2062_v62, %v2060_v52 }
 0x833   : > { %v2064_v48 = vpop.f32.mrf.mxu2 }
 0x834   : > { %v2065_v36 = vadd.f32 %v3536_v54, %v2064_v48  ;;  %v3538_v48 = vld [vmem:[%s3840_s7 + $0x3] ss:$0 sm:$0xff]  ;;  %s4688_s7 = scalar_lea.vmem %s4632_s21, %s3810_s29 }
 0x83b   : > { %v2066_v51 = vpop.f32.mrf.mxu2 }
 0x83c   : > { %v2067_v60 = vadd.f32 %v3536_v54, %v2066_v51 }
 0x83e   : > { %v2179_v26 = vpack.c.bf16 %v2067_v60, %v2065_v36 }
 0x843   : > { %v2069_v55 = vpop.f32.mrf.mxu2 }
 0x844   : > { %v2070_v58 = vadd.f32 %v3536_v54, %v2069_v55 }
 0x846   : > { %v2180_v59 = vpack.c.bf16 %v2070_v58, %v2070_v58 }
 0x848   : > { %v2191_v34 = vsel %vm1553_vm8, %v2180_v59, 0 }
 0x849   : > { %2198 = vmatpush.bf16.msra.mxu0 %v2191_v34 }
 0x84b   : > { %v2071_v18 = vpop.f32.mrf.mxu2 }
 0x84d   : > { %2199 = vmatpush.bf16.msra.mxu0 %v2179_v26 }
 0x851   : > { %2200 = vmatpush.bf16.msra.mxu0 %v2178_v30 }
 0x853   : > { %v2292_v21 = vpop.f32.mrf.mxu2 }
 0x854   : > { %v4325_v2 = vadd.f32 %v4321_v63, %v2292_v21 }
 0x855   : > { %v2106_v22 = vpop.f32.mrf.mxu3 }
 0x856   : > { %v2107_v53 = vadd.f32 %v2106_v22, %v4142_v11 }
 0x858   : > { %v2120_v0 = vsel %vm1481_vm9, %v2107_v53, -inf }
 0x859   : > { %2121 = vmax.xlane.f32.xlu0 %v2120_v0 }
 0x85b   : > { %v2294_v1 = vpop.f32.mrf.mxu2 }
 0x85c   : > { %v4328_v56 = vadd.f32 %v4321_v63, %v2294_v1 }
 0x85d   : > { %v2108_v3 = vpop.f32.mrf.mxu3 }
 0x85e   : > { %v2396_v4 = vpack.c.bf16 %v4328_v56, %v4325_v2  ;;  %v2109_v5 = vadd.f32 %v2108_v3, %v4149_v15 }
 0x860   : > { %v2123_v11 = vsel %vm1481_vm9, %v2109_v5, -inf }
 0x861   : > { %2124 = vmax.xlane.f32.xlu1 %v2123_v11 }
 0x863   : > { %v2297_v6 = vpop.f32.mrf.mxu2 }
 0x864   : > { %v4337_v12 = vadd.f32 %v4321_v63, %v2297_v6 }
 0x865   : > { %v2111_v7 = vpop.f32.mrf.mxu3 }
 0x866   : > { %v2112_v8 = vadd.f32 %v2111_v7, %v4156_v23 }
 0x868   : > { %v2126_v9 = vsel %vm1481_vm9, %v2112_v8, -inf }
 0x869   : > { %2127 = vmax.xlane.f32.xlu2 %v2126_v9 }
 0x86b   : > { %v2299_v10 = vpop.f32.mrf.mxu2 }
 0x86c   : > { %v4340_v13 = vadd.f32 %v4321_v63, %v2299_v10 }
 0x86d   : > { %v2113_v14 = vpop.f32.mrf.mxu3 }
 0x86e   : > { %v2397_v15 = vpack.c.bf16 %v4340_v13, %v4337_v12  ;;  %v2114_v17 = vadd.f32 %v2113_v14, %v4163_v28  ;;  %v1925_v13 = vadd.f32 %v4237_v40, %v4301_v32  ;;  %v1935_v32 = vadd.f32 %v4245_v57, %v4313_v29 }
 0x870   : > { %v2129_v19 = vsel %vm1481_vm9, %v2114_v17, -inf }
 0x871   : > { %2130 = vmax.xlane.f32.xlu0 %v2129_v19 }
 0x873   : > { %v4346_v23 = vpop.f32.mrf.mxu2 }
 0x875   : > { %v2116_v20 = vpop.f32.mrf.mxu3 }
 0x876   : > { %v2117_v24 = vadd.f32 %v2116_v20, %v4170_v35 }
 0x878   : > { %v2132_v25 = vsel %vm1494_vm10, %v2117_v24, -inf }
 0x879   : > { %2133 = vmax.xlane.f32.xlu1 %v2132_v25 }
 0x87b   : > { %v2304_v27 = vpop.f32.mrf.mxu2 }
 0x87d   : > { %v2118_v31 = vpop.f32.mrf.mxu3 }
 0x885   : > { %v2337_v39 = vpop.f32.mrf.mxu3 }
 0x886   : > { %v2338_v26 = vadd.f32 %v3538_v48, %v2337_v39 }
 0x88d   : > { %v2339_v28 = vpop.f32.mrf.mxu3 }
 0x88e   : > { %v2340_v36 = vadd.f32 %v3538_v48, %v2339_v28 }
 0x890   : > { %v2399_v18 = vpack.c.bf16 %v2340_v36, %v2338_v26 }
 0x892   : > { %v2412_v52 = vsel %vm1439_vm7, %v2399_v18, 0 }
 0x895   : > { %v2342_v46 = vpop.f32.mrf.mxu3 }
 0x896   : > { %v2343_v59 = vadd.f32 %v3538_v48, %v2342_v46 }
 0x89d   : > { %v2344_v47 = vpop.f32.mrf.mxu3 }
 0x89e   : > { %v2345_v58 = vadd.f32 %v3538_v48, %v2344_v47 }
 0x8a0   : > { %v2400_v34 = vpack.c.bf16 %v2345_v58, %v2343_v59  ;;  %v3484_v59 = vld [vmem:[%s3845_s2 + $0x30] sm:$0xff] }
 0x8a2   : > { %v2415_v62 = vsel %vm1439_vm7, %v2400_v34, 0 }
 0x8a5   : > { %v2347_v51 = vpop.f32.mrf.mxu3 }
 0x8a6   : > { %v2348_v54 = vadd.f32 %v3538_v48, %v2347_v51 }
 0x8a8   : > { %v2401_v55 = vpack.c.bf16 %v2348_v54, %v2348_v54 }
 0x8aa   : > { %v2418_v35 = vsel %vm1439_vm7, %v2401_v55, 0 }
 0x8ab   : > { %2425 = vmatpush.bf16.xpose.msrb.mxu1 %v2418_v35  ;;  %v3485_v35 = vld [vmem:[%s3845_s2 + $0x38] sm:$0xff] }
 0x8ac   : > { %2379 = vmatpush.bf16.msrb.mxu0 %v3485_v35 }
 0x8ad   : > { %v2349_v60 = vpop.f32.mrf.mxu3 }
 0x8b0   : > { %2380 = vmatpush.bf16.msrb.mxu0 %v3484_v59  ;;  %v3669_v59 = vld [vmem:[%s4686_s5 + $0x10] sm:$0xff] }
 0x8b3   : > { %2426 = vmatpush.bf16.xpose.msrb.mxu1 %v2415_v62 }
 0x8bb   : > { %2427 = vmatpush.bf16.xpose.msrb.mxu1 %v2412_v52 }
 0x8cc   : > { %v2122_v30 = vpop.xlane.xlu0 %2121 }
 0x8cd   : > { %v2135_v21 = vsub.f32 %v2107_v53, %v2122_v30 }
 0x8cf   : > { %v2140_v22 = vmul.f32 1.442695, %v2135_v21 }
 0x8d1   : > { %3597 = vpow2.f32 %v2140_v22 }
 0x8d4   : > { %v2125_v0 = vpop.xlane.xlu1 %2124 }
 0x8d5   : > { %v2136_v1 = vsub.f32 %v2109_v5, %v2125_v0 }
 0x8d7   : > { %v3598_v3 = vpop.eup %3597  ;;  %v2142_v11 = vmul.f32 1.442695, %v2136_v1 }
 0x8d8   : > { %v2150_v6 = vsel %vm1481_vm9, %v3598_v3, 0.0 }
 0x8d9   : > { %3599 = vpow2.f32 %v2142_v11  ;;  %2151 = vadd.xlane.f32.xlu2 %v2150_v6 }
 0x8dc   : > { %v2128_v7 = vpop.xlane.xlu2 %2127 }
 0x8dd   : > { %v2137_v9 = vsub.f32 %v2112_v8, %v2128_v7 }
 0x8df   : > { %v3600_v10 = vpop.eup %3599  ;;  %v2144_v14 = vmul.f32 1.442695, %v2137_v9 }
 0x8e0   : > { %v2153_v19 = vsel %vm1481_vm9, %v3600_v10, 0.0 }
 0x8e1   : > { %3601 = vpow2.f32 %v2144_v14  ;;  %2154 = vadd.xlane.f32.xlu0 %v2153_v19 }
 0x8e4   : > { %v2131_v20 = vpop.xlane.xlu0 %2130 }
 0x8e5   : > { %v2138_v53 = vsub.f32 %v2114_v17, %v2131_v20  ;;  %v3539_v20 = vld [vmem:[%s3850_s30 + $0x3] ss:$0 sm:$0xff] }
 0x8e7   : > { %v3602_v25 = vpop.eup %3601  ;;  %v2146_v27 = vmul.f32 1.442695, %v2138_v53 }
 0x8e8   : > { %v2156_v5 = vsel %vm1481_vm9, %v3602_v25, 0.0 }
 0x8e9   : > { %3603 = vpow2.f32 %v2146_v27  ;;  %2157 = vadd.xlane.f32.xlu1 %v2156_v5 }
 0x8ec   : > { %v2134_v31 = vpop.xlane.xlu1 %2133 }
 0x8ed   : > { %v2139_v39 = vsub.f32 %v2117_v24, %v2134_v31  ;;  %v2303_v31 = vadd.f32 %v4321_v63, %v4346_v23  ;;  %v1927_v63 = vadd.f32 %v4239_v41, %v4303_v38 }
 0x8ef   : > { %v3604_v43 = vpop.eup %3603  ;;  %v2148_v45 = vmul.f32 1.442695, %v2139_v39 }
 0x8f0   : > { %v2159_v8 = vsel %vm1481_vm9, %v3604_v43, 0.0 }
 0x8f1   : > { %3605 = vpow2.f32 %v2148_v45  ;;  %2160 = vadd.xlane.f32.xlu2 %v2159_v8  ;;  %v2398_v45 = vpack.c.bf16 %v2303_v31, %v2303_v31 }
 0x8f7   : > { %v3606_v28 = vpop.eup %3605 }
 0x8f8   : > { %v2162_v46 = vsel %vm1494_vm10, %v3606_v28, 0.0 }
 0x8f9   : > { %2163 = vadd.xlane.f32.xlu0 %v2162_v46 }
 0x94c   : > { %v2152_v17 = vpop.xlane.xlu2 %2151 }
 0x94d   : > { %3607 = vrcp.f32 %v2152_v17  ;;  %v1930_v17 = vadd.f32 %v4241_v33, %v4307_v42  ;;  %v3667_v33 = vld [vmem:[%s4686_s5] sm:$0xff] }
 0x953   : > { %v3608_v48 = vpop.eup %3607 }
 0x954   : > { %v2155_v47 = vpop.xlane.xlu0 %2154  ;;  %v2170_v54 = vmul.f32 %v3608_v48, %v3598_v3 }
 0x955   : > { %3609 = vrcp.f32 %v2155_v47 }
 0x95b   : > { %v3610_v51 = vpop.eup %3609 }
 0x95c   : > { %v2171_v24 = vmul.f32 %v3610_v51, %v3600_v10  ;;  %v2158_v58 = vpop.xlane.xlu1 %2157  ;;  %v1932_v51 = vadd.f32 %v4243_v49, %v4309_v44  ;;  %v3668_v44 = vld [vmem:[%s4686_s5 + $0x8] sm:$0xff] }
 0x95d   : > { %3611 = vrcp.f32 %v2158_v58 }
 0x95e   : > { %v2175_v55 = vpack.c.bf16 %v2171_v24, %v2170_v54 }
 0x960   : > { %3349 = vmatmul.msk.bf16.vlgmr.msra.gmra.mxu0 %vm1481_vm9, %v2175_v55 }
 0x963   : > { %v3612_v34 = vpop.eup %3611 }
 0x964   : > { %v2161_v60 = vpop.xlane.xlu2 %2160  ;;  %v2172_v62 = vmul.f32 %v3612_v34, %v3602_v25 }
 0x965   : > { %3613 = vrcp.f32 %v2161_v60 }
 0x96b   : > { %v3614_v36 = vpop.eup %3613 }
 0x96c   : > { %v2173_v26 = vmul.f32 %v3614_v36, %v3604_v43  ;;  %v2164_v18 = vpop.xlane.xlu0 %2163 }
 0x96d   : > { %3615 = vrcp.f32 %v2164_v18 }
 0x96e   : > { %v2176_v52 = vpack.c.bf16 %v2173_v26, %v2172_v62  ;;  %v3670_v62 = vld [vmem:[%s4686_s5 + $0x18] sm:$0xff] }
 0x970   : > { %3350 = vmatmul.msk.bf16.gmra.mxu0 %vm1481_vm9, %v2176_v52 }
 0x973   : > { %v3616_v30 = vpop.eup %3615 }
 0x974   : > { %v2174_v21 = vmul.f32 %v3616_v30, %v3606_v28  ;;  %v3671_v30 = vld [vmem:[%s4686_s5 + $0x20] sm:$0x3] }
 0x976   : > { %v2177_v22 = vpack.c.bf16 %v2174_v21, %v2174_v21 }
 0x980   : > { %3351 = vmatmul.msk.bf16.gmra.mxu0 %vm1481_vm9, %v2177_v22 }
 0x990   : > { %3401 = vmatmul.msk.bf16.vlgmr.msrb.gmra.mxu0 %vm1157_vm1, %v4077_v61 }
 0x9a0   : > { %3402 = vmatmul.msk.bf16.gmra.mxu0 %vm1157_vm1, %v4070_v50 }
 0x9b0   : > { %3403 = vmatmul.msk.bf16.gmra.mxu0 %vm1157_vm1, %v4060_v37 }
 0x9dd   : > { %v2202_v0 = vpop.f32.mrf.mxu0 }
 0x9e5   : > { %v2204_v1 = vpop.f32.mrf.mxu0 }
 0x9e6   : > { %v2216_v3 = vpack.c.bf16 %v2204_v1, %v2202_v0 }
 0x9e8   : > { %3353 = vmatmul.msk.bf16.vlgmr.msra.gmra.mxu1 %vm1439_vm7, %v2216_v3 }
 0x9ed   : > { %v2207_v11 = vpop.f32.mrf.mxu0 }
 0x9f5   : > { %v2209_v6 = vpop.f32.mrf.mxu0 }
 0x9f6   : > { %v2217_v7 = vpack.c.bf16 %v2209_v6, %v2207_v11 }
 0x9f8   : > { %3354 = vmatmul.msk.bf16.gmra.mxu1 %vm1439_vm7, %v2217_v7 }
 0x9fd   : > { %v2212_v9 = vpop.f32.mrf.mxu0 }
 0x9fe   : > { %v2218_v61 = vpack.c.bf16 %v2212_v9, %v2212_v9 }
 0xa05   : > { %v2214_v10 = vpop.f32.mrf.mxu0 }
 0xa08   : > { %3355 = vmatmul.msk.bf16.gmra.mxu1 %vm1439_vm7, %v2218_v61 }
 0xa0d   : > { %v2382_v50 = vpop.f32.mrf.mxu0 }
 0xa0e   : > { %v2383_v8 = vadd.f32 %v3539_v20, %v2382_v50 }
 0xa15   : > { %v2384_v14 = vpop.f32.mrf.mxu0 }
 0xa16   : > { %v2385_v56 = vadd.f32 %v3539_v20, %v2384_v14 }
 0xa18   : > { %3404 = vmatmul.msk.bf16.vlgmr.msrb.gmra.mxu1 %vm1439_vm7, %v2396_v4  ;;  %v2501_v12 = vpack.c.bf16 %v2385_v56, %v2383_v8 }
 0xa1d   : > { %v2387_v37 = vpop.f32.mrf.mxu0 }
 0xa1e   : > { %v2388_v2 = vadd.f32 %v3539_v20, %v2387_v37 }
 0xa25   : > { %v2389_v19 = vpop.f32.mrf.mxu0 }
 0xa26   : > { %v2390_v5 = vadd.f32 %v3539_v20, %v2389_v19 }
 0xa28   : > { %3405 = vmatmul.msk.bf16.gmra.mxu1 %vm1439_vm7, %v2397_v15  ;;  %v2502_v4 = vpack.c.bf16 %v2390_v5, %v2388_v2 }
 0xa2d   : > { %v2392_v53 = vpop.f32.mrf.mxu0 }
 0xa2e   : > { %v2393_v25 = vadd.f32 %v3539_v20, %v2392_v53 }
 0xa30   : > { %v2503_v27 = vpack.c.bf16 %v2393_v25, %v2393_v25 }
 0xa32   : > { %v2514_v39 = vsel %vm1553_vm8, %v2503_v27, 0 }
 0xa33   : > { %2521 = vmatpush.bf16.msra.mxu2 %v2514_v39 }
 0xa35   : > { %v2394_v43 = vpop.f32.mrf.mxu0 }
 0xa37   : > { %2522 = vmatpush.bf16.msra.mxu2 %v2502_v4 }
 0xa38   : > { %3406 = vmatmul.msk.bf16.gmra.mxu1 %vm1439_vm7, %v2398_v45 }
 0xa3b   : > { %2523 = vmatpush.bf16.msra.mxu2 %v2501_v12 }
 0xa65   : > { %v2242_v15 = vpop.f32.mrf.mxu1 }
 0xa66   : > { %v4390_v28 = vadd.f32 %v2242_v15, %v1925_v13 }
 0xa6d   : > { %v2244_v23 = vpop.f32.mrf.mxu1 }
 0xa6e   : > { %v4394_v46 = vadd.f32 %v2244_v23, %v1927_v63 }
 0xa75   : > { %v2247_v47 = vpop.f32.mrf.mxu1 }
 0xa76   : > { %v4398_v48 = vadd.f32 %v2247_v47, %v1930_v17 }
 0xa7d   : > { %v2249_v54 = vpop.f32.mrf.mxu1 }
 0xa7e   : > { %v4402_v40 = vadd.f32 %v2249_v54, %v1932_v51  ;;  %v3410_v54 = vld [vmem:[%s3860_s24 + $0xc] sm:$0xf] }
 0xa85   : > { %v2252_v24 = vpop.f32.mrf.mxu1 }
 0xa86   : > { %v4406_v41 = vadd.f32 %v2252_v24, %v1935_v32  ;;  %v2554_v32 = vsel %vm1876_vm11, %v3410_v54, 0 }
 0xa87   : > { %2563 = vmatpush.bf16.msra.mxu3 %v2554_v32 }
 0xa8d   : > { %v2254_v38 = vpop.f32.mrf.mxu1 }
 0xa95   : > { %v2429_v55 = vpop.f32.mrf.mxu1 }
 0xa96   : > { %v2430_v42 = vadd.f32 %v3667_v33, %v2429_v55 }
 0xa98   : > { %v2443_v58 = vsel %vm1481_vm9, %v2430_v42, -inf }
 0xa99   : > { %2444 = vmax.xlane.f32.xlu1 %v2443_v58 }
 0xa9d   : > { %v2431_v49 = vpop.f32.mrf.mxu1 }
 0xa9e   : > { %v2432_v35 = vadd.f32 %v3668_v44, %v2431_v49 }
 0xaa0   : > { %v2446_v57 = vsel %vm1481_vm9, %v2432_v35, -inf }
 0xaa1   : > { %2447 = vmax.xlane.f32.xlu2 %v2446_v57 }
 0xaa5   : > { %v2434_v29 = vpop.f32.mrf.mxu1 }
 0xaa6   : > { %v2435_v60 = vadd.f32 %v3669_v59, %v2434_v29 }
 0xaa8   : > { %v2449_v34 = vsel %vm1481_vm9, %v2435_v60, -inf }
 0xaa9   : > { %2450 = vmax.xlane.f32.xlu0 %v2449_v34 }
 0xaad   : > { %v2436_v36 = vpop.f32.mrf.mxu1 }
 0xaae   : > { %v2437_v26 = vadd.f32 %v3670_v62, %v2436_v36 }
 0xab0   : > { %v2452_v18 = vsel %vm1481_vm9, %v2437_v26, -inf }
 0xab1   : > { %2453 = vmax.xlane.f32.xlu1 %v2452_v18 }
 0xab5   : > { %v2439_v52 = vpop.f32.mrf.mxu1 }
 0xab6   : > { %v2440_v21 = vadd.f32 %v3671_v30, %v2439_v52 }
 0xab8   : > { %v2455_v22 = vsel %vm1494_vm10, %v2440_v21, -inf }
 0xab9   : > { %2456 = vmax.xlane.f32.xlu1 %v2455_v22  ;;  %v3540_v22 = vld [vmem:[%s4687_s26] ss:$0 sm:$0xff] }
 0xabd   : > { %v2441_v0 = vpop.f32.mrf.mxu1 }
 0xabe   : > { %v3672_v0 = vld [vmem:[%s4677_s3] sm:$0xff] }
 0xb0c   : > { %v2445_v1 = vpop.xlane.xlu1 %2444 }
 0xb0d   : > { %v2458_v3 = vsub.f32 %v2430_v42, %v2445_v1 }
 0xb0f   : > { %v2463_v11 = vmul.f32 1.442695, %v2458_v3 }
 0xb11   : > { %3617 = vpow2.f32 %v2463_v11 }
 0xb14   : > { %v2448_v6 = vpop.xlane.xlu2 %2447 }
 0xb15   : > { %v2459_v7 = vsub.f32 %v2432_v35, %v2448_v6 }
 0xb17   : > { %v3618_v9 = vpop.eup %3617  ;;  %v2465_v10 = vmul.f32 1.442695, %v2459_v7 }
 0xb18   : > { %v2473_v61 = vsel %vm1481_vm9, %v3618_v9, 0.0 }
 0xb19   : > { %3619 = vpow2.f32 %v2465_v10  ;;  %2474 = vadd.xlane.f32.xlu2 %v2473_v61 }
 0xb1c   : > { %v2451_v50 = vpop.xlane.xlu0 %2450 }
 0xb1d   : > { %v2460_v14 = vsub.f32 %v2435_v60, %v2451_v50 }
 0xb1f   : > { %v3620_v37 = vpop.eup %3619  ;;  %v2467_v19 = vmul.f32 1.442695, %v2460_v14 }
 0xb20   : > { %v2476_v20 = vsel %vm1481_vm9, %v3620_v37, 0.0 }
 0xb21   : > { %3621 = vpow2.f32 %v2467_v19  ;;  %2477 = vadd.xlane.f32.xlu0 %v2476_v20 }
 0xb24   : > { %v2454_v53 = vpop.xlane.xlu1 %2453 }
 0xb25   : > { %v2461_v25 = vsub.f32 %v2437_v26, %v2454_v53 }
 0xb27   : > { %v3622_v27 = vpop.eup %3621  ;;  %v2469_v5 = vmul.f32 1.442695, %v2461_v25 }
 0xb28   : > { %v2479_v31 = vsel %vm1481_vm9, %v3622_v27, 0.0 }
 0xb29   : > { %3623 = vpow2.f32 %v2469_v5  ;;  %2480 = vadd.xlane.f32.xlu2 %v2479_v31 }
 0xb2c   : > { %v2457_v39 = vpop.xlane.xlu1 %2456 }
 0xb2d   : > { %v2462_v2 = vsub.f32 %v2440_v21, %v2457_v39 }
 0xb2f   : > { %v3624_v56 = vpop.eup %3623  ;;  %v2471_v4 = vmul.f32 1.442695, %v2462_v2 }
 0xb30   : > { %v2482_v43 = vsel %vm1481_vm9, %v3624_v56, 0.0 }
 0xb31   : > { %3625 = vpow2.f32 %v2471_v4  ;;  %2483 = vadd.xlane.f32.xlu0 %v2482_v43 }
 0xb37   : > { %v3626_v45 = vpop.eup %3625 }
 0xb38   : > { %v2485_v8 = vsel %vm1494_vm10, %v3626_v45, 0.0 }
 0xb39   : > { %2486 = vadd.xlane.f32.xlu1 %v2485_v8 }
 0xb8c   : > { %v2475_v12 = vpop.xlane.xlu2 %2474 }
 0xb8d   : > { %3627 = vrcp.f32 %v2475_v12 }
 0xb93   : > { %v3628_v15 = vpop.eup %3627 }
 0xb94   : > { %v2478_v13 = vpop.xlane.xlu0 %2477  ;;  %v2493_v23 = vmul.f32 %v3628_v15, %v3618_v9 }
 0xb95   : > { %3629 = vrcp.f32 %v2478_v13 }
 0xb9b   : > { %v3630_v63 = vpop.eup %3629 }
 0xb9c   : > { %v2494_v17 = vmul.f32 %v3630_v63, %v3620_v37  ;;  %v2481_v51 = vpop.xlane.xlu2 %2480  ;;  %v3674_v37 = vld [vmem:[%s4677_s3 + $0x10] sm:$0xff] }
 0xb9d   : > { %3631 = vrcp.f32 %v2481_v51 }
 0xb9e   : > { %v2498_v47 = vpack.c.bf16 %v2494_v17, %v2493_v23 }
 0xba0   : > { %3407 = vmatmul.msk.bf16.vlgmr.msra.gmra.mxu2 %vm1481_vm9, %v2498_v47 }
 0xba3   : > { %v3632_v38 = vpop.eup %3631 }
 0xba4   : > { %v2484_v24 = vpop.xlane.xlu0 %2483  ;;  %v2495_v33 = vmul.f32 %v3632_v38, %v3622_v27  ;;  %v3675_v27 = vld [vmem:[%s4677_s3 + $0x18] sm:$0xff] }
 0xba5   : > { %3633 = vrcp.f32 %v2484_v24 }
 0xbab   : > { %v3634_v55 = vpop.eup %3633 }
 0xbac   : > { %v2496_v42 = vmul.f32 %v3634_v55, %v3624_v56  ;;  %v2487_v58 = vpop.xlane.xlu1 %2486  ;;  %v3676_v56 = vld [vmem:[%s4677_s3 + $0x20] sm:$0x3] }
 0xbad   : > { %3635 = vrcp.f32 %v2487_v58 }
 0xbae   : > { %v2499_v49 = vpack.c.bf16 %v2496_v42, %v2495_v33 }
 0xbb0   : > { %3408 = vmatmul.msk.bf16.gmra.mxu2 %vm1481_vm9, %v2499_v49 }
 0xbb3   : > { %v3636_v44 = vpop.eup %3635 }
 0xbb4   : > { %v2497_v35 = vmul.f32 %v3636_v44, %v3626_v45 }
 0xbb6   : > { %v2500_v57 = vpack.c.bf16 %v2497_v35, %v2497_v35 }
 0xbc0   : > { %3409 = vmatmul.msk.bf16.gmra.mxu2 %vm1481_vm9, %v2500_v57 }
 0xc23   : > { %v2525_v29 = vpop.f32.mrf.mxu2 }
 0xc2b   : > { %v2527_v59 = vpop.f32.mrf.mxu2 }
 0xc2c   : > { %v2539_v60 = vpack.c.bf16 %v2527_v59, %v2525_v29 }
 0xc2e   : > { %3411 = vmatmul.msk.bf16.vlgmr.msra.gmra.mxu3 %vm1439_vm7, %v2539_v60 }
 0xc33   : > { %v2530_v34 = vpop.f32.mrf.mxu2 }
 0xc3b   : > { %v2532_v36 = vpop.f32.mrf.mxu2 }
 0xc3c   : > { %v2540_v62 = vpack.c.bf16 %v2532_v36, %v2530_v34  ;;  %v3487_v34 = vld [vmem:[%s3873_s12 + $0x8] sm:$0xff] }
 0xc3d   : > { %2764 = vmatpush.bf16.msra.mxu0 %v3487_v34 }
 0xc3e   : > { %3412 = vmatmul.msk.bf16.gmra.mxu3 %vm1439_vm7, %v2540_v62 }
 0xc43   : > { %v2535_v26 = vpop.f32.mrf.mxu2 }
 0xc44   : > { %v2541_v52 = vpack.c.bf16 %v2535_v26, %v2535_v26 }
 0xc4b   : > { %v2537_v18 = vpop.f32.mrf.mxu2 }
 0xc4c   : > { %v3486_v18 = vld [vmem:[%s3873_s12] sm:$0xff] }
 0xc4d   : > { %2765 = vmatpush.bf16.msra.mxu0 %v3486_v18 }
 0xc4e   : > { %3413 = vmatmul.msk.bf16.gmra.mxu3 %vm1439_vm7, %v2541_v52 }
 0xcb1   : > { %v2565_v30 = vpop.f32.mrf.mxu3 }
 0xcb2   : > { %v2579_v21 = vadd.f32 %v2565_v30, %v4390_v28  ;;  %v3673_v28 = vld [vmem:[%s4677_s3 + $0x8] sm:$0xff] }
 0xcb4   : > { %v2584_v1 = vadd.f32 %v3672_v0, %v2579_v21 }
 0xcb6   : > { %v4450_v3 = vadd.f32 %v3540_v22, %v2584_v1 }
 0xcb8   : > { %v2600_v11 = vsel %vm1157_vm1, %v4450_v3, 0.0 }
 0xcb9   : > { %2601 = vadd.xlane.f32.xlu2 %v2600_v11  ;;  %v2567_v6 = vpop.f32.mrf.mxu3 }
 0xcba   : > { %v2580_v7 = vadd.f32 %v2567_v6, %v4394_v46 }
 0xcbc   : > { %v2585_v9 = vadd.f32 %v3673_v28, %v2580_v7 }
 0xcbe   : > { %v4458_v10 = vadd.f32 %v3540_v22, %v2585_v9 }
 0xcc0   : > { %v2603_v61 = vsel %vm1157_vm1, %v4458_v10, 0.0 }
 0xcc1   : > { %2604 = vadd.xlane.f32.xlu0 %v2603_v61  ;;  %v2570_v50 = vpop.f32.mrf.mxu3 }
 0xcc2   : > { %v2581_v14 = vadd.f32 %v2570_v50, %v4398_v48 }
 0xcc4   : > { %v2586_v19 = vadd.f32 %v3674_v37, %v2581_v14 }
 0xcc6   : > { %v4466_v46 = vadd.f32 %v3540_v22, %v2586_v19 }
 0xcc8   : > { %v2606_v20 = vsel %vm1157_vm1, %v4466_v46, 0.0 }
 0xcc9   : > { %2607 = vadd.xlane.f32.xlu1 %v2606_v20  ;;  %v2572_v53 = vpop.f32.mrf.mxu3 }
 0xcca   : > { %v2582_v25 = vadd.f32 %v2572_v53, %v4402_v40 }
 0xccc   : > { %v2587_v5 = vadd.f32 %v3675_v27, %v2582_v25 }
 0xcce   : > { %v4474_v48 = vadd.f32 %v3540_v22, %v2587_v5 }
 0xcd0   : > { %v2609_v31 = vsel %vm1157_vm1, %v4474_v48, 0.0 }
 0xcd1   : > { %2610 = vadd.xlane.f32.xlu2 %v2609_v31  ;;  %v2575_v39 = vpop.f32.mrf.mxu3  ;;  %v3541_v31 = vld [vmem:[%s898_s22] ss:$0 sm:$0xff] }
 0xcd2   : > { %v2583_v2 = vadd.f32 %v2575_v39, %v4406_v41 }
 0xcd4   : > { %v2588_v4 = vadd.f32 %v3676_v56, %v2583_v2 }
 0xcd6   : > { %v4482_v40 = vadd.f32 %v3540_v22, %v2588_v4 }
 0xcd8   : > { %v2612_v43 = vsel %vm1170_vm5, %v4482_v40, 0.0 }
 0xcd9   : > { %2613 = vadd.xlane.f32.xlu0 %v2612_v43  ;;  %v2577_v45 = vpop.f32.mrf.mxu3 }
 0xd2c   : > { %v2602_v8 = vpop.xlane.xlu2 %2601 }
 0xd2d   : > { %v2615_v12 = vmul.f32 %v2602_v8, %v4003_v16  ;;  %v3542_v8 = vld [vmem:[%s901_s8] ss:$0 sm:$0xff] }
 0xd2f   : > { %v4488_v13 = vsub.f32 %v4450_v3, %v2615_v12 }
 0xd31   : > { %v2625_v41 = vmul.f32 %v4488_v13, %v4488_v13 }
 0xd33   : > { %v2630_v15 = vsel %vm1157_vm1, %v2625_v41, 0.0 }
 0xd34   : > { %v2605_v63 = vpop.xlane.xlu0 %2604  ;;  %2631 = vadd.xlane.f32.xlu1 %v2630_v15 }
 0xd35   : > { %v2616_v23 = vmul.f32 %v2605_v63, %v4003_v16 }
 0xd37   : > { %v4495_v17 = vsub.f32 %v4458_v10, %v2616_v23 }
 0xd39   : > { %v2626_v47 = vmul.f32 %v4495_v17, %v4495_v17 }
 0xd3b   : > { %v2633_v51 = vsel %vm1157_vm1, %v2626_v47, 0.0 }
 0xd3c   : > { %v2608_v54 = vpop.xlane.xlu1 %2607  ;;  %2634 = vadd.xlane.f32.xlu2 %v2633_v51 }
 0xd3d   : > { %v2617_v32 = vmul.f32 %v2608_v54, %v4003_v16 }
 0xd3f   : > { %v4502_v24 = vsub.f32 %v4466_v46, %v2617_v32 }
 0xd41   : > { %v2627_v38 = vmul.f32 %v4502_v24, %v4502_v24 }
 0xd43   : > { %v2636_v55 = vsel %vm1157_vm1, %v2627_v38, 0.0 }
 0xd44   : > { %v2611_v33 = vpop.xlane.xlu2 %2610  ;;  %2637 = vadd.xlane.f32.xlu0 %v2636_v55 }
 0xd45   : > { %v2618_v42 = vmul.f32 %v2611_v33, %v4003_v16 }
 0xd47   : > { %v4509_v58 = vsub.f32 %v4474_v48, %v2618_v42 }
 0xd49   : > { %v2628_v49 = vmul.f32 %v4509_v58, %v4509_v58 }
 0xd4b   : > { %v2639_v44 = vsel %vm1157_vm1, %v2628_v49, 0.0 }
 0xd4c   : > { %2640 = vadd.xlane.f32.xlu1 %v2639_v44  ;;  %v2614_v35 = vpop.xlane.xlu0 %2613 }
 0xd4d   : > { %v2619_v57 = vmul.f32 %v2614_v35, %v4003_v16 }
 0xd4f   : > { %v4516_v29 = vsub.f32 %v4482_v40, %v2619_v57 }
 0xd51   : > { %v2629_v59 = vmul.f32 %v4516_v29, %v4516_v29 }
 0xd53   : > { %v2642_v60 = vsel %vm1170_vm5, %v2629_v59, 0.0 }
 0xd54   : > { %2643 = vadd.xlane.f32.xlu2 %v2642_v60 }
 0xda7   : > { %v2632_v36 = vpop.xlane.xlu1 %2631 }
 0xda8   : > { %v2645_v62 = vmul.f32 %v2632_v36, %v4003_v16 }
 0xdaa   : > { %v2650_v26 = vadd.f32 1e-05, %v2645_v62 }
 0xdac   : > { %3637 = vrsqrt.f32 %v2650_v26  ;;  %vm2661_vm13 = vweird.f32 %v2650_v26 }
 0xdaf   : > { %v2635_v52 = vpop.xlane.xlu2 %2634 }
 0xdb0   : > { %v2646_v30 = vmul.f32 %v2635_v52, %v4003_v16 }
 0xdb2   : > { %v3638_v21 = vpop.eup %3637  ;;  %v2651_v22 = vadd.f32 1e-05, %v2646_v30 }
 0xdb3   : > { %v2656_v0 = vmul.f32 %v3638_v21, %v2650_v26  ;;  %vm2662_vm12 = vweird.f32 %v3638_v21 }
 0xdb4   : > { %3639 = vrsqrt.f32 %v2651_v22  ;;  %vm2663_vm14 = vmor %vm2661_vm13, %vm2662_vm12  ;;  %vm2671_vm0 = vweird.f32 %v2651_v22 }
 0xdb5   : > { %v2657_v1 = vmul.f32 %v3638_v21, %v2656_v0 }
 0xdb7   : > { %v2658_v11 = vmul.f32 0.5, %v2657_v1  ;;  %v2638_v6 = vpop.xlane.xlu0 %2637 }
 0xdb8   : > { %v2647_v7 = vmul.f32 %v2638_v6, %v4003_v16 }
 0xdb9   : > { %v2659_v28 = vsub.f32 1.5, %v2658_v11 }
 0xdba   : > { %v3640_v9 = vpop.eup %3639  ;;  %v2652_v61 = vadd.f32 1e-05, %v2647_v7 }
 0xdbb   : > { %v2660_v50 = vmul.f32 %v3638_v21, %v2659_v28  ;;  %v2666_v14 = vmul.f32 %v3640_v9, %v2651_v22  ;;  %vm2672_vm15 = vweird.f32 %v3640_v9  ;;  %v3543_v28 = vld [vmem:[%s909_s0] ss:$0 sm:$0xff] }
 0xdbc   : > { %3641 = vrsqrt.f32 %v2652_v61  ;;  %vm2673_vm3 = vmor %vm2671_vm0, %vm2672_vm15  ;;  %vm2681_vm2 = vweird.f32 %v2652_v61 }
 0xdbd   : > { %v2667_v37 = vmul.f32 %v3640_v9, %v2666_v14  ;;  %v2664_v19 = vsel %vm2663_vm14, %v3638_v21, %v2660_v50  ;;  %v3490_v14 = vld [vmem:[%s3883_s14 + $0x10] sm:$0xff] }
 0xdbe   : > { %v2705_v39 = vmul.f32 %v2664_v19, %v4488_v13  ;;  %v3489_v19 = vld [vmem:[%s3883_s14 + $0x8] sm:$0xff] }
 0xdbf   : > { %v2668_v20 = vmul.f32 0.5, %v2667_v37  ;;  %v2641_v53 = vpop.xlane.xlu1 %2640 }
 0xdc0   : > { %v2648_v25 = vmul.f32 %v2641_v53, %v4003_v16  ;;  %v2713_v12 = vmul.f32 %v3541_v31, %v2705_v39 }
 0xdc1   : > { %v2669_v27 = vsub.f32 1.5, %v2668_v20 }
 0xdc2   : > { %v3642_v5 = vpop.eup %3641  ;;  %v2653_v2 = vadd.f32 1e-05, %v2648_v25  ;;  %v2721_v54 = vadd.f32 %v3542_v8, %v2713_v12  ;;  %v3488_v25 = vld [vmem:[%s3883_s14] sm:$0xff] }
 0xdc3   : > { %v2670_v56 = vmul.f32 %v3640_v9, %v2669_v27  ;;  %v2676_v4 = vmul.f32 %v3642_v5, %v2652_v61  ;;  %vm2682_vm4 = vweird.f32 %v3642_v5 }
 0xdc4   : > { %3643 = vrsqrt.f32 %v2653_v2  ;;  %vm2683_vm6 = vmor %vm2681_vm2, %vm2682_vm4  ;;  %vm2691_vm8 = vweird.f32 %v2653_v2 }
 0xdc5   : > { %v2674_v43 = vsel %vm2673_vm3, %v3640_v9, %v2670_v56  ;;  %v2677_v45 = vmul.f32 %v3642_v5, %v2676_v4  ;;  %v3491_v9 = vld [vmem:[%s3883_s14 + $0x18] sm:$0xff] }
 0xdc6   : > { %v2706_v41 = vmul.f32 %v2674_v43, %v4495_v17  ;;  %2939 = vmatpush.bf16.msra.mxu1 %v3491_v9 }
 0xdc7   : > { %v2678_v15 = vmul.f32 0.5, %v2677_v45  ;;  %v2644_v63 = vpop.xlane.xlu2 %2643 }
 0xdc8   : > { %v2714_v23 = vmul.f32 %v3541_v31, %v2706_v41  ;;  %v2649_v13 = vmul.f32 %v2644_v63, %v4003_v16 }
 0xdc9   : > { %v2679_v47 = vsub.f32 1.5, %v2678_v15 }
 0xdca   : > { %v3644_v51 = vpop.eup %3643  ;;  %v2722_v32 = vadd.f32 %v3542_v8, %v2714_v23  ;;  %v2654_v38 = vadd.f32 1e-05, %v2649_v13  ;;  %2940 = vmatpush.bf16.msra.mxu1 %v3490_v14 }
 0xdcb   : > { %v2680_v55 = vmul.f32 %v3642_v5, %v2679_v47  ;;  %v2686_v33 = vmul.f32 %v3644_v51, %v2653_v2  ;;  %vm2692_vm7 = vweird.f32 %v3644_v51 }
 0xdcc   : > { %v2726_v42 = vpack.c.bf16 %v2722_v32, %v2721_v54  ;;  %3645 = vrsqrt.f32 %v2654_v38  ;;  %vm2693_vm9 = vmor %vm2691_vm8, %vm2692_vm7  ;;  %vm2701_vm11 = vweird.f32 %v2654_v38  ;;  %vm2925_vm7 = vcmask 523264  }
 0xdcd   : > { %v2687_v49 = vmul.f32 %v3644_v51, %v2686_v33  ;;  %v2684_v17 = vsel %vm2683_vm6, %v3642_v5, %v2680_v55 }
 0xdce   : > { %3422 = vmatmul.msk.bf16.vlgmr.msra.gmra.mxu0 %vm1157_vm1, %v2726_v42  ;;  %v2707_v57 = vmul.f32 %v2684_v17, %v4502_v24  ;;  %2941 = vmatpush.bf16.msra.mxu1 %v3489_v19 }
 0xdcf   : > { %v2688_v44 = vmul.f32 0.5, %v2687_v49 }
 0xdd0   : > { %v2715_v26 = vmul.f32 %v3541_v31, %v2707_v57 }
 0xdd1   : > { %v2689_v35 = vsub.f32 1.5, %v2688_v44 }
 0xdd2   : > { %v3646_v16 = vpop.eup %3645  ;;  %v2723_v21 = vadd.f32 %v3542_v8, %v2715_v26  ;;  %2942 = vmatpush.bf16.msra.mxu1 %v3488_v25 }
 0xdd3   : > { %v2690_v59 = vmul.f32 %v3644_v51, %v2689_v35  ;;  %v2696_v60 = vmul.f32 %v3646_v16, %v2654_v38  ;;  %vm2702_vm10 = vweird.f32 %v3646_v16 }
 0xdd4   : > { %vm2703_vm12 = vmor %vm2701_vm11, %vm2702_vm10 }
 0xdd5   : > { %v2694_v34 = vsel %vm2693_vm9, %v3644_v51, %v2690_v59  ;;  %v2697_v36 = vmul.f32 %v3646_v16, %v2696_v60 }
 0xdd6   : > { %v2708_v62 = vmul.f32 %v2694_v34, %v4509_v58 }
 0xdd7   : > { %v2698_v18 = vmul.f32 0.5, %v2697_v36 }
 0xdd8   : > { %v2716_v52 = vmul.f32 %v3541_v31, %v2708_v62 }
 0xdd9   : > { %v2699_v30 = vsub.f32 1.5, %v2698_v18 }
 0xdda   : > { %v2724_v22 = vadd.f32 %v3542_v8, %v2716_v52 }
 0xddb   : > { %v2700_v0 = vmul.f32 %v3646_v16, %v2699_v30 }
 0xddc   : > { %v2727_v24 = vpack.c.bf16 %v2724_v22, %v2723_v21 }
 0xddd   : > { %v2704_v1 = vsel %vm2703_vm12, %v3646_v16, %v2700_v0 }
 0xdde   : > { %3423 = vmatmul.msk.bf16.gmra.mxu0 %vm1157_vm1, %v2727_v24  ;;  %v2709_v58 = vmul.f32 %v2704_v1, %v4516_v29 }
 0xde0   : > { %v2717_v11 = vmul.f32 %v3541_v31, %v2709_v58 }
 0xde2   : > { %v2725_v6 = vadd.f32 %v3542_v8, %v2717_v11 }
 0xde4   : > { %v2728_v7 = vpack.c.bf16 %v2725_v6, %v2725_v6 }
 0xdee   : > { %3424 = vmatmul.msk.bf16.gmra.mxu0 %vm1157_vm1, %v2728_v7 }
 0xe4b   : > { %v2767_v61 = vpop.f32.mrf.mxu0 }
 0xe4c   : > { %v4552_v50 = vadd.f32 %v3543_v28, %v2767_v61 }
 0xe4e   : > { %v3425_v37 = vmul.f32 -1.702, %v4552_v50 }
 0xe50   : > { %v2791_v29 = vmul.f32 1.442695, %v3425_v37 }
 0xe52   : > { %3647 = vpow2.f32 %v2791_v29 }
 0xe53   : > { %v2769_v20 = vpop.f32.mrf.mxu0 }
 0xe54   : > { %v4557_v53 = vadd.f32 %v3543_v28, %v2769_v20 }
 0xe56   : > { %v3426_v27 = vmul.f32 -1.702, %v4557_v53 }
 0xe58   : > { %v3648_v5 = vpop.eup %3647  ;;  %v2793_v31 = vmul.f32 1.442695, %v3426_v27 }
 0xe59   : > { %v2801_v39 = vadd.f32 1.0, %v3648_v5 }
 0xe5a   : > { %3649 = vpow2.f32 %v2793_v31 }
 0xe5b   : > { %3651 = vrcp.f32 %v2801_v39  ;;  %v2772_v2 = vpop.f32.mrf.mxu0  ;;  %v2817_v42 = vand.u32 2147483648, %v2801_v39  ;;  %vm2811_vm14 = vweird.f32 %v2801_v39  ;;  %v2815_v17 = vand.u32 2147483647, %v2801_v39 }
 0xe5c   : > { %v4561_v56 = vadd.f32 %v3543_v28, %v2772_v2 }
 0xe5d   : > { %v2818_v36 = vor.u32 1.1754944e-38, %v2817_v42  ;;  %vm2816_vm3 = vcmp.eq.f32.partialorder %v2815_v17, 8.507059e+37 }
 0xe5e   : > { %v3427_v4 = vmul.f32 -1.702, %v4561_v56 }
 0xe60   : > { %v3650_v43 = vpop.eup %3649  ;;  %v2795_v45 = vmul.f32 1.442695, %v3427_v4 }
 0xe61   : > { %v3652_v8 = vpop.eup %3651  ;;  %v2802_v12 = vadd.f32 1.0, %v3650_v43 }
 0xe62   : > { %v2807_v41 = vmul.f32 %v3652_v8, %v2801_v39  ;;  %3653 = vpow2.f32 %v2795_v45  ;;  %vm2812_vm13 = vweird.f32 %v3652_v8 }
 0xe63   : > { %3655 = vrcp.f32 %v2802_v12  ;;  %v2774_v15 = vpop.f32.mrf.mxu0  ;;  %vm2813_vm15 = vmor %vm2811_vm14, %vm2812_vm13  ;;  %v2830_v16 = vand.u32 2147483647, %v2802_v12  ;;  %v2832_v57 = vand.u32 2147483648, %v2802_v12  ;;  %vm2826_vm4 = vweird.f32 %v2802_v12 }
 0xe64   : > { %v2808_v63 = vsub.f32 1.0, %v2807_v41  ;;  %v4564_v23 = vadd.f32 %v3543_v28, %v2774_v15 }
 0xe65   : > { %v2833_v21 = vor.u32 1.1754944e-38, %v2832_v57  ;;  %vm2831_vm6 = vcmp.eq.f32.partialorder %v2830_v16, 8.507059e+37 }
 0xe66   : > { %v2809_v13 = vmul.f32 %v3652_v8, %v2808_v63  ;;  %v3428_v47 = vmul.f32 -1.702, %v4564_v23 }
 0xe68   : > { %v3654_v51 = vpop.eup %3653  ;;  %v2797_v54 = vmul.f32 1.442695, %v3428_v47  ;;  %v2810_v55 = vadd.f32 %v3652_v8, %v2809_v13 }
 0xe69   : > { %v3656_v32 = vpop.eup %3655  ;;  %v2803_v38 = vadd.f32 1.0, %v3654_v51 }
 0xe6a   : > { %v2822_v33 = vmul.f32 %v3656_v32, %v2802_v12  ;;  %3657 = vpow2.f32 %v2797_v54  ;;  %v2814_v59 = vsel %vm2813_vm15, %v3652_v8, %v2810_v55  ;;  %vm2827_vm0 = vweird.f32 %v3656_v32 }
 0xe6b   : > { %3659 = vrcp.f32 %v2803_v38  ;;  %v2777_v49 = vpop.f32.mrf.mxu0  ;;  %v2819_v30 = vsel %vm2816_vm3, %v2818_v36, %v2814_v59  ;;  %vm2828_vm2 = vmor %vm2826_vm4, %vm2827_vm0  ;;  %v2847_v20 = vand.u32 2147483648, %v2803_v38  ;;  %vm2841_vm9 = vweird.f32 %v2803_v38 }
 0xe6c   : > { %v2823_v44 = vsub.f32 1.0, %v2822_v33  ;;  %v4567_v35 = vadd.f32 %v3543_v28, %v2777_v49  ;;  %v2881_v11 = vmul.f32 %v2819_v30, %v4552_v50  ;;  %v2845_v25 = vand.u32 2147483647, %v2803_v38 }
 0xe6d   : > { %v2848_v39 = vor.u32 1.1754944e-38, %v2847_v20 }
 0xe6e   : > { %v2824_v60 = vmul.f32 %v3656_v32, %v2823_v44  ;;  %v3429_v34 = vmul.f32 -1.702, %v4567_v35  ;;  %vm2846_vm12 = vcmp.eq.f32.partialorder %v2845_v25, 8.507059e+37 }
 0xe70   : > { %v3658_v62 = vpop.eup %3657  ;;  %v2825_v26 = vadd.f32 %v3656_v32, %v2824_v60  ;;  %v2799_v18 = vmul.f32 1.442695, %v3429_v34 }
 0xe71   : > { %v3660_v52 = vpop.eup %3659  ;;  %v2804_v22 = vadd.f32 1.0, %v3658_v62 }
 0xe72   : > { %v2829_v0 = vsel %vm2828_vm2, %v3656_v32, %v2825_v26  ;;  %v2837_v24 = vmul.f32 %v3660_v52, %v2803_v38  ;;  %3661 = vpow2.f32 %v2799_v18  ;;  %vm2842_vm8 = vweird.f32 %v3660_v52 }
 0xe73   : > { %v2834_v1 = vsel %vm2831_vm6, %v2833_v21, %v2829_v0  ;;  %3663 = vrcp.f32 %v2804_v22  ;;  %v2779_v58 = vpop.f32.mrf.mxu0  ;;  %vm2843_vm10 = vmor %vm2841_vm9, %vm2842_vm8  ;;  %v2862_v50 = vand.u32 2147483648, %v2804_v22  ;;  %v2860_v31 = vand.u32 2147483647, %v2804_v22 }
 0xe74   : > { %v2882_v6 = vmul.f32 %v2834_v1, %v4557_v53  ;;  %v2838_v7 = vsub.f32 1.0, %v2837_v24  ;;  %vm2856_vm13 = vweird.f32 %v2804_v22 }
 0xe75   : > { %v2863_v45 = vor.u32 1.1754944e-38, %v2862_v50  ;;  %vm2861_vm15 = vcmp.eq.f32.partialorder %v2860_v31, 8.507059e+37 }
 0xe76   : > { %v2886_v28 = vpack.c.bf16 %v2882_v6, %v2881_v11  ;;  %v2839_v9 = vmul.f32 %v3660_v52, %v2838_v7 }
 0xe78   : > { %v3662_v61 = vpop.eup %3661  ;;  %3446 = vmatmul.msk.bf16.vlgmr.msra.gmra.mxu1 %vm2925_vm7, %v2886_v28  ;;  %v2840_v29 = vadd.f32 %v3660_v52, %v2839_v9 }
 0xe79   : > { %v3664_v14 = vpop.eup %3663  ;;  %v2805_v37 = vadd.f32 1.0, %v3662_v61 }
 0xe7a   : > { %v2852_v19 = vmul.f32 %v3664_v14, %v2804_v22  ;;  %v2844_v53 = vsel %vm2843_vm10, %v3660_v52, %v2840_v29  ;;  %vm2857_vm11 = vweird.f32 %v3664_v14 }
 0xe7b   : > { %3665 = vrcp.f32 %v2805_v37  ;;  %v2849_v43 = vsel %vm2846_vm12, %v2848_v39, %v2844_v53  ;;  %vm2858_vm14 = vmor %vm2856_vm13, %vm2857_vm11  ;;  %v2877_v32 = vand.u32 2147483648, %v2805_v37  ;;  %vm2871_vm3 = vweird.f32 %v2805_v37 }
 0xe7c   : > { %v2853_v27 = vsub.f32 1.0, %v2852_v19  ;;  %v2883_v15 = vmul.f32 %v2849_v43, %v4561_v56  ;;  %v2875_v38 = vand.u32 2147483647, %v2805_v37 }
 0xe7d   : > { %v2878_v33 = vor.u32 1.1754944e-38, %v2877_v32 }
 0xe7e   : > { %v2854_v5 = vmul.f32 %v3664_v14, %v2853_v27  ;;  %vm2876_vm2 = vcmp.eq.f32.partialorder %v2875_v38, 8.507059e+37 }
 0xe80   : > { %v2855_v2 = vadd.f32 %v3664_v14, %v2854_v5 }
 0xe81   : > { %v3666_v4 = vpop.eup %3665 }
 0xe82   : > { %v2859_v8 = vsel %vm2858_vm14, %v3664_v14, %v2855_v2  ;;  %v2867_v12 = vmul.f32 %v3666_v4, %v2805_v37  ;;  %vm2872_vm0 = vweird.f32 %v3666_v4 }
 0xe83   : > { %v2864_v41 = vsel %vm2861_vm15, %v2863_v45, %v2859_v8  ;;  %vm2873_vm4 = vmor %vm2871_vm3, %vm2872_vm0 }
 0xe84   : > { %v2884_v63 = vmul.f32 %v2864_v41, %v4564_v23  ;;  %v2868_v13 = vsub.f32 1.0, %v2867_v12  ;;  %v3544_v23 = vld [vmem:[%s4688_s7] ss:$0 sm:$0xff] }
 0xe86   : > { %v2887_v47 = vpack.c.bf16 %v2884_v63, %v2883_v15  ;;  %v2869_v51 = vmul.f32 %v3666_v4, %v2868_v13 }
 0xe88   : > { %v2870_v54 = vadd.f32 %v3666_v4, %v2869_v51  ;;  %3447 = vmatmul.msk.bf16.gmra.mxu1 %vm2925_vm7, %v2887_v47 }
 0xe8a   : > { %v2874_v55 = vsel %vm2873_vm4, %v3666_v4, %v2870_v54 }
 0xe8b   : > { %v2879_v42 = vsel %vm2876_vm2, %v2878_v33, %v2874_v55 }
 0xe8c   : > { %v2885_v56 = vmul.f32 %v2879_v42, %v4567_v35 }
 0xe8e   : > { %v2888_v49 = vpack.c.bf16 %v2885_v56, %v2885_v56 }
 0xe98   : > { %3448 = vmatmul.msk.bf16.gmra.mxu1 %vm2925_vm7, %v2888_v49 }
 0xef5   : > { %v2944_v17 = vpop.f32.mrf.mxu1 }
 0xef6   : > { %v2945_v44 = vadd.f32 %v3544_v23, %v2944_v17 }
 0xef8   : > { %v2958_v16 = vadd.f32 %v2945_v44, %v4450_v3 }
 0xefa   : > { %2963 = vst.msk [vmem:[%s4677_s3] sm:$0xff] %vm1157_vm1, %v2958_v16 }
 0xefd   : > { %v2946_v57 = vpop.f32.mrf.mxu1 }
 0xefe   : > { %v2947_v59 = vadd.f32 %v3544_v23, %v2946_v57 }
 0xf00   : > { %v2959_v35 = vadd.f32 %v2947_v59, %v4458_v10 }
 0xf02   : > { %2964 = vst.msk [vmem:[%s4677_s3 + $0x8] sm:$0xff] %vm1157_vm1, %v2959_v35 }
 0xf05   : > { %v2949_v60 = vpop.f32.mrf.mxu1 }
 0xf06   : > { %v2950_v34 = vadd.f32 %v3544_v23, %v2949_v60 }
 0xf08   : > { %v2960_v36 = vadd.f32 %v2950_v34, %v4466_v46 }
 0xf0a   : > { %2965 = vst.msk [vmem:[%s4677_s3 + $0x10] sm:$0xff] %vm1157_vm1, %v2960_v36 }
 0xf0d   : > { %v2951_v3 = vpop.f32.mrf.mxu1 }
 0xf0e   : > { %v2952_v62 = vadd.f32 %v3544_v23, %v2951_v3 }
 0xf10   : > { %v2961_v26 = vadd.f32 %v2952_v62, %v4474_v48 }
 0xf12   : > { %2966 = vst.msk [vmem:[%s4677_s3 + $0x18] sm:$0xff] %vm1157_vm1, %v2961_v26 }
 0xf15   : > { %v2954_v10 = vpop.f32.mrf.mxu1 }
 0xf16   : > { %v2955_v18 = vadd.f32 %v3544_v23, %v2954_v10 }
 0xf18   : > { %v2962_v52 = vadd.f32 %v2955_v18, %v4482_v40 }
 0xf1a   : > { %2967 = vst.msk [vmem:[%s4677_s3 + $0x20] sm:$0x3] %vm1170_vm5, %v2962_v52 }
 0xf1d   : > { %v2956_v46 = vpop.f32.mrf.mxu1 }
 0xf1e PF: > { %s4689_s12 = sld [smem:[#allocation2_spill]] }
 0xf24   : > { %s32_s3 = sadd.s32 1, %s4689_s12  }
 0xf25   : > { %p29_p5 = scmp.ge.s32.totalorder %s32_s3, 4  }
 0xf27   :  { %31 = sbr.rel (!%p29_p5) target bundleno = 17 (0x11), region = 204 }

</bundles_post_ra>
